<compile_context>
chip_gen: v7x
topology: tpu7x:2x2x1
jax: 0.10.0
libtpu: 0.0.40
codegen_flags: <defaults>
</compile_context>

<pallas_src>
import jax
import jax.numpy as jnp
from jax.experimental import pallas as pl
from jax.experimental.pallas import tpu as pltpu


def _round_up(v, m):
    return -(-v // m) * m


def _padded_bytes(shape, dtype_bytes):
    """Lane/sublane-padded VMEM bytes for an array of `shape`."""
    s = list(shape)
    s[-1] = _round_up(s[-1], 128)
    if len(s) >= 2:
        s[-2] = _round_up(s[-2], 8 * (4 // dtype_bytes))
    n = 1
    for d in s:
        n *= d
    return n * dtype_bytes


def _vmem_bytes_estimate(tile_b, L4, hp, ncp):
    C1, C2 = 32, 64
    f32, bf16 = 4, 2
    # Pipeline buffers: Pallas double-buffers every blocked input/output,
    # including the resident (constant index_map) weights -> count them x2.
    io = 2 * (_padded_bytes((11, tile_b, L4), f32)
              + _padded_bytes((tile_b, ncp), f32))
    weights = 2 * (_padded_bytes((5, C1, 1), f32) + _padded_bytes((C1, 1), f32)
                   + _padded_bytes((5, C1, C2), bf16) + _padded_bytes((1, 1, C2), f32)
                   + _padded_bytes((L4 * C2, hp), bf16) + _padded_bytes((1, hp), f32)
                   + _padded_bytes((hp, ncp), bf16) + _padded_bytes((1, ncp), f32))
    # Approximate peak in-kernel live set.
    conv1 = 4 * _padded_bytes((tile_b, C1, L4), f32)
    conv2 = (6 * _padded_bytes((tile_b, L4, C1), bf16)
             + 3 * _padded_bytes((tile_b, L4, C2), f32))
    fc = (_padded_bytes((tile_b, L4 * C2), bf16)
          + _padded_bytes((tile_b, L4 * C2), f32)
          + 2 * _padded_bytes((tile_b, hp), f32))
    return io + weights + conv1 + conv2 + fc


def _vmem_capacity_bytes():
    try:
        return int(pltpu.get_tpu_info().vmem_capacity_bytes)
    except Exception:
        return 64 * 2**20  # conservative: v7x per-TensorCore VMEM


def _fingerprint_kernel(
    xs_ref,      # (11, TB, L4) f32   phase slabs of x (see wrapper)
    w1_ref,      # (5, 32, 1)  f32    conv1 weight per tap, channel on sublane
    b1_ref,      # (32, 1)     f32
    w2_ref,      # (5, 32, 64) bf16   conv2 weight per tap, (c, o)
    b2_ref,      # (1, 1, 64)  f32
    wfc1_ref,    # (L4*64, Hp) bf16   fc1 weight, position-major flatten order
    bfc1_ref,    # (1, Hp)     f32
    wfc2_ref,    # (Hp, NCp)   bf16   fc2 weight, zero-padded classes
    bfc2_ref,    # (1, NCp)    f32
    out_ref,     # (TB, NCp)   f32    padded logits
):
    _, TB, L4 = xs_ref.shape
    C1 = w1_ref.shape[1]     # 32
    C2 = w2_ref.shape[2]     # 64

    b1 = b1_ref[...][None]                                   # (1, C1, 1)

    def conv1_relu(tap_ids):
        # Lane-dense VPU conv1: 5 broadcast FMAs over (TB, C1, L4).
        acc = xs_ref[tap_ids[0]][:, None, :] * w1_ref[0][None]
        for k in range(1, 5):
            acc = acc + xs_ref[tap_ids[k]][:, None, :] * w1_ref[k][None]
        return jnp.maximum(acc + b1, 0.0)                     # (TB, C1, L4)

    # Slab indices: 0..7 -> x[8m+j]; 8 -> x[8m-2]; 9 -> x[8m-1]; 10 -> x[8m+8].
    # conv1 (k=5, s=2, p=2) outputs at positions 4m+{0,1,2,3}; pool1 (k=2, s=2)
    # pairs them into even (pe = pool1[2m]) / odd (po = pool1[2m+1]) slabs.
    pe = jnp.maximum(conv1_relu((8, 9, 0, 1, 2)), conv1_relu((0, 1, 2, 3, 4)))
    po = jnp.maximum(conv1_relu((2, 3, 4, 5, 6)), conv1_relu((4, 5, 6, 7, 10)))

    # Single relayout: channels -> lanes, positions -> sublanes; bf16 for MXU.
    pe_t = jnp.transpose(pe, (0, 2, 1)).astype(jnp.bfloat16)  # (TB, L4, C1)
    po_t = jnp.transpose(po, (0, 2, 1)).astype(jnp.bfloat16)

    zrow = jnp.zeros((TB, 1, C1), jnp.bfloat16)
    pe_pad = jnp.concatenate([zrow, pe_t, zrow], axis=1)      # (TB, L4+2, C1)
    po_pad = jnp.concatenate([zrow, po_t, zrow], axis=1)
    pe_m1 = pe_pad[:, 0:L4, :]          # pool1[2m-2]
    pe_p1 = pe_pad[:, 2:L4 + 2, :]      # pool1[2m+2]
    po_m1 = po_pad[:, 0:L4, :]          # pool1[2m-1]
    po_p1 = po_pad[:, 2:L4 + 2, :]      # pool1[2m+3]

    def dot_tap(a, k):
        return jnp.dot(a, w2_ref[k], preferred_element_type=jnp.float32)

    # conv2 (k=5, s=1, p=2), split by output-position parity so pool2 is one
    # elementwise max; K=32 accumulating matmuls avoid the 5x tap-concat dup.
    h2e = (dot_tap(pe_m1, 0) + dot_tap(po_m1, 1) + dot_tap(pe_t, 2)
           + dot_tap(po_t, 3) + dot_tap(pe_p1, 4))            # (TB, L4, C2)
    h2o = (dot_tap(po_m1, 0) + dot_tap(pe_t, 1) + dot_tap(po_t, 2)
           + dot_tap(pe_p1, 3) + dot_tap(po_p1, 4))
    b2 = b2_ref[...]
    h2e = jnp.maximum(h2e + b2, 0.0)
    h2o = jnp.maximum(h2o + b2, 0.0)
    pool2 = jnp.maximum(h2e, h2o)                             # (TB, L4, C2)

    # Flatten position-major (fc1 weight pre-permuted in the wrapper) + fc1.
    flat = pool2.astype(jnp.bfloat16).reshape(TB, L4 * C2)
    z1 = jnp.dot(flat, wfc1_ref[...], preferred_element_type=jnp.float32)
    z1 = jnp.maximum(z1 + bfc1_ref[...], 0.0)                 # (TB, Hp)

    # dropout(0.5): identity in eval/inference mode.
    # TODO(synk): training-mode dropout (PRNG masking) not implemented.

    logits = jnp.dot(z1.astype(jnp.bfloat16), wfc2_ref[...],
                     preferred_element_type=jnp.float32)
    out_ref[...] = (logits + bfc2_ref[...]).astype(out_ref.dtype)


def fingerprint_classifier(x, params, hidden_size, num_classes, tile_b=None):
    """x: (B, input_size) float32. Returns logits (B, num_classes)."""
    B, N = x.shape
    assert N % 8 == 0, "input_size must be divisible by 8 (matches // 8 in the module)"
    L4 = N // 8
    C1, C2 = 32, 64
    Hp = _round_up(hidden_size, 128)
    NCp = _round_up(num_classes, 128)

    # ---- batch tiling from the chip's VMEM capacity ----
    cap = _vmem_capacity_bytes()
    if tile_b is None:
        tile_b = min(256, _round_up(B, 8))
        while tile_b > 8 and _vmem_bytes_estimate(tile_b, L4, Hp, NCp) > 0.45 * cap:
            tile_b //= 2
        if B >= 16:  # keep >=2 grid steps so v7x's 2 TensorCores both get work
            tile_b = min(tile_b, _round_up(-(-B // 2), 8))
    tile_b = max(8, (tile_b // 8) * 8)
    B_pad = _round_up(B, tile_b)
    if B_pad != B:
        x = jnp.pad(x, ((0, B_pad - B), (0, 0)))

    # ---- input layout: 11 phase slabs, positions (L4) on the lane axis ----
    xr = x.reshape(B_pad, L4, 8)
    ph = jnp.transpose(xr, (2, 0, 1))                        # (8, B_pad, L4)
    zcol = jnp.zeros((B_pad, 1), x.dtype)
    r6m1 = jnp.concatenate([zcol, ph[6, :, :L4 - 1]], axis=1)   # x[8m-2]
    r7m1 = jnp.concatenate([zcol, ph[7, :, :L4 - 1]], axis=1)   # x[8m-1]
    r0p1 = jnp.concatenate([ph[0, :, 1:], zcol], axis=1)        # x[8m+8]
    xs = jnp.concatenate([ph, r6m1[None], r7m1[None], r0p1[None]], axis=0)

    # ---- weight layout plumbing (bf16 MXU operands, padded lane-dense FC) ----
    f32, bf16 = jnp.float32, jnp.bfloat16
    w1p = jnp.transpose(params["conv1_w"][:, 0, :], (1, 0))[:, :, None].astype(f32)
    b1p = params["conv1_b"].reshape(C1, 1).astype(f32)
    w2r = jnp.transpose(params["conv2_w"], (2, 1, 0)).astype(bf16)   # (5, 32, 64)
    b2r = params["conv2_b"].reshape(1, 1, C2).astype(f32)
    # PyTorch flattens (B, 64, L4) channel-major (j = c*L4 + m); the kernel
    # flattens position-major (j' = m*64 + c) -> permute fc1 weight.
    wfc1 = (params["fc1_w"].reshape(hidden_size, C2, L4)
            .transpose(0, 2, 1).reshape(hidden_size, L4 * C2).T)     # (L4*64, H)
    wfc1p = jnp.zeros((L4 * C2, Hp), bf16).at[:, :hidden_size].set(wfc1.astype(bf16))
    bfc1r = jnp.zeros((1, Hp), f32).at[:, :hidden_size].set(params["fc1_b"][None, :])
    wfc2p = jnp.zeros((Hp, NCp), bf16).at[:hidden_size, :num_classes].set(
        params["fc2_w"].T.astype(bf16))
    bfc2r = jnp.zeros((1, NCp), f32).at[:, :num_classes].set(params["fc2_b"][None, :])

    est = _vmem_bytes_estimate(tile_b, L4, Hp, NCp)
    vmem_limit = int(min(0.9 * cap, max(1.3 * est, 32 * 2**20)))
    # TODO(synk): for very large input_size/hidden_size (wfc1 > ~25% of VMEM,
    # esp. on v7x's 64 MiB), add a trailing 'arbitrary' grid axis over fc1's K
    # with a (tile_b, Hp) accumulator instead of keeping wfc1 fully resident.

    grid = (B_pad // tile_b,)
    out = pl.pallas_call(
        _fingerprint_kernel,
        out_shape=jax.ShapeDtypeStruct((B_pad, NCp), jnp.float32),
        grid=grid,
        in_specs=[
            pl.BlockSpec((11, tile_b, L4), lambda i: (0, i, 0)),     # x slabs
            pl.BlockSpec((5, C1, 1), lambda i: (0, 0, 0)),           # conv1 w
            pl.BlockSpec((C1, 1), lambda i: (0, 0)),                 # conv1 b
            pl.BlockSpec((5, C1, C2), lambda i: (0, 0, 0)),          # conv2 w
            pl.BlockSpec((1, 1, C2), lambda i: (0, 0, 0)),           # conv2 b
            pl.BlockSpec((L4 * C2, Hp), lambda i: (0, 0)),           # fc1 w
            pl.BlockSpec((1, Hp), lambda i: (0, 0)),                 # fc1 b
            pl.BlockSpec((Hp, NCp), lambda i: (0, 0)),               # fc2 w
            pl.BlockSpec((1, NCp), lambda i: (0, 0)),                # fc2 b
        ],
        out_specs=pl.BlockSpec((tile_b, NCp), lambda i: (i, 0)),
        compiler_params=pltpu.CompilerParams(
            dimension_semantics=("parallel",),
            vmem_limit_bytes=vmem_limit,
        ),
    )(xs, w1p, b1p, w2r, b2r, wfc1p, bfc1r, wfc2p, bfc2r)

    return out[:B, :num_classes]


def init_params(key, input_size, hidden_size, num_classes):
    ks = jax.random.split(key, 8)
    rnd = lambda k, shape, s: s * jax.random.normal(k, shape, jnp.float32)
    fc_in = (input_size // 8) * 64
    return dict(
        conv1_w=rnd(ks[0], (32, 1, 5), 0.30),
        conv1_b=rnd(ks[1], (32,), 0.10),
        conv2_w=rnd(ks[2], (64, 32, 5), 0.08),
        conv2_b=rnd(ks[3], (64,), 0.10),
        fc1_w=rnd(ks[4], (hidden_size, fc_in), 0.04),
        fc1_b=rnd(ks[5], (hidden_size,), 0.10),
        fc2_w=rnd(ks[6], (num_classes, hidden_size), 0.15),
        fc2_b=rnd(ks[7], (num_classes,), 0.10),
    )


def reference(x, params):
    """Pure-JAX NCL reference mirroring the PyTorch forward (eval mode)."""
    HIGH = jax.lax.Precision.HIGHEST
    B, N = x.shape
    L4 = N // 8
    xc = x[:, None, :]                                             # (B, 1, N)
    h = jax.lax.conv_general_dilated(
        xc, params["conv1_w"], (2,), [(2, 2)],
        dimension_numbers=("NCH", "OIH", "NCH"), precision=HIGH)
    h = jax.nn.relu(h + params["conv1_b"][None, :, None])          # (B, 32, N/2)
    h = h.reshape(B, 32, N // 4, 2).max(-1)                        # maxpool1
    h2 = jax.lax.conv_general_dilated(
        h, params["conv2_w"], (1,), [(2, 2)],
        dimension_numbers=("NCH", "OIH", "NCH"), precision=HIGH)
    h2 = jax.nn.relu(h2 + params["conv2_b"][None, :, None])        # (B, 64, N/4)
    h2 = h2.reshape(B, 64, L4, 2).max(-1)                          # maxpool2
    flat = h2.reshape(B, 64 * L4)
    z1 = jax.nn.relu(flat @ params["fc1_w"].T + params["fc1_b"])
    return z1 @ params["fc2_w"].T + params["fc2_b"]


if __name__ == "__main__":
    input_size, hidden_size, num_classes, batch = 64, 32, 8, 2

    key = jax.random.PRNGKey(0)
    k_x, k_p = jax.random.split(key)
    x = jax.random.normal(k_x, (batch, input_size), jnp.float32)
    params = init_params(k_p, input_size, hidden_size, num_classes)

    out = fingerprint_classifier(x, params, hidden_size, num_classes)
    out = jax.block_until_ready(out)

    ref = jax.block_until_ready(reference(x, params))
    assert out.shape == (batch, num_classes)
    # bf16 MXU operands (f32 accumulation) vs a HIGHEST-precision reference.
    assert bool(jnp.allclose(out, ref, atol=5e-2, rtol=5e-2)), "mismatch vs reference"

    print("KERNEL_OK")
</pallas_src>

<mosaic_0001>
module attributes {stable_mosaic.version = 11 : i64} {
  func.func @_fingerprint_kernel(%arg0: i32, %arg1: memref<11x8x8xf32, #tpu.memory_space<vmem>>, %arg2: memref<5x32x1xf32, #tpu.memory_space<vmem>>, %arg3: memref<32x1xf32, #tpu.memory_space<vmem>>, %arg4: memref<5x32x64xbf16, #tpu.memory_space<vmem>>, %arg5: memref<1x1x64xf32, #tpu.memory_space<vmem>>, %arg6: memref<512x128xbf16, #tpu.memory_space<vmem>>, %arg7: memref<1x128xf32, #tpu.memory_space<vmem>>, %arg8: memref<128x128xbf16, #tpu.memory_space<vmem>>, %arg9: memref<1x128xf32, #tpu.memory_space<vmem>>, %arg10: memref<8x128xf32, #tpu.memory_space<vmem>>) attributes {dimension_semantics = [#tpu.dimension_semantics<parallel>], iteration_bounds = array<i64: 1>, scalar_prefetch = 0 : i64, scratch_operands = 0 : i64, tpu.core_type = #tpu.core_type<tc>, window_params = [{transform_indices = @transform_0, window_bounds = array<i64: 11, 8, 8>}, {pipeline_mode = #tpu.pipeline_mode<synchronous>, transform_indices = @transform_1, window_bounds = array<i64: 5, 32, 1>}, {pipeline_mode = #tpu.pipeline_mode<synchronous>, transform_indices = @transform_2, window_bounds = array<i64: 32, 1>}, {pipeline_mode = #tpu.pipeline_mode<synchronous>, transform_indices = @transform_3, window_bounds = array<i64: 5, 32, 64>}, {pipeline_mode = #tpu.pipeline_mode<synchronous>, transform_indices = @transform_4, window_bounds = array<i64: 1, 1, 64>}, {pipeline_mode = #tpu.pipeline_mode<synchronous>, transform_indices = @transform_5, window_bounds = array<i64: 512, 128>}, {pipeline_mode = #tpu.pipeline_mode<synchronous>, transform_indices = @transform_6, window_bounds = array<i64: 1, 128>}, {pipeline_mode = #tpu.pipeline_mode<synchronous>, transform_indices = @transform_7, window_bounds = array<i64: 128, 128>}, {pipeline_mode = #tpu.pipeline_mode<synchronous>, transform_indices = @transform_8, window_bounds = array<i64: 1, 128>}, {transform_indices = @transform_9, window_bounds = array<i64: 8, 128>}]} {
    %c0 = arith.constant 0 : index
    %c0_0 = arith.constant 0 : index
    %0 = vector.load %arg3[%c0, %c0_0] : memref<32x1xf32, #tpu.memory_space<vmem>>, vector<32x1xf32>
    %1 = vector.shape_cast %0 : vector<32x1xf32> to vector<1x32x1xf32>
    %c8 = arith.constant 8 : index
    %c0_1 = arith.constant 0 : index
    %c0_2 = arith.constant 0 : index
    %2 = vector.load %arg1[%c8, %c0_1, %c0_2] : memref<11x8x8xf32, #tpu.memory_space<vmem>>, vector<1x8x8xf32>
    %3 = vector.shape_cast %2 : vector<1x8x8xf32> to vector<8x8xf32>
    %4 = vector.shape_cast %3 : vector<8x8xf32> to vector<8x1x8xf32>
    %c0_3 = arith.constant 0 : index
    %c0_4 = arith.constant 0 : index
    %c0_5 = arith.constant 0 : index
    %5 = vector.load %arg2[%c0_3, %c0_4, %c0_5] : memref<5x32x1xf32, #tpu.memory_space<vmem>>, vector<1x32x1xf32>
    %6 = vector.shape_cast %5 : vector<1x32x1xf32> to vector<32x1xf32>
    %7 = vector.shape_cast %6 : vector<32x1xf32> to vector<1x32x1xf32>
    %8 = vector.broadcast %4 : vector<8x1x8xf32> to vector<8x32x8xf32>
    %9 = vector.broadcast %7 : vector<1x32x1xf32> to vector<8x32x8xf32>
    %10 = arith.mulf %8, %9 : vector<8x32x8xf32>
    %c9 = arith.constant 9 : index
    %c0_6 = arith.constant 0 : index
    %c0_7 = arith.constant 0 : index
    %11 = vector.load %arg1[%c9, %c0_6, %c0_7] : memref<11x8x8xf32, #tpu.memory_space<vmem>>, vector<1x8x8xf32>
    %12 = vector.shape_cast %11 : vector<1x8x8xf32> to vector<8x8xf32>
    %13 = vector.shape_cast %12 : vector<8x8xf32> to vector<8x1x8xf32>
    %c1 = arith.constant 1 : index
    %c0_8 = arith.constant 0 : index
    %c0_9 = arith.constant 0 : index
    %14 = vector.load %arg2[%c1, %c0_8, %c0_9] : memref<5x32x1xf32, #tpu.memory_space<vmem>>, vector<1x32x1xf32>
    %15 = vector.shape_cast %14 : vector<1x32x1xf32> to vector<32x1xf32>
    %16 = vector.shape_cast %15 : vector<32x1xf32> to vector<1x32x1xf32>
    %17 = vector.broadcast %13 : vector<8x1x8xf32> to vector<8x32x8xf32>
    %18 = vector.broadcast %16 : vector<1x32x1xf32> to vector<8x32x8xf32>
    %19 = arith.mulf %17, %18 : vector<8x32x8xf32>
    %20 = arith.addf %10, %19 : vector<8x32x8xf32>
    %c0_10 = arith.constant 0 : index
    %c0_11 = arith.constant 0 : index
    %c0_12 = arith.constant 0 : index
    %21 = vector.load %arg1[%c0_10, %c0_11, %c0_12] : memref<11x8x8xf32, #tpu.memory_space<vmem>>, vector<1x8x8xf32>
    %22 = vector.shape_cast %21 : vector<1x8x8xf32> to vector<8x8xf32>
    %23 = vector.shape_cast %22 : vector<8x8xf32> to vector<8x1x8xf32>
    %c2 = arith.constant 2 : index
    %c0_13 = arith.constant 0 : index
    %c0_14 = arith.constant 0 : index
    %24 = vector.load %arg2[%c2, %c0_13, %c0_14] : memref<5x32x1xf32, #tpu.memory_space<vmem>>, vector<1x32x1xf32>
    %25 = vector.shape_cast %24 : vector<1x32x1xf32> to vector<32x1xf32>
    %26 = vector.shape_cast %25 : vector<32x1xf32> to vector<1x32x1xf32>
    %27 = vector.broadcast %23 : vector<8x1x8xf32> to vector<8x32x8xf32>
    %28 = vector.broadcast %26 : vector<1x32x1xf32> to vector<8x32x8xf32>
    %29 = arith.mulf %27, %28 : vector<8x32x8xf32>
    %30 = arith.addf %20, %29 : vector<8x32x8xf32>
    %c1_15 = arith.constant 1 : index
    %c0_16 = arith.constant 0 : index
    %c0_17 = arith.constant 0 : index
    %31 = vector.load %arg1[%c1_15, %c0_16, %c0_17] : memref<11x8x8xf32, #tpu.memory_space<vmem>>, vector<1x8x8xf32>
    %32 = vector.shape_cast %31 : vector<1x8x8xf32> to vector<8x8xf32>
    %33 = vector.shape_cast %32 : vector<8x8xf32> to vector<8x1x8xf32>
    %c3 = arith.constant 3 : index
    %c0_18 = arith.constant 0 : index
    %c0_19 = arith.constant 0 : index
    %34 = vector.load %arg2[%c3, %c0_18, %c0_19] : memref<5x32x1xf32, #tpu.memory_space<vmem>>, vector<1x32x1xf32>
    %35 = vector.shape_cast %34 : vector<1x32x1xf32> to vector<32x1xf32>
    %36 = vector.shape_cast %35 : vector<32x1xf32> to vector<1x32x1xf32>
    %37 = vector.broadcast %33 : vector<8x1x8xf32> to vector<8x32x8xf32>
    %38 = vector.broadcast %36 : vector<1x32x1xf32> to vector<8x32x8xf32>
    %39 = arith.mulf %37, %38 : vector<8x32x8xf32>
    %40 = arith.addf %30, %39 : vector<8x32x8xf32>
    %c2_20 = arith.constant 2 : index
    %c0_21 = arith.constant 0 : index
    %c0_22 = arith.constant 0 : index
    %41 = vector.load %arg1[%c2_20, %c0_21, %c0_22] : memref<11x8x8xf32, #tpu.memory_space<vmem>>, vector<1x8x8xf32>
    %42 = vector.shape_cast %41 : vector<1x8x8xf32> to vector<8x8xf32>
    %43 = vector.shape_cast %42 : vector<8x8xf32> to vector<8x1x8xf32>
    %c4 = arith.constant 4 : index
    %c0_23 = arith.constant 0 : index
    %c0_24 = arith.constant 0 : index
    %44 = vector.load %arg2[%c4, %c0_23, %c0_24] : memref<5x32x1xf32, #tpu.memory_space<vmem>>, vector<1x32x1xf32>
    %45 = vector.shape_cast %44 : vector<1x32x1xf32> to vector<32x1xf32>
    %46 = vector.shape_cast %45 : vector<32x1xf32> to vector<1x32x1xf32>
    %47 = vector.broadcast %43 : vector<8x1x8xf32> to vector<8x32x8xf32>
    %48 = vector.broadcast %46 : vector<1x32x1xf32> to vector<8x32x8xf32>
    %49 = arith.mulf %47, %48 : vector<8x32x8xf32>
    %50 = arith.addf %40, %49 : vector<8x32x8xf32>
    %51 = vector.broadcast %1 : vector<1x32x1xf32> to vector<8x32x8xf32>
    %52 = arith.addf %50, %51 : vector<8x32x8xf32>
    %cst = arith.constant 0.000000e+00 : f32
    %53 = vector.broadcast %cst : f32 to vector<8x32x8xf32>
    %54 = arith.maximumf %52, %53 : vector<8x32x8xf32>
    %c0_25 = arith.constant 0 : index
    %c0_26 = arith.constant 0 : index
    %c0_27 = arith.constant 0 : index
    %55 = vector.load %arg1[%c0_25, %c0_26, %c0_27] : memref<11x8x8xf32, #tpu.memory_space<vmem>>, vector<1x8x8xf32>
    %56 = vector.shape_cast %55 : vector<1x8x8xf32> to vector<8x8xf32>
    %57 = vector.shape_cast %56 : vector<8x8xf32> to vector<8x1x8xf32>
    %c0_28 = arith.constant 0 : index
    %c0_29 = arith.constant 0 : index
    %c0_30 = arith.constant 0 : index
    %58 = vector.load %arg2[%c0_28, %c0_29, %c0_30] : memref<5x32x1xf32, #tpu.memory_space<vmem>>, vector<1x32x1xf32>
    %59 = vector.shape_cast %58 : vector<1x32x1xf32> to vector<32x1xf32>
    %60 = vector.shape_cast %59 : vector<32x1xf32> to vector<1x32x1xf32>
    %61 = vector.broadcast %57 : vector<8x1x8xf32> to vector<8x32x8xf32>
    %62 = vector.broadcast %60 : vector<1x32x1xf32> to vector<8x32x8xf32>
    %63 = arith.mulf %61, %62 : vector<8x32x8xf32>
    %c1_31 = arith.constant 1 : index
    %c0_32 = arith.constant 0 : index
    %c0_33 = arith.constant 0 : index
    %64 = vector.load %arg1[%c1_31, %c0_32, %c0_33] : memref<11x8x8xf32, #tpu.memory_space<vmem>>, vector<1x8x8xf32>
    %65 = vector.shape_cast %64 : vector<1x8x8xf32> to vector<8x8xf32>
    %66 = vector.shape_cast %65 : vector<8x8xf32> to vector<8x1x8xf32>
    %c1_34 = arith.constant 1 : index
    %c0_35 = arith.constant 0 : index
    %c0_36 = arith.constant 0 : index
    %67 = vector.load %arg2[%c1_34, %c0_35, %c0_36] : memref<5x32x1xf32, #tpu.memory_space<vmem>>, vector<1x32x1xf32>
    %68 = vector.shape_cast %67 : vector<1x32x1xf32> to vector<32x1xf32>
    %69 = vector.shape_cast %68 : vector<32x1xf32> to vector<1x32x1xf32>
    %70 = vector.broadcast %66 : vector<8x1x8xf32> to vector<8x32x8xf32>
    %71 = vector.broadcast %69 : vector<1x32x1xf32> to vector<8x32x8xf32>
    %72 = arith.mulf %70, %71 : vector<8x32x8xf32>
    %73 = arith.addf %63, %72 : vector<8x32x8xf32>
    %c2_37 = arith.constant 2 : index
    %c0_38 = arith.constant 0 : index
    %c0_39 = arith.constant 0 : index
    %74 = vector.load %arg1[%c2_37, %c0_38, %c0_39] : memref<11x8x8xf32, #tpu.memory_space<vmem>>, vector<1x8x8xf32>
    %75 = vector.shape_cast %74 : vector<1x8x8xf32> to vector<8x8xf32>
    %76 = vector.shape_cast %75 : vector<8x8xf32> to vector<8x1x8xf32>
    %c2_40 = arith.constant 2 : index
    %c0_41 = arith.constant 0 : index
    %c0_42 = arith.constant 0 : index
    %77 = vector.load %arg2[%c2_40, %c0_41, %c0_42] : memref<5x32x1xf32, #tpu.memory_space<vmem>>, vector<1x32x1xf32>
    %78 = vector.shape_cast %77 : vector<1x32x1xf32> to vector<32x1xf32>
    %79 = vector.shape_cast %78 : vector<32x1xf32> to vector<1x32x1xf32>
    %80 = vector.broadcast %76 : vector<8x1x8xf32> to vector<8x32x8xf32>
    %81 = vector.broadcast %79 : vector<1x32x1xf32> to vector<8x32x8xf32>
    %82 = arith.mulf %80, %81 : vector<8x32x8xf32>
    %83 = arith.addf %73, %82 : vector<8x32x8xf32>
    %c3_43 = arith.constant 3 : index
    %c0_44 = arith.constant 0 : index
    %c0_45 = arith.constant 0 : index
    %84 = vector.load %arg1[%c3_43, %c0_44, %c0_45] : memref<11x8x8xf32, #tpu.memory_space<vmem>>, vector<1x8x8xf32>
    %85 = vector.shape_cast %84 : vector<1x8x8xf32> to vector<8x8xf32>
    %86 = vector.shape_cast %85 : vector<8x8xf32> to vector<8x1x8xf32>
    %c3_46 = arith.constant 3 : index
    %c0_47 = arith.constant 0 : index
    %c0_48 = arith.constant 0 : index
    %87 = vector.load %arg2[%c3_46, %c0_47, %c0_48] : memref<5x32x1xf32, #tpu.memory_space<vmem>>, vector<1x32x1xf32>
    %88 = vector.shape_cast %87 : vector<1x32x1xf32> to vector<32x1xf32>
    %89 = vector.shape_cast %88 : vector<32x1xf32> to vector<1x32x1xf32>
    %90 = vector.broadcast %86 : vector<8x1x8xf32> to vector<8x32x8xf32>
    %91 = vector.broadcast %89 : vector<1x32x1xf32> to vector<8x32x8xf32>
    %92 = arith.mulf %90, %91 : vector<8x32x8xf32>
    %93 = arith.addf %83, %92 : vector<8x32x8xf32>
    %c4_49 = arith.constant 4 : index
    %c0_50 = arith.constant 0 : index
    %c0_51 = arith.constant 0 : index
    %94 = vector.load %arg1[%c4_49, %c0_50, %c0_51] : memref<11x8x8xf32, #tpu.memory_space<vmem>>, vector<1x8x8xf32>
    %95 = vector.shape_cast %94 : vector<1x8x8xf32> to vector<8x8xf32>
    %96 = vector.shape_cast %95 : vector<8x8xf32> to vector<8x1x8xf32>
    %c4_52 = arith.constant 4 : index
    %c0_53 = arith.constant 0 : index
    %c0_54 = arith.constant 0 : index
    %97 = vector.load %arg2[%c4_52, %c0_53, %c0_54] : memref<5x32x1xf32, #tpu.memory_space<vmem>>, vector<1x32x1xf32>
    %98 = vector.shape_cast %97 : vector<1x32x1xf32> to vector<32x1xf32>
    %99 = vector.shape_cast %98 : vector<32x1xf32> to vector<1x32x1xf32>
    %100 = vector.broadcast %96 : vector<8x1x8xf32> to vector<8x32x8xf32>
    %101 = vector.broadcast %99 : vector<1x32x1xf32> to vector<8x32x8xf32>
    %102 = arith.mulf %100, %101 : vector<8x32x8xf32>
    %103 = arith.addf %93, %102 : vector<8x32x8xf32>
    %104 = vector.broadcast %1 : vector<1x32x1xf32> to vector<8x32x8xf32>
    %105 = arith.addf %103, %104 : vector<8x32x8xf32>
    %cst_55 = arith.constant 0.000000e+00 : f32
    %106 = vector.broadcast %cst_55 : f32 to vector<8x32x8xf32>
    %107 = arith.maximumf %105, %106 : vector<8x32x8xf32>
    %108 = arith.maximumf %54, %107 : vector<8x32x8xf32>
    %c2_56 = arith.constant 2 : index
    %c0_57 = arith.constant 0 : index
    %c0_58 = arith.constant 0 : index
    %109 = vector.load %arg1[%c2_56, %c0_57, %c0_58] : memref<11x8x8xf32, #tpu.memory_space<vmem>>, vector<1x8x8xf32>
    %110 = vector.shape_cast %109 : vector<1x8x8xf32> to vector<8x8xf32>
    %111 = vector.shape_cast %110 : vector<8x8xf32> to vector<8x1x8xf32>
    %c0_59 = arith.constant 0 : index
    %c0_60 = arith.constant 0 : index
    %c0_61 = arith.constant 0 : index
    %112 = vector.load %arg2[%c0_59, %c0_60, %c0_61] : memref<5x32x1xf32, #tpu.memory_space<vmem>>, vector<1x32x1xf32>
    %113 = vector.shape_cast %112 : vector<1x32x1xf32> to vector<32x1xf32>
    %114 = vector.shape_cast %113 : vector<32x1xf32> to vector<1x32x1xf32>
    %115 = vector.broadcast %111 : vector<8x1x8xf32> to vector<8x32x8xf32>
    %116 = vector.broadcast %114 : vector<1x32x1xf32> to vector<8x32x8xf32>
    %117 = arith.mulf %115, %116 : vector<8x32x8xf32>
    %c3_62 = arith.constant 3 : index
    %c0_63 = arith.constant 0 : index
    %c0_64 = arith.constant 0 : index
    %118 = vector.load %arg1[%c3_62, %c0_63, %c0_64] : memref<11x8x8xf32, #tpu.memory_space<vmem>>, vector<1x8x8xf32>
    %119 = vector.shape_cast %118 : vector<1x8x8xf32> to vector<8x8xf32>
    %120 = vector.shape_cast %119 : vector<8x8xf32> to vector<8x1x8xf32>
    %c1_65 = arith.constant 1 : index
    %c0_66 = arith.constant 0 : index
    %c0_67 = arith.constant 0 : index
    %121 = vector.load %arg2[%c1_65, %c0_66, %c0_67] : memref<5x32x1xf32, #tpu.memory_space<vmem>>, vector<1x32x1xf32>
    %122 = vector.shape_cast %121 : vector<1x32x1xf32> to vector<32x1xf32>
    %123 = vector.shape_cast %122 : vector<32x1xf32> to vector<1x32x1xf32>
    %124 = vector.broadcast %120 : vector<8x1x8xf32> to vector<8x32x8xf32>
    %125 = vector.broadcast %123 : vector<1x32x1xf32> to vector<8x32x8xf32>
    %126 = arith.mulf %124, %125 : vector<8x32x8xf32>
    %127 = arith.addf %117, %126 : vector<8x32x8xf32>
    %c4_68 = arith.constant 4 : index
    %c0_69 = arith.constant 0 : index
    %c0_70 = arith.constant 0 : index
    %128 = vector.load %arg1[%c4_68, %c0_69, %c0_70] : memref<11x8x8xf32, #tpu.memory_space<vmem>>, vector<1x8x8xf32>
    %129 = vector.shape_cast %128 : vector<1x8x8xf32> to vector<8x8xf32>
    %130 = vector.shape_cast %129 : vector<8x8xf32> to vector<8x1x8xf32>
    %c2_71 = arith.constant 2 : index
    %c0_72 = arith.constant 0 : index
    %c0_73 = arith.constant 0 : index
    %131 = vector.load %arg2[%c2_71, %c0_72, %c0_73] : memref<5x32x1xf32, #tpu.memory_space<vmem>>, vector<1x32x1xf32>
    %132 = vector.shape_cast %131 : vector<1x32x1xf32> to vector<32x1xf32>
    %133 = vector.shape_cast %132 : vector<32x1xf32> to vector<1x32x1xf32>
    %134 = vector.broadcast %130 : vector<8x1x8xf32> to vector<8x32x8xf32>
    %135 = vector.broadcast %133 : vector<1x32x1xf32> to vector<8x32x8xf32>
    %136 = arith.mulf %134, %135 : vector<8x32x8xf32>
    %137 = arith.addf %127, %136 : vector<8x32x8xf32>
    %c5 = arith.constant 5 : index
    %c0_74 = arith.constant 0 : index
    %c0_75 = arith.constant 0 : index
    %138 = vector.load %arg1[%c5, %c0_74, %c0_75] : memref<11x8x8xf32, #tpu.memory_space<vmem>>, vector<1x8x8xf32>
    %139 = vector.shape_cast %138 : vector<1x8x8xf32> to vector<8x8xf32>
    %140 = vector.shape_cast %139 : vector<8x8xf32> to vector<8x1x8xf32>
    %c3_76 = arith.constant 3 : index
    %c0_77 = arith.constant 0 : index
    %c0_78 = arith.constant 0 : index
    %141 = vector.load %arg2[%c3_76, %c0_77, %c0_78] : memref<5x32x1xf32, #tpu.memory_space<vmem>>, vector<1x32x1xf32>
    %142 = vector.shape_cast %141 : vector<1x32x1xf32> to vector<32x1xf32>
    %143 = vector.shape_cast %142 : vector<32x1xf32> to vector<1x32x1xf32>
    %144 = vector.broadcast %140 : vector<8x1x8xf32> to vector<8x32x8xf32>
    %145 = vector.broadcast %143 : vector<1x32x1xf32> to vector<8x32x8xf32>
    %146 = arith.mulf %144, %145 : vector<8x32x8xf32>
    %147 = arith.addf %137, %146 : vector<8x32x8xf32>
    %c6 = arith.constant 6 : index
    %c0_79 = arith.constant 0 : index
    %c0_80 = arith.constant 0 : index
    %148 = vector.load %arg1[%c6, %c0_79, %c0_80] : memref<11x8x8xf32, #tpu.memory_space<vmem>>, vector<1x8x8xf32>
    %149 = vector.shape_cast %148 : vector<1x8x8xf32> to vector<8x8xf32>
    %150 = vector.shape_cast %149 : vector<8x8xf32> to vector<8x1x8xf32>
    %c4_81 = arith.constant 4 : index
    %c0_82 = arith.constant 0 : index
    %c0_83 = arith.constant 0 : index
    %151 = vector.load %arg2[%c4_81, %c0_82, %c0_83] : memref<5x32x1xf32, #tpu.memory_space<vmem>>, vector<1x32x1xf32>
    %152 = vector.shape_cast %151 : vector<1x32x1xf32> to vector<32x1xf32>
    %153 = vector.shape_cast %152 : vector<32x1xf32> to vector<1x32x1xf32>
    %154 = vector.broadcast %150 : vector<8x1x8xf32> to vector<8x32x8xf32>
    %155 = vector.broadcast %153 : vector<1x32x1xf32> to vector<8x32x8xf32>
    %156 = arith.mulf %154, %155 : vector<8x32x8xf32>
    %157 = arith.addf %147, %156 : vector<8x32x8xf32>
    %158 = vector.broadcast %1 : vector<1x32x1xf32> to vector<8x32x8xf32>
    %159 = arith.addf %157, %158 : vector<8x32x8xf32>
    %cst_84 = arith.constant 0.000000e+00 : f32
    %160 = vector.broadcast %cst_84 : f32 to vector<8x32x8xf32>
    %161 = arith.maximumf %159, %160 : vector<8x32x8xf32>
    %c4_85 = arith.constant 4 : index
    %c0_86 = arith.constant 0 : index
    %c0_87 = arith.constant 0 : index
    %162 = vector.load %arg1[%c4_85, %c0_86, %c0_87] : memref<11x8x8xf32, #tpu.memory_space<vmem>>, vector<1x8x8xf32>
    %163 = vector.shape_cast %162 : vector<1x8x8xf32> to vector<8x8xf32>
    %164 = vector.shape_cast %163 : vector<8x8xf32> to vector<8x1x8xf32>
    %c0_88 = arith.constant 0 : index
    %c0_89 = arith.constant 0 : index
    %c0_90 = arith.constant 0 : index
    %165 = vector.load %arg2[%c0_88, %c0_89, %c0_90] : memref<5x32x1xf32, #tpu.memory_space<vmem>>, vector<1x32x1xf32>
    %166 = vector.shape_cast %165 : vector<1x32x1xf32> to vector<32x1xf32>
    %167 = vector.shape_cast %166 : vector<32x1xf32> to vector<1x32x1xf32>
    %168 = vector.broadcast %164 : vector<8x1x8xf32> to vector<8x32x8xf32>
    %169 = vector.broadcast %167 : vector<1x32x1xf32> to vector<8x32x8xf32>
    %170 = arith.mulf %168, %169 : vector<8x32x8xf32>
    %c5_91 = arith.constant 5 : index
    %c0_92 = arith.constant 0 : index
    %c0_93 = arith.constant 0 : index
    %171 = vector.load %arg1[%c5_91, %c0_92, %c0_93] : memref<11x8x8xf32, #tpu.memory_space<vmem>>, vector<1x8x8xf32>
    %172 = vector.shape_cast %171 : vector<1x8x8xf32> to vector<8x8xf32>
    %173 = vector.shape_cast %172 : vector<8x8xf32> to vector<8x1x8xf32>
    %c1_94 = arith.constant 1 : index
    %c0_95 = arith.constant 0 : index
    %c0_96 = arith.constant 0 : index
    %174 = vector.load %arg2[%c1_94, %c0_95, %c0_96] : memref<5x32x1xf32, #tpu.memory_space<vmem>>, vector<1x32x1xf32>
    %175 = vector.shape_cast %174 : vector<1x32x1xf32> to vector<32x1xf32>
    %176 = vector.shape_cast %175 : vector<32x1xf32> to vector<1x32x1xf32>
    %177 = vector.broadcast %173 : vector<8x1x8xf32> to vector<8x32x8xf32>
    %178 = vector.broadcast %176 : vector<1x32x1xf32> to vector<8x32x8xf32>
    %179 = arith.mulf %177, %178 : vector<8x32x8xf32>
    %180 = arith.addf %170, %179 : vector<8x32x8xf32>
    %c6_97 = arith.constant 6 : index
    %c0_98 = arith.constant 0 : index
    %c0_99 = arith.constant 0 : index
    %181 = vector.load %arg1[%c6_97, %c0_98, %c0_99] : memref<11x8x8xf32, #tpu.memory_space<vmem>>, vector<1x8x8xf32>
    %182 = vector.shape_cast %181 : vector<1x8x8xf32> to vector<8x8xf32>
    %183 = vector.shape_cast %182 : vector<8x8xf32> to vector<8x1x8xf32>
    %c2_100 = arith.constant 2 : index
    %c0_101 = arith.constant 0 : index
    %c0_102 = arith.constant 0 : index
    %184 = vector.load %arg2[%c2_100, %c0_101, %c0_102] : memref<5x32x1xf32, #tpu.memory_space<vmem>>, vector<1x32x1xf32>
    %185 = vector.shape_cast %184 : vector<1x32x1xf32> to vector<32x1xf32>
    %186 = vector.shape_cast %185 : vector<32x1xf32> to vector<1x32x1xf32>
    %187 = vector.broadcast %183 : vector<8x1x8xf32> to vector<8x32x8xf32>
    %188 = vector.broadcast %186 : vector<1x32x1xf32> to vector<8x32x8xf32>
    %189 = arith.mulf %187, %188 : vector<8x32x8xf32>
    %190 = arith.addf %180, %189 : vector<8x32x8xf32>
    %c7 = arith.constant 7 : index
    %c0_103 = arith.constant 0 : index
    %c0_104 = arith.constant 0 : index
    %191 = vector.load %arg1[%c7, %c0_103, %c0_104] : memref<11x8x8xf32, #tpu.memory_space<vmem>>, vector<1x8x8xf32>
    %192 = vector.shape_cast %191 : vector<1x8x8xf32> to vector<8x8xf32>
    %193 = vector.shape_cast %192 : vector<8x8xf32> to vector<8x1x8xf32>
    %c3_105 = arith.constant 3 : index
    %c0_106 = arith.constant 0 : index
    %c0_107 = arith.constant 0 : index
    %194 = vector.load %arg2[%c3_105, %c0_106, %c0_107] : memref<5x32x1xf32, #tpu.memory_space<vmem>>, vector<1x32x1xf32>
    %195 = vector.shape_cast %194 : vector<1x32x1xf32> to vector<32x1xf32>
    %196 = vector.shape_cast %195 : vector<32x1xf32> to vector<1x32x1xf32>
    %197 = vector.broadcast %193 : vector<8x1x8xf32> to vector<8x32x8xf32>
    %198 = vector.broadcast %196 : vector<1x32x1xf32> to vector<8x32x8xf32>
    %199 = arith.mulf %197, %198 : vector<8x32x8xf32>
    %200 = arith.addf %190, %199 : vector<8x32x8xf32>
    %c10 = arith.constant 10 : index
    %c0_108 = arith.constant 0 : index
    %c0_109 = arith.constant 0 : index
    %201 = vector.load %arg1[%c10, %c0_108, %c0_109] : memref<11x8x8xf32, #tpu.memory_space<vmem>>, vector<1x8x8xf32>
    %202 = vector.shape_cast %201 : vector<1x8x8xf32> to vector<8x8xf32>
    %203 = vector.shape_cast %202 : vector<8x8xf32> to vector<8x1x8xf32>
    %c4_110 = arith.constant 4 : index
    %c0_111 = arith.constant 0 : index
    %c0_112 = arith.constant 0 : index
    %204 = vector.load %arg2[%c4_110, %c0_111, %c0_112] : memref<5x32x1xf32, #tpu.memory_space<vmem>>, vector<1x32x1xf32>
    %205 = vector.shape_cast %204 : vector<1x32x1xf32> to vector<32x1xf32>
    %206 = vector.shape_cast %205 : vector<32x1xf32> to vector<1x32x1xf32>
    %207 = vector.broadcast %203 : vector<8x1x8xf32> to vector<8x32x8xf32>
    %208 = vector.broadcast %206 : vector<1x32x1xf32> to vector<8x32x8xf32>
    %209 = arith.mulf %207, %208 : vector<8x32x8xf32>
    %210 = arith.addf %200, %209 : vector<8x32x8xf32>
    %211 = vector.broadcast %1 : vector<1x32x1xf32> to vector<8x32x8xf32>
    %212 = arith.addf %210, %211 : vector<8x32x8xf32>
    %cst_113 = arith.constant 0.000000e+00 : f32
    %213 = vector.broadcast %cst_113 : f32 to vector<8x32x8xf32>
    %214 = arith.maximumf %212, %213 : vector<8x32x8xf32>
    %215 = arith.maximumf %161, %214 : vector<8x32x8xf32>
    %216 = tpu.transpose %108, [0, 2, 1] : vector<8x32x8xf32> -> vector<8x8x32xf32>
    %217 = arith.truncf %216 : vector<8x8x32xf32> to vector<8x8x32xbf16>
    %218 = tpu.transpose %215, [0, 2, 1] : vector<8x32x8xf32> -> vector<8x8x32xf32>
    %219 = arith.truncf %218 : vector<8x8x32xf32> to vector<8x8x32xbf16>
    %cst_114 = arith.constant 0.000000e+00 : bf16
    %220 = vector.broadcast %cst_114 : bf16 to vector<8x1x32xbf16>
    %221 = tpu.concatenate %220, %217, %220 in 1 : vector<8x1x32xbf16>, vector<8x8x32xbf16>, vector<8x1x32xbf16> -> vector<8x10x32xbf16>
    %222 = tpu.concatenate %220, %219, %220 in 1 : vector<8x1x32xbf16>, vector<8x8x32xbf16>, vector<8x1x32xbf16> -> vector<8x10x32xbf16>
    %223 = vector.extract_strided_slice %221 {offsets = [0, 0, 0], sizes = [8, 8, 32], strides = [1, 1, 1]} : vector<8x10x32xbf16> to vector<8x8x32xbf16>
    %224 = vector.extract_strided_slice %221 {offsets = [0, 2, 0], sizes = [8, 8, 32], strides = [1, 1, 1]} : vector<8x10x32xbf16> to vector<8x8x32xbf16>
    %225 = vector.extract_strided_slice %222 {offsets = [0, 0, 0], sizes = [8, 8, 32], strides = [1, 1, 1]} : vector<8x10x32xbf16> to vector<8x8x32xbf16>
    %226 = vector.extract_strided_slice %222 {offsets = [0, 2, 0], sizes = [8, 8, 32], strides = [1, 1, 1]} : vector<8x10x32xbf16> to vector<8x8x32xbf16>
    %c0_115 = arith.constant 0 : index
    %c0_116 = arith.constant 0 : index
    %c0_117 = arith.constant 0 : index
    %227 = vector.load %arg4[%c0_115, %c0_116, %c0_117] : memref<5x32x64xbf16, #tpu.memory_space<vmem>>, vector<1x32x64xbf16>
    %228 = vector.shape_cast %227 : vector<1x32x64xbf16> to vector<32x64xbf16>
    %cst_118 = arith.constant dense<0.000000e+00> : vector<8x8x64xf32>
    %229 = tpu.matmul %223, %228, %cst_118 {dimension_numbers = #tpu.dot_dimension_numbers<[2], [0], [0, 1], [1], [0, 0, 0, 1, 1, 1], [], []>} : vector<8x8x32xbf16>, vector<32x64xbf16>, vector<8x8x64xf32> -> vector<8x8x64xf32>
    %c1_119 = arith.constant 1 : index
    %c0_120 = arith.constant 0 : index
    %c0_121 = arith.constant 0 : index
    %230 = vector.load %arg4[%c1_119, %c0_120, %c0_121] : memref<5x32x64xbf16, #tpu.memory_space<vmem>>, vector<1x32x64xbf16>
    %231 = vector.shape_cast %230 : vector<1x32x64xbf16> to vector<32x64xbf16>
    %cst_122 = arith.constant dense<0.000000e+00> : vector<8x8x64xf32>
    %232 = tpu.matmul %225, %231, %cst_122 {dimension_numbers = #tpu.dot_dimension_numbers<[2], [0], [0, 1], [1], [0, 0, 0, 1, 1, 1], [], []>} : vector<8x8x32xbf16>, vector<32x64xbf16>, vector<8x8x64xf32> -> vector<8x8x64xf32>
    %233 = arith.addf %229, %232 : vector<8x8x64xf32>
    %c2_123 = arith.constant 2 : index
    %c0_124 = arith.constant 0 : index
    %c0_125 = arith.constant 0 : index
    %234 = vector.load %arg4[%c2_123, %c0_124, %c0_125] : memref<5x32x64xbf16, #tpu.memory_space<vmem>>, vector<1x32x64xbf16>
    %235 = vector.shape_cast %234 : vector<1x32x64xbf16> to vector<32x64xbf16>
    %cst_126 = arith.constant dense<0.000000e+00> : vector<8x8x64xf32>
    %236 = tpu.matmul %217, %235, %cst_126 {dimension_numbers = #tpu.dot_dimension_numbers<[2], [0], [0, 1], [1], [0, 0, 0, 1, 1, 1], [], []>} : vector<8x8x32xbf16>, vector<32x64xbf16>, vector<8x8x64xf32> -> vector<8x8x64xf32>
    %237 = arith.addf %233, %236 : vector<8x8x64xf32>
    %c3_127 = arith.constant 3 : index
    %c0_128 = arith.constant 0 : index
    %c0_129 = arith.constant 0 : index
    %238 = vector.load %arg4[%c3_127, %c0_128, %c0_129] : memref<5x32x64xbf16, #tpu.memory_space<vmem>>, vector<1x32x64xbf16>
    %239 = vector.shape_cast %238 : vector<1x32x64xbf16> to vector<32x64xbf16>
    %cst_130 = arith.constant dense<0.000000e+00> : vector<8x8x64xf32>
    %240 = tpu.matmul %219, %239, %cst_130 {dimension_numbers = #tpu.dot_dimension_numbers<[2], [0], [0, 1], [1], [0, 0, 0, 1, 1, 1], [], []>} : vector<8x8x32xbf16>, vector<32x64xbf16>, vector<8x8x64xf32> -> vector<8x8x64xf32>
    %241 = arith.addf %237, %240 : vector<8x8x64xf32>
    %c4_131 = arith.constant 4 : index
    %c0_132 = arith.constant 0 : index
    %c0_133 = arith.constant 0 : index
    %242 = vector.load %arg4[%c4_131, %c0_132, %c0_133] : memref<5x32x64xbf16, #tpu.memory_space<vmem>>, vector<1x32x64xbf16>
    %243 = vector.shape_cast %242 : vector<1x32x64xbf16> to vector<32x64xbf16>
    %cst_134 = arith.constant dense<0.000000e+00> : vector<8x8x64xf32>
    %244 = tpu.matmul %224, %243, %cst_134 {dimension_numbers = #tpu.dot_dimension_numbers<[2], [0], [0, 1], [1], [0, 0, 0, 1, 1, 1], [], []>} : vector<8x8x32xbf16>, vector<32x64xbf16>, vector<8x8x64xf32> -> vector<8x8x64xf32>
    %245 = arith.addf %241, %244 : vector<8x8x64xf32>
    %c0_135 = arith.constant 0 : index
    %c0_136 = arith.constant 0 : index
    %c0_137 = arith.constant 0 : index
    %246 = vector.load %arg4[%c0_135, %c0_136, %c0_137] : memref<5x32x64xbf16, #tpu.memory_space<vmem>>, vector<1x32x64xbf16>
    %247 = vector.shape_cast %246 : vector<1x32x64xbf16> to vector<32x64xbf16>
    %cst_138 = arith.constant dense<0.000000e+00> : vector<8x8x64xf32>
    %248 = tpu.matmul %225, %247, %cst_138 {dimension_numbers = #tpu.dot_dimension_numbers<[2], [0], [0, 1], [1], [0, 0, 0, 1, 1, 1], [], []>} : vector<8x8x32xbf16>, vector<32x64xbf16>, vector<8x8x64xf32> -> vector<8x8x64xf32>
    %c1_139 = arith.constant 1 : index
    %c0_140 = arith.constant 0 : index
    %c0_141 = arith.constant 0 : index
    %249 = vector.load %arg4[%c1_139, %c0_140, %c0_141] : memref<5x32x64xbf16, #tpu.memory_space<vmem>>, vector<1x32x64xbf16>
    %250 = vector.shape_cast %249 : vector<1x32x64xbf16> to vector<32x64xbf16>
    %cst_142 = arith.constant dense<0.000000e+00> : vector<8x8x64xf32>
    %251 = tpu.matmul %217, %250, %cst_142 {dimension_numbers = #tpu.dot_dimension_numbers<[2], [0], [0, 1], [1], [0, 0, 0, 1, 1, 1], [], []>} : vector<8x8x32xbf16>, vector<32x64xbf16>, vector<8x8x64xf32> -> vector<8x8x64xf32>
    %252 = arith.addf %248, %251 : vector<8x8x64xf32>
    %c2_143 = arith.constant 2 : index
    %c0_144 = arith.constant 0 : index
    %c0_145 = arith.constant 0 : index
    %253 = vector.load %arg4[%c2_143, %c0_144, %c0_145] : memref<5x32x64xbf16, #tpu.memory_space<vmem>>, vector<1x32x64xbf16>
    %254 = vector.shape_cast %253 : vector<1x32x64xbf16> to vector<32x64xbf16>
    %cst_146 = arith.constant dense<0.000000e+00> : vector<8x8x64xf32>
    %255 = tpu.matmul %219, %254, %cst_146 {dimension_numbers = #tpu.dot_dimension_numbers<[2], [0], [0, 1], [1], [0, 0, 0, 1, 1, 1], [], []>} : vector<8x8x32xbf16>, vector<32x64xbf16>, vector<8x8x64xf32> -> vector<8x8x64xf32>
    %256 = arith.addf %252, %255 : vector<8x8x64xf32>
    %c3_147 = arith.constant 3 : index
    %c0_148 = arith.constant 0 : index
    %c0_149 = arith.constant 0 : index
    %257 = vector.load %arg4[%c3_147, %c0_148, %c0_149] : memref<5x32x64xbf16, #tpu.memory_space<vmem>>, vector<1x32x64xbf16>
    %258 = vector.shape_cast %257 : vector<1x32x64xbf16> to vector<32x64xbf16>
    %cst_150 = arith.constant dense<0.000000e+00> : vector<8x8x64xf32>
    %259 = tpu.matmul %224, %258, %cst_150 {dimension_numbers = #tpu.dot_dimension_numbers<[2], [0], [0, 1], [1], [0, 0, 0, 1, 1, 1], [], []>} : vector<8x8x32xbf16>, vector<32x64xbf16>, vector<8x8x64xf32> -> vector<8x8x64xf32>
    %260 = arith.addf %256, %259 : vector<8x8x64xf32>
    %c4_151 = arith.constant 4 : index
    %c0_152 = arith.constant 0 : index
    %c0_153 = arith.constant 0 : index
    %261 = vector.load %arg4[%c4_151, %c0_152, %c0_153] : memref<5x32x64xbf16, #tpu.memory_space<vmem>>, vector<1x32x64xbf16>
    %262 = vector.shape_cast %261 : vector<1x32x64xbf16> to vector<32x64xbf16>
    %cst_154 = arith.constant dense<0.000000e+00> : vector<8x8x64xf32>
    %263 = tpu.matmul %226, %262, %cst_154 {dimension_numbers = #tpu.dot_dimension_numbers<[2], [0], [0, 1], [1], [0, 0, 0, 1, 1, 1], [], []>} : vector<8x8x32xbf16>, vector<32x64xbf16>, vector<8x8x64xf32> -> vector<8x8x64xf32>
    %264 = arith.addf %260, %263 : vector<8x8x64xf32>
    %c0_155 = arith.constant 0 : index
    %c0_156 = arith.constant 0 : index
    %c0_157 = arith.constant 0 : index
    %265 = vector.load %arg5[%c0_155, %c0_156, %c0_157] : memref<1x1x64xf32, #tpu.memory_space<vmem>>, vector<1x1x64xf32>
    %266 = vector.broadcast %265 : vector<1x1x64xf32> to vector<8x8x64xf32>
    %267 = arith.addf %245, %266 : vector<8x8x64xf32>
    %cst_158 = arith.constant 0.000000e+00 : f32
    %268 = vector.broadcast %cst_158 : f32 to vector<8x8x64xf32>
    %269 = arith.maximumf %267, %268 : vector<8x8x64xf32>
    %270 = vector.broadcast %265 : vector<1x1x64xf32> to vector<8x8x64xf32>
    %271 = arith.addf %264, %270 : vector<8x8x64xf32>
    %cst_159 = arith.constant 0.000000e+00 : f32
    %272 = vector.broadcast %cst_159 : f32 to vector<8x8x64xf32>
    %273 = arith.maximumf %271, %272 : vector<8x8x64xf32>
    %274 = arith.maximumf %269, %273 : vector<8x8x64xf32>
    %275 = arith.truncf %274 : vector<8x8x64xf32> to vector<8x8x64xbf16>
    %276 = vector.shape_cast %275 : vector<8x8x64xbf16> to vector<8x512xbf16>
    %c0_160 = arith.constant 0 : index
    %c0_161 = arith.constant 0 : index
    %277 = vector.load %arg6[%c0_160, %c0_161] : memref<512x128xbf16, #tpu.memory_space<vmem>>, vector<512x128xbf16>
    %cst_162 = arith.constant dense<0.000000e+00> : vector<8x128xf32>
    %278 = tpu.matmul %276, %277, %cst_162 {dimension_numbers = #tpu.dot_dimension_numbers<[1], [0], [0], [1], [0, 0, 1, 1], [], []>} : vector<8x512xbf16>, vector<512x128xbf16>, vector<8x128xf32> -> vector<8x128xf32>
    %c0_163 = arith.constant 0 : index
    %c0_164 = arith.constant 0 : index
    %279 = vector.load %arg7[%c0_163, %c0_164] : memref<1x128xf32, #tpu.memory_space<vmem>>, vector<1x128xf32>
    %280 = vector.broadcast %279 : vector<1x128xf32> to vector<8x128xf32>
    %281 = arith.addf %278, %280 : vector<8x128xf32>
    %cst_165 = arith.constant 0.000000e+00 : f32
    %282 = vector.broadcast %cst_165 : f32 to vector<8x128xf32>
    %283 = arith.maximumf %281, %282 : vector<8x128xf32>
    %284 = arith.truncf %283 : vector<8x128xf32> to vector<8x128xbf16>
    %c0_166 = arith.constant 0 : index
    %c0_167 = arith.constant 0 : index
    %285 = vector.load %arg8[%c0_166, %c0_167] : memref<128x128xbf16, #tpu.memory_space<vmem>>, vector<128x128xbf16>
    %cst_168 = arith.constant dense<0.000000e+00> : vector<8x128xf32>
    %286 = tpu.matmul %284, %285, %cst_168 {dimension_numbers = #tpu.dot_dimension_numbers<[1], [0], [0], [1], [0, 0, 1, 1], [], []>} : vector<8x128xbf16>, vector<128x128xbf16>, vector<8x128xf32> -> vector<8x128xf32>
    %c0_169 = arith.constant 0 : index
    %c0_170 = arith.constant 0 : index
    %287 = vector.load %arg9[%c0_169, %c0_170] : memref<1x128xf32, #tpu.memory_space<vmem>>, vector<1x128xf32>
    %288 = vector.broadcast %287 : vector<1x128xf32> to vector<8x128xf32>
    %289 = arith.addf %286, %288 : vector<8x128xf32>
    %c0_171 = arith.constant 0 : index
    %c0_172 = arith.constant 0 : index
    %290 = vector.load %arg10[%c0_171, %c0_172] : memref<8x128xf32, #tpu.memory_space<vmem>>, vector<8x128xf32>
    tpu.vector_store %arg10[%c0_171, %c0_172], %289 {strides = array<i32>} : memref<8x128xf32, #tpu.memory_space<vmem>>, vector<8x128xf32>,
    return
  }
  func.func @transform_0(%arg0: i32) -> (i32, i32, i32) {
    %c0_i32 = arith.constant 0 : i32
    %c0_i32_0 = arith.constant 0 : i32
    %c0_i32_1 = arith.constant 0 : i32
    return %c0_i32, %arg0, %c0_i32_0 : i32, i32, i32
  }
  func.func @transform_1(%arg0: i32) -> (i32, i32, i32) {
    %c0_i32 = arith.constant 0 : i32
    %c0_i32_0 = arith.constant 0 : i32
    %c0_i32_1 = arith.constant 0 : i32
    %c0_i32_2 = arith.constant 0 : i32
    return %c0_i32, %c0_i32_0, %c0_i32_1 : i32, i32, i32
  }
  func.func @transform_2(%arg0: i32) -> (i32, i32) {
    %c0_i32 = arith.constant 0 : i32
    %c0_i32_0 = arith.constant 0 : i32
    %c0_i32_1 = arith.constant 0 : i32
    return %c0_i32, %c0_i32_0 : i32, i32
  }
  func.func @transform_3(%arg0: i32) -> (i32, i32, i32) {
    %c0_i32 = arith.constant 0 : i32
    %c0_i32_0 = arith.constant 0 : i32
    %c0_i32_1 = arith.constant 0 : i32
    %c0_i32_2 = arith.constant 0 : i32
    return %c0_i32, %c0_i32_0, %c0_i32_1 : i32, i32, i32
  }
  func.func @transform_4(%arg0: i32) -> (i32, i32, i32) {
    %c0_i32 = arith.constant 0 : i32
    %c0_i32_0 = arith.constant 0 : i32
    %c0_i32_1 = arith.constant 0 : i32
    %c0_i32_2 = arith.constant 0 : i32
    return %c0_i32, %c0_i32_0, %c0_i32_1 : i32, i32, i32
  }
  func.func @transform_5(%arg0: i32) -> (i32, i32) {
    %c0_i32 = arith.constant 0 : i32
    %c0_i32_0 = arith.constant 0 : i32
    %c0_i32_1 = arith.constant 0 : i32
    return %c0_i32, %c0_i32_0 : i32, i32
  }
  func.func @transform_6(%arg0: i32) -> (i32, i32) {
    %c0_i32 = arith.constant 0 : i32
    %c0_i32_0 = arith.constant 0 : i32
    %c0_i32_1 = arith.constant 0 : i32
    return %c0_i32, %c0_i32_0 : i32, i32
  }
  func.func @transform_7(%arg0: i32) -> (i32, i32) {
    %c0_i32 = arith.constant 0 : i32
    %c0_i32_0 = arith.constant 0 : i32
    %c0_i32_1 = arith.constant 0 : i32
    return %c0_i32, %c0_i32_0 : i32, i32
  }
  func.func @transform_8(%arg0: i32) -> (i32, i32) {
    %c0_i32 = arith.constant 0 : i32
    %c0_i32_0 = arith.constant 0 : i32
    %c0_i32_1 = arith.constant 0 : i32
    return %c0_i32, %c0_i32_0 : i32, i32
  }
  func.func @transform_9(%arg0: i32) -> (i32, i32) {
    %c0_i32 = arith.constant 0 : i32
    %c0_i32_0 = arith.constant 0 : i32
    return %arg0, %c0_i32 : i32, i32
  }
}

</mosaic_0001>

<bundles_post_ra>
// kernel: tpu_custom_call.1
= control target key start
LH: loop header
LB: loop body
LE: loop exit
PB: predicated region body
PF: predicated region fallthrough
CT: control target
= control target key end

     0   :  { %14 = vsyncpa [#allocation3], 0  ;;  %s8421_s0 = inlined_call_operand.vmem [shape: f32[11,8,8], index: 0, kind: input, shape index: {}]   ;;  %s8422_s1 = inlined_call_operand.vmem [shape: f32[5,32,1], index: 1, kind: input, shape index: {}]   ;;  %s8423_s2 = inlined_call_operand.vmem [shape: f32[32,1], index: 2, kind: input, shape index: {}]   ;;  %s8424_s3 = inlined_call_operand.vmem [shape: bf16[5,32,64], index: 3, kind: input, shape index: {}]   ;;  %s8425_s4 = inlined_call_operand.vmem [shape: f32[1,1,64], index: 4, kind: input, shape index: {}]   ;;  %s8426_s5 = inlined_call_operand.vmem [shape: bf16[512,128], index: 5, kind: input, shape index: {}]   ;;  %s8427_s6 = inlined_call_operand.vmem [shape: f32[1,128], index: 6, kind: input, shape index: {}]   ;;  %s8428_s7 = inlined_call_operand.hbm [shape: bf16[128,128], index: 7, kind: input, shape index: {}]   ;;  %s8429_s8 = inlined_call_operand.vmem [shape: f32[1,128], index: 8, kind: input, shape index: {}]   ;;  %s8430_s9 = inlined_call_operand.hbm [shape: f32[8,128], index: 9, kind: output, shape index: {}]  }
   0x1   :  { %15 = vsyncpa [#allocation4], 0  ;;  %s5855_s30 = smov [#allocation2]   ;;  %s5807_s13 = scalar_lea.hbm %s8428_s7, 1024 }
   0x2   :  { %s35_s10 = sshll.u32 %s5855_s30, 4  ;;  %p5808_p0 = scmp.ne.s32.totalorder %s8428_s7, %s5807_s13  ;;  %s36_s10 = int_to_ptr.vmem [resolvable:$true] %s35_s10 }
   0x3   :  { %p5811_p1 = scmp.lt.u32.totalorder %s5807_s13, %s8428_s7 }
   0x5   :  { %p5813_p2 = pnand %p5811_p1, %p5808_p0 }
   0x7   :  { %5816 = shalt.err (!%p5813_p2)
}
   0x8   :  { %s5817_s18 = scalar_lea.vmem %s36_s10, 1024  ;;  %p5822_p4 = scmp.lt.s32.totalorder %s36_s10, %s36_s10 }
   0x9   :  { %p5818_p3 = scmp.ne.s32.totalorder %s36_s10, %s5817_s18  ;;  %p5823_p5 = scmp.lt.s32.totalorder %s5817_s18, %s5817_s18 }
   0xb   :  { %p5824_p6 = por %p5823_p5, %p5822_p4 }
   0xd   :  { %p5825_p7 = pnand %p5824_p6, %p5818_p3 }
   0xf   :  { %5828 = shalt.err (!%p5825_p7)
}
  0x10   :  { %s5856_s19 = smov 64   ;;  %s5857_s20 = smov 4  }
  0x11   :  { %41 = dma.hbm_to_vmem [thread:$0]  %s8428_s7, 1024, %s36_s10, [#allocation3], %s5856_s19, %s5856_s19, %s5857_s20  }
  0x12   :  { %5851 = dma.done.wait [#allocation3], 1024  }
  0x13   :  { %5852 = vsyncadd [#allocation3], 4294966272  ;;  %v8431_v0 = vmov 0   ;;  %v105_v1 = vld [vmem:[%s8422_s1 + $0x8] sm:$0xff]  ;;  %v104_v2 = vld [vmem:[%s8422_s1] sm:$0xff]  ;;  %v59_v27 = vlaneseq  ;;  %vm3271_vm0 = vcmask 1040384  }
  0x14   :  { %5638 = vset.pattern.permute.xlu1 %v8431_v0  ;;  %5637 = vset.pattern.permute.xlu0 %v8431_v0  ;;  %v5094_v3 = vld [vmem:[%s8422_s1 + $0x28] sm:$0xff]  ;;  %v5093_v4 = vld [vmem:[%s8422_s1 + $0x20] sm:$0xff]  ;;  %v106_v5 = vld [vmem:[%s8422_s1 + $0x10] sm:$0xff]  ;;  %v5859_v25 = vmov 1966171168   ;;  %vm3282_vm2 = vcmask 1044480  }
  0x15   :  { %155 = vperm.xlu1 %5638, %v105_v1   ;;  %150 = vperm.xlu0 %5637, %v104_v2   ;;  %v5097_v6 = vld [vmem:[%s8422_s1 + $0x40] sm:$0xff]  ;;  %v5098_v7 = vld [vmem:[%s8422_s1 + $0x48] sm:$0xff]  ;;  %v5095_v8 = vld [vmem:[%s8422_s1 + $0x30] sm:$0xff]  ;;  %v57_v26 = vunpack.c.l.s4 %v5859_v25  ;;  %v6003_v29 = vshrl.u32 %v59_v27, 7  ;;  %vm3272_vm1 = vsmask.f32 256 }
  0x16   :  { %v107_v9 = vld [vmem:[%s8422_s1 + $0x18] sm:$0xff]  ;;  %v5102_v10 = vld [vmem:[%s8422_s1 + $0x60] sm:$0xff]  ;;  %v5099_v11 = vld [vmem:[%s8422_s1 + $0x50] sm:$0xff]  ;;  %vm3283_vm4 = vsmask.f32 4352  ;;  %vm3414_vm6 = vcmask 261120  }
  0x17   :  { %v5096_v12 = vld [vmem:[%s8422_s1 + $0x38] sm:$0xff]  ;;  %v5107_v13 = vld [vmem:[%s8422_s1 + $0x80] sm:$0xff]  ;;  %v5103_v14 = vld [vmem:[%s8422_s1 + $0x68] sm:$0xff]  ;;  %v58_v28 = vunpack.c.0.s8 %v57_v26  ;;  %8613 = vst [vmem:[#allocation8_spill] sm:$0xff] %v6003_v29  ;;  %v6051_v53 = vsub.s32 0, %v6003_v29  ;;  %vm3874_vm7 = vcmask 1042432  }
  0x18   :  { %v5104_v15 = vld [vmem:[%s8422_s1 + $0x70] sm:$0xff]  ;;  %v5100_v16 = vld [vmem:[%s8422_s1 + $0x58] sm:$0xff]  ;;  %v5108_v18 = vld [vmem:[%s8422_s1 + $0x88] sm:$0xff]  ;;  %vm3875_vm8 = vcmask 1046532   ;;  %vm4602_vm10 = vcmask 523264   ;;  %vm5863_vm11 = vmmov 0  }
  0x19   :  { %304 = vperm.xlu1 %5638, %v5094_v3   ;;  %299 = vperm.xlu0 %5637, %v5093_v4   ;;  %v5105_v17 = vld [vmem:[%s8422_s1 + $0x78] sm:$0xff]  ;;  %v5109_v19 = vld [vmem:[%s8422_s1 + $0x90] sm:$0xff]  ;;  %v48_v20 = vld [vmem:[%s8423_s2] sm:$0xff]  ;;  %v6006_v30 = vsub.s32 %v58_v28, %v6003_v29  ;;  %8615 = vst [vmem:[#allocation10_spill] sm:$0xff] %v6051_v53  ;;  %s5864_s22 = smov [#allocation5]  }
  0x1a   :  { %v5110_v21 = vld [vmem:[%s8422_s1 + $0x98] sm:$0xff]  ;;  %v49_v22 = vld [vmem:[%s8423_s2 + $0x8] sm:$0xff]  ;;  %v50_v23 = vld [vmem:[%s8423_s2 + $0x10] sm:$0xff]  ;;  %s5082_s23 = sshll.u32 %s5864_s22, 4  ;;  %s5083_s23 = int_to_ptr.vmem [resolvable:$true] %s5082_s23 }
  0x1b   :  { %v51_v24 = vld [vmem:[%s8423_s2 + $0x18] sm:$0xff]  ;;  %8614 = vst [vmem:[#allocation9_spill] sm:$0xff] %v6006_v30  ;;  %v5106_v31 = vld [vmem:[%s8421_s0 + $0x10] sm:$0xff]  ;;  %v5112_v35 = vld [vmem:[%s8421_s0 + $0x20] sm:$0xff]  ;;  %p5834_p9 = scmp.lt.s32.totalorder %s5083_s23, %s5083_s23 }
  0x1c   :  { %v6014_v32 = vld [vmem:[%s8421_s0 + $0x18] sm:$0xff]  ;;  %v752_v33 = vrot.slane %v5106_v31, %v6006_v30  ;;  %v6025_v36 = vld [vmem:[%s8421_s0 + $0x28] sm:$0xff]  ;;  %v1333_v37 = vrot.slane %v5112_v35, %v6006_v30  ;;  %v6036_v46 = vld [vmem:[%s8421_s0 + $0x30] sm:$0xff] }
  0x1d   :  { %160 = vperm.xlu1 %5638, %v106_v5   ;;  %479 = vperm.xlu0 %5637, %v5097_v6   ;;  %v1177_v34 = vrot.slane %v6014_v32, %v6006_v30  ;;  %v1745_v38 = vrot.slane %v6025_v36, %v6006_v30  ;;  %v1901_v49 = vrot.slane %v6036_v46, %v6006_v30  ;;  %v6045_v50 = vld [vmem:[%s8421_s0 + $0x38] sm:$0xff]  ;;  %v5116_v2 = vld [vmem:[%s8421_s0 + $0x50] sm:$0xff]  ;;  %vm7958_vm3 = vmand %vm3271_vm0, %vm3272_vm1 }
  0x1e   :  { %v760_v39 = vcombine.high %v752_v33, %v752_v33  ;;  %v768_v41 = vrot.slane %v752_v33, %v6006_v30  ;;  %v1341_v42 = vcombine.high %v1333_v37, %v1333_v37  ;;  %v1349_v45 = vrot.slane %v1333_v37, %v6006_v30  ;;  %vm7962_vm5 = vmand %vm3282_vm2, %vm3283_vm4 }
  0x1f   :  { %v1185_v40 = vcombine.high %v1177_v34, %v1177_v34  ;;  %v1753_v43 = vcombine.high %v1745_v38, %v1745_v38  ;;  %v1193_v44 = vrot.slane %v1177_v34, %v6006_v30  ;;  %v1761_v51 = vrot.slane %v1745_v38, %v6006_v30  ;;  %vm8060_vm9 = vmor %vm3874_vm7, %vm3875_vm8 }
  0x20   :  { %v782_v47 = vrot.slane %v760_v39, %v6006_v30  ;;  %v2281_v52 = vrot.slane %v6045_v50, %v6006_v30  ;;  %v790_v54 = vcombine.high %v768_v41, %v768_v41  ;;  %v1363_v55 = vrot.slane %v1341_v42, %v6006_v30 }
  0x21   :  { %484 = vperm.xlu1 %5638, %v5098_v7   ;;  %309 = vperm.xlu0 %5637, %v5095_v8   ;;  %v1207_v48 = vrot.slane %v1185_v40, %v6006_v30  ;;  %v6055_v56 = vrot.slane %v1753_v43, %v6006_v30  ;;  %v1215_v57 = vcombine.high %v1193_v44, %v1193_v44 }
  0x22   :  { %v1371_v58 = vcombine.high %v1349_v45, %v1349_v45  ;;  %v792_v59 = vcombine.high %v782_v47, %v782_v47  ;;  %v1909_v61 = vcombine.high %v1901_v49, %v1901_v49  ;;  %v1783_v62 = vcombine.high %v1761_v51, %v1761_v51 }
  0x23   :  { %v1217_v60 = vcombine.high %v1207_v48, %v1207_v48  ;;  %v1917_v63 = vrot.slane %v1901_v49, %v6006_v30  ;;  %v2289_v1 = vcombine.high %v2281_v52, %v2281_v52  ;;  %v6062_v3 = vrot.slane %v790_v54, %v6051_v53 }
  0x24   :  { %v1373_v4 = vcombine.high %v1363_v55, %v1363_v55  ;;  %v1785_v5 = vcombine.high %v6055_v56, %v6055_v56  ;;  %v2437_v6 = vrot.slane %v5116_v2, %v6006_v30  ;;  %v6068_v7 = vrot.slane %v1215_v57, %v6051_v53 }
  0x25   :  { %165 = vperm.xlu1 %5638, %v107_v9   ;;  %660 = vperm.xlu0 %5637, %v5102_v10   ;;  %8616 = vst [vmem:[#allocation11_spill] sm:$0xff] %v6062_v3  ;;  %v6071_v8 = vrot.slane %v1371_v58, %v6051_v53  ;;  %v2297_v9 = vrot.slane %v2281_v52, %v6006_v30 }
  0x26   :  { %8617 = vst [vmem:[#allocation12_spill] sm:$0xff] %v6068_v7  ;;  %v745_v10 = vcombine.high %v5106_v31, %v5106_v31  ;;  %v6099_v25 = vrot.slane %v768_v41, %v6051_v53  ;;  %v6103_v28 = vrot.slane %v782_v47, %v6051_v53  ;;  %v2274_v39 = vcombine.high %v6045_v50, %v6045_v50 }
  0x27   :  { %8618 = vst [vmem:[#allocation13_spill] sm:$0xff] %v6071_v8  ;;  %v2430_v40 = vcombine.high %v5116_v2, %v5116_v2  ;;  %v6125_v43 = vrot.slane %v1207_v48, %v6051_v53  ;;  %v6131_v47 = vrot.slane %v1349_v45, %v6051_v53  ;;  %v6138_v54 = vrot.slane %v1363_v55, %v6051_v53 }
  0x28   :  { %8623 = vst [vmem:[#allocation18_spill] sm:$0xff] %v6099_v25  ;;  %v759_v26 = vrot.slane %v745_v10, %v6006_v30  ;;  %8624 = vst [vmem:[#allocation19_spill] sm:$0xff] %v6103_v28  ;;  %v6141_v57 = vrot.slane %v1761_v51, %v6051_v53  ;;  %v6155_v51 = vrot.slane %v1917_v63, %v6051_v53 }
  0x29   :  { %489 = vperm.xlu1 %5638, %v5099_v11   ;;  %314 = vperm.xlu0 %5637, %v5096_v12   ;;  %v6075_v11 = vrot.slane %v792_v59, %v6051_v53  ;;  %v6078_v12 = vrot.slane %v1217_v60, %v6051_v53  ;;  %8627 = vst [vmem:[#allocation22_spill] sm:$0xff] %v6125_v43  ;;  %8628 = vst [vmem:[#allocation23_spill] sm:$0xff] %v6131_v47 }
  0x2a   :  { %8630 = vst [vmem:[#allocation25_spill] sm:$0xff] %v6138_v54  ;;  %v2288_v60 = vrot.slane %v2274_v39, %v6006_v30  ;;  %v2444_v45 = vrot.slane %v2430_v40, %v6006_v30  ;;  %v775_v55 = vrot.slane %v759_v26, %v6006_v30 }
  0x2b   :  { %8619 = vst [vmem:[#allocation14_spill] sm:$0xff] %v6075_v11  ;;  %8620 = vst [vmem:[#allocation15_spill] sm:$0xff] %v6078_v12 }
  0x2c   :  { %v2304_v39 = vrot.slane %v2288_v60, %v6006_v30 }
  0x2d   :  { %841 = vperm.xlu1 %5638, %v5107_v13   ;;  %665 = vperm.xlu0 %5637, %v5103_v14   ;;  %v1931_v13 = vrot.slane %v1909_v61, %v6006_v30  ;;  %v1326_v14 = vcombine.high %v5112_v35, %v5112_v35  ;;  %v6112_v35 = vrot.slane %v1193_v44, %v6051_v53 }
  0x2e   :  { %v761_v44 = vcombine.high %v759_v26, %v759_v26 }
  0x2f   :  { %v1941_v27 = vcombine.high %v1931_v13, %v1931_v13  ;;  %v1340_v31 = vrot.slane %v1326_v14, %v6006_v30  ;;  %8625 = vst [vmem:[#allocation20_spill] sm:$0xff] %v6112_v35 }
  0x31   :  { %670 = vperm.xlu1 %5638, %v5104_v15   ;;  %494 = vperm.xlu0 %5637, %v5100_v16   ;;  %v6082_v15 = vrot.slane %v1783_v62, %v6051_v53  ;;  %v1939_v16 = vcombine.high %v1917_v63, %v1917_v63  ;;  %v1342_v49 = vcombine.high %v1340_v31, %v1340_v31 }
  0x32   :  { %v6150_v62 = vrot.slane %v6055_v56, %v6051_v53  ;;  %v1356_v2 = vrot.slane %v1340_v31, %v6006_v30 }
  0x33   :  { %v6109_v33 = vrot.slane %v1939_v16, %v6051_v53  ;;  %v6166_v16 = vrot.slane %v2297_v9, %v6051_v53 }
  0x35   :  { %675 = vperm.xlu1 %5638, %v5105_v17   ;;  %846 = vperm.xlu0 %5637, %v5108_v18   ;;  %v2311_v17 = vrot.slane %v2289_v1, %v6006_v30  ;;  %v1170_v18 = vcombine.high %v6014_v32, %v6014_v32  ;;  %v1894_v32 = vcombine.high %v6036_v46, %v6036_v46 }
  0x36   :  { %v6128_v46 = vrot.slane %v1941_v27, %v6051_v53  ;;  %v789_v1 = vrot.slane %v761_v44, %v6006_v30  ;;  %8631 = vst [vmem:[#allocation26_spill] sm:$0xff] %v6166_v16  ;;  %v1372_v27 = vcombine.high %v1356_v2, %v1356_v2  ;;  %v2460_v44 = vrot.slane %v2444_v45, %v6006_v30 }
  0x37   :  { %v2321_v34 = vcombine.high %v2311_v17, %v2311_v17  ;;  %v1908_v50 = vrot.slane %v1894_v32, %v6006_v30 }
  0x38   :  { %v793_v26 = vcombine.high %v789_v1, %v789_v1  ;;  %v6216_v29 = vrot.slane %v789_v1, %v6051_v53 }
  0x39   :  { %851 = vperm.xlu0 %5637, %v5109_v19   ;;  %925 = vperm.xlu1 %5638, %v48_v20   ;;  %v6088_v19 = vrot.slane %v1373_v4, %v6051_v53  ;;  %v6091_v20 = vrot.slane %v1785_v5, %v6051_v53  ;;  %v6135_v52 = vrot.slane %v2321_v34, %v6051_v53 }
  0x3a   :  { %v1370_v4 = vrot.slane %v1342_v49, %v6006_v30  ;;  %v1910_v5 = vcombine.high %v1908_v50, %v1908_v50  ;;  %v1924_v32 = vrot.slane %v1908_v50, %v6006_v30  ;;  %8642 = vst [vmem:[#allocation37_spill] sm:$0xff] %v6216_v29 }
  0x3b   :  { %8621 = vst [vmem:[#allocation16_spill] sm:$0xff] %v6088_v19  ;;  %8622 = vst [vmem:[#allocation17_spill] sm:$0xff] %v6091_v20 }
  0x3c   :  { %8629 = vst [vmem:[#allocation24_spill] sm:$0xff] %v6135_v52  ;;  %v1374_v31 = vcombine.high %v1370_v4, %v1370_v4  ;;  %v1938_v34 = vrot.slane %v1910_v5, %v6006_v30 }
  0x3d   :  { %856 = vperm.xlu0 %5637, %v5110_v21   ;;  %930 = vperm.xlu1 %5638, %v49_v22   ;;  %v2445_v21 = vcombine.high %v2437_v6, %v2437_v6  ;;  %v1738_v22 = vcombine.high %v6025_v36, %v6025_v36  ;;  %v1184_v36 = vrot.slane %v1170_v18, %v6006_v30 }
  0x3e   :  { %v2290_v18 = vcombine.high %v2288_v60, %v2288_v60  ;;  %v6198_v60 = vrot.slane %v1374_v31, %v6051_v53  ;;  %v1942_v5 = vcombine.high %v1938_v34, %v1938_v34  ;;  %v6213_v31 = vrot.slane %v775_v55, %v6051_v53 }
  0x3f   :  { %v2467_v37 = vrot.slane %v2445_v21, %v6006_v30  ;;  %v1752_v38 = vrot.slane %v1738_v22, %v6006_v30  ;;  %v1186_v48 = vcombine.high %v1184_v36, %v1184_v36  ;;  %v1200_v10 = vrot.slane %v1184_v36, %v6006_v30 }
  0x40   :  { %v2446_v21 = vcombine.high %v2444_v45, %v2444_v45  ;;  %8636 = vst [vmem:[#allocation31_spill] sm:$0xff] %v6198_v60  ;;  %v1940_v45 = vcombine.high %v1924_v32, %v1924_v32  ;;  %8641 = vst [vmem:[#allocation36_spill] sm:$0xff] %v6213_v31 }
  0x41   :  { %935 = vperm.xlu0 %5637, %v50_v23   ;;  %940 = vperm.xlu1 %5638, %v51_v24   ;;  %v2319_v23 = vcombine.high %v2297_v9, %v2297_v9  ;;  %v6096_v24 = vrot.slane %v2437_v6, %v6006_v30  ;;  %v2477_v58 = vcombine.high %v2467_v37, %v2467_v37 }
  0x42   :  { %v1754_v59 = vcombine.high %v1752_v38, %v1752_v38  ;;  %v6160_v6 = vrot.slane %v1931_v13, %v6051_v53  ;;  %v1214_v56 = vrot.slane %v1186_v48, %v6006_v30  ;;  %v1768_v14 = vrot.slane %v1752_v38, %v6006_v30 }
  0x43   :  { %v6120_v41 = vrot.slane %v2319_v23, %v6051_v53  ;;  %v2475_v42 = vcombine.high %v6096_v24, %v6096_v24  ;;  %v6170_v22 = vrot.slane %v2477_v58, %v6051_v53  ;;  %v6173_v23 = vrot.slane %v2311_v17, %v6051_v53 }
  0x44   :  { %v1782_v63 = vrot.slane %v1754_v59, %v6006_v30  ;;  %v791_v13 = vcombine.high %v775_v55, %v775_v55  ;;  %v1216_v9 = vcombine.high %v1200_v10, %v1200_v10  ;;  %v1218_v36 = vcombine.high %v1214_v56, %v1214_v56 }
  0x45   :  { %8626 = vst [vmem:[#allocation21_spill] sm:$0xff] %v6120_v41  ;;  %v6146_v61 = vrot.slane %v2475_v42, %v6051_v53  ;;  %v1784_v38 = vcombine.high %v1768_v14, %v1768_v14  ;;  %v2318_v42 = vrot.slane %v2290_v18, %v6006_v30  ;;  %v2474_v17 = vrot.slane %v2446_v21, %v6006_v30 }
  0x46   :  { %v1786_v40 = vcombine.high %v1782_v63, %v1782_v63  ;;  %v6183_v49 = vrot.slane %v6096_v24, %v6051_v53  ;;  %v6186_v50 = vrot.slane %v2467_v37, %v6051_v53  ;;  %v6189_v48 = vrot.slane %v791_v13, %v6051_v53 }
  0x47   :  { %v6192_v58 = vrot.slane %v793_v26, %v6051_v53  ;;  %v6195_v59 = vrot.slane %v1372_v27, %v6051_v53  ;;  %v6201_v24 = vrot.slane %v1216_v9, %v6051_v53  ;;  %v6204_v37 = vrot.slane %v1218_v36, %v6051_v53 }
  0x48   :  { %8632 = vst [vmem:[#allocation27_spill] sm:$0xff] %v6186_v50  ;;  %8633 = vst [vmem:[#allocation28_spill] sm:$0xff] %v6189_v48  ;;  %v6207_v18 = vrot.slane %v1784_v38, %v6051_v53  ;;  %v2320_v21 = vcombine.high %v2304_v39, %v2304_v39  ;;  %v6210_v13 = vrot.slane %v1786_v40, %v6051_v53 }
  0x49   :  { %8634 = vst [vmem:[#allocation29_spill] sm:$0xff] %v6192_v58  ;;  %8635 = vst [vmem:[#allocation30_spill] sm:$0xff] %v6195_v59  ;;  %v2322_v26 = vcombine.high %v2318_v42, %v2318_v42  ;;  %v2476_v27 = vcombine.high %v2460_v44, %v2460_v44  ;;  %v2478_v0 = vcombine.high %v2474_v17, %v2474_v17 }
  0x4a   :  { %8637 = vst [vmem:[#allocation32_spill] sm:$0xff] %v6201_v24  ;;  %8638 = vst [vmem:[#allocation33_spill] sm:$0xff] %v6204_v37  ;;  %v6219_v9 = vrot.slane %v1356_v2, %v6051_v53  ;;  %v6222_v36 = vrot.slane %v1370_v4, %v6051_v53  ;;  %v6225_v38 = vrot.slane %v1940_v45, %v6051_v53 }
  0x4b   :  { %8639 = vst [vmem:[#allocation34_spill] sm:$0xff] %v6207_v18  ;;  %8640 = vst [vmem:[#allocation35_spill] sm:$0xff] %v6210_v13  ;;  %v6228_v40 = vrot.slane %v1942_v5, %v6051_v53  ;;  %v6231_v30 = vrot.slane %v1200_v10, %v6051_v53  ;;  %v6234_v55 = vrot.slane %v1214_v56, %v6051_v53 }
  0x4c   :  { %8643 = vst [vmem:[#allocation38_spill] sm:$0xff] %v6219_v9  ;;  %8644 = vst [vmem:[#allocation39_spill] sm:$0xff] %v6222_v36  ;;  %v6237_v1 = vrot.slane %v2320_v21, %v6051_v53  ;;  %v6240_v2 = vrot.slane %v1768_v14, %v6051_v53  ;;  %v6243_v4 = vrot.slane %v1782_v63, %v6051_v53 }
  0x4d   :  { %8645 = vst [vmem:[#allocation40_spill] sm:$0xff] %v6225_v38  ;;  %8646 = vst [vmem:[#allocation41_spill] sm:$0xff] %v6228_v40  ;;  %v6246_v45 = vrot.slane %v1924_v32, %v6051_v53  ;;  %v6249_v5 = vrot.slane %v2322_v26, %v6051_v53  ;;  %v6252_v10 = vrot.slane %v2476_v27, %v6051_v53 }
  0x4e   :  { %8647 = vst [vmem:[#allocation42_spill] sm:$0xff] %v6231_v30  ;;  %8648 = vst [vmem:[#allocation43_spill] sm:$0xff] %v6234_v55  ;;  %v6255_v56 = vrot.slane %v2478_v0, %v6051_v53  ;;  %v6258_v21 = vrot.slane %v1938_v34, %v6051_v53  ;;  %v6265_v63 = vrot.slane %v2304_v39, %v6051_v53 }
  0x4f   :  { %8649 = vst [vmem:[#allocation44_spill] sm:$0xff] %v6237_v1  ;;  %8650 = vst [vmem:[#allocation45_spill] sm:$0xff] %v6240_v2  ;;  %v6268_v32 = vrot.slane %v2318_v42, %v6051_v53  ;;  %v6271_v26 = vrot.slane %v2460_v44, %v6051_v53  ;;  %v6274_v27 = vrot.slane %v2474_v17, %v6051_v53 }
  0x50   :  { %8651 = vst [vmem:[#allocation46_spill] sm:$0xff] %v6243_v4  ;;  %8652 = vst [vmem:[#allocation47_spill] sm:$0xff] %v6246_v45 }
  0x51   :  { %8653 = vst [vmem:[#allocation48_spill] sm:$0xff] %v6249_v5  ;;  %8654 = vst [vmem:[#allocation49_spill] sm:$0xff] %v6252_v10 }
  0x52   :  { %8655 = vst [vmem:[#allocation50_spill] sm:$0xff] %v6255_v56  ;;  %8656 = vst [vmem:[#allocation51_spill] sm:$0xff] %v6258_v21 }
  0x53   :  { %8659 = vst [vmem:[#allocation54_spill] sm:$0xff] %v6265_v63  ;;  %8660 = vst [vmem:[#allocation55_spill] sm:$0xff] %v6268_v32 }
  0x54   :  { %8661 = vst [vmem:[#allocation56_spill] sm:$0xff] %v6271_v26  ;;  %8662 = vst [vmem:[#allocation57_spill] sm:$0xff] %v6274_v27 }
  0x94   :  { %v6260_v14 = vpop.permute.xlu1 %155  ;;  %v6262_v2 = vpop.permute.xlu0 %150 }
  0x95   :  { %8657 = vst [vmem:[#allocation52_spill] sm:$0xff] %v6260_v14  ;;  %8658 = vst [vmem:[#allocation53_spill] sm:$0xff] %v6262_v2  ;;  %v1583_v0 = vmul.f32 %v6062_v3, %v6262_v2  ;;  %v1587_v34 = vmul.f32 %v6075_v11, %v6262_v2  ;;  %v2119_v21 = vmul.f32 %v6071_v8, %v6262_v2 }
  0x96   :  { %v2123_v39 = vmul.f32 %v6088_v19, %v6262_v2  ;;  %v1575_v42 = vmul.f32 %v6099_v25, %v6262_v2  ;;  %v1579_v44 = vmul.f32 %v6103_v28, %v6262_v2  ;;  %v2111_v17 = vmul.f32 %v6131_v47, %v6262_v2 }
  0x97   :  { %v2115_v53 = vmul.f32 %v6138_v54, %v6262_v2  ;;  %v1584_v27 = vmul.f32 %v6062_v3, %v6260_v14  ;;  %v1588_v26 = vmul.f32 %v6075_v11, %v6260_v14  ;;  %v2120_v32 = vmul.f32 %v6071_v8, %v6260_v14 }
  0x98   :  { %v2124_v63 = vmul.f32 %v6088_v19, %v6260_v14  ;;  %v6300_v45 = vpop.permute.xlu1 %304  ;;  %v6302_v4 = vpop.permute.xlu0 %299  ;;  %v6306_v36 = vmul.f32 %v6099_v25, %v6260_v14  ;;  %v6310_v9 = vmul.f32 %v6103_v28, %v6260_v14  ;;  %v6314_v55 = vmul.f32 %v6131_v47, %v6260_v14 }
  0x99   :  { %8663 = vst [vmem:[#allocation58_spill] sm:$0xff] %v6300_v45  ;;  %8664 = vst [vmem:[#allocation59_spill] sm:$0xff] %v6302_v4  ;;  %v6318_v30 = vmul.f32 %v6138_v54, %v6260_v14  ;;  %v1615_v29 = vmul.f32 %v6068_v7, %v6302_v4  ;;  %v1619_v31 = vmul.f32 %v6078_v12, %v6302_v4 }
  0x9a   :  { %v2151_v56 = vmul.f32 %v6082_v15, %v6302_v4  ;;  %v2155_v10 = vmul.f32 %v6091_v20, %v6302_v4  ;;  %v1607_v5 = vmul.f32 %v6112_v35, %v6302_v4  ;;  %v1611_v1 = vmul.f32 %v6125_v43, %v6302_v4 }
  0x9b   :  { %v2143_v14 = vmul.f32 %v6141_v57, %v6302_v4  ;;  %v2147_v40 = vmul.f32 %v6150_v62, %v6302_v4  ;;  %v1647_v38 = vadd.f32 %v1615_v29, %v1583_v0  ;;  %v1651_v13 = vadd.f32 %v1619_v31, %v1587_v34 }
  0x9c   :  { %v2183_v18 = vadd.f32 %v2151_v56, %v2119_v21  ;;  %v2187_v60 = vadd.f32 %v2155_v10, %v2123_v39  ;;  %v6336_v59 = vpop.permute.xlu1 %160  ;;  %v6338_v37 = vpop.permute.xlu0 %479  ;;  %v1639_v24 = vadd.f32 %v1607_v5, %v1575_v42  ;;  %v1643_v58 = vadd.f32 %v1611_v1, %v1579_v44 }
  0x9d   :  { %8665 = vst [vmem:[#allocation60_spill] sm:$0xff] %v6336_v59  ;;  %8666 = vst [vmem:[#allocation61_spill] sm:$0xff] %v6338_v37  ;;  %v2175_v48 = vadd.f32 %v2143_v14, %v2111_v17  ;;  %v2179_v2 = vadd.f32 %v2147_v40, %v2115_v53  ;;  %v1679_v28 = vmul.f32 %v6071_v8, %v6338_v37 }
  0x9e   :  { %v1683_v25 = vmul.f32 %v6088_v19, %v6338_v37  ;;  %v2215_v29 = vmul.f32 %v6109_v33, %v6338_v37  ;;  %v2219_v31 = vmul.f32 %v6128_v46, %v6338_v37  ;;  %v1671_v10 = vmul.f32 %v6131_v47, %v6338_v37 }
  0x9f   :  { %v1675_v1 = vmul.f32 %v6138_v54, %v6338_v37  ;;  %v2207_v53 = vmul.f32 %v6155_v51, %v6338_v37  ;;  %v2211_v40 = vmul.f32 %v6160_v6, %v6338_v37  ;;  %v1711_v5 = vadd.f32 %v1679_v28, %v1647_v38 }
  0xa0   :  { %v1715_v56 = vadd.f32 %v1683_v25, %v1651_v13  ;;  %v2247_v21 = vadd.f32 %v2215_v29, %v2183_v18  ;;  %v2251_v14 = vadd.f32 %v2219_v31, %v2187_v60  ;;  %v6356_v0 = vpop.permute.xlu1 %484  ;;  %v6358_v34 = vpop.permute.xlu0 %309  ;;  %v1703_v39 = vadd.f32 %v1671_v10, %v1639_v24 }
  0xa1   :  { %8667 = vst [vmem:[#allocation62_spill] sm:$0xff] %v6356_v0  ;;  %8668 = vst [vmem:[#allocation63_spill] sm:$0xff] %v6358_v34  ;;  %v1707_v42 = vadd.f32 %v1675_v1, %v1643_v58  ;;  %v2239_v44 = vadd.f32 %v2207_v53, %v2175_v48  ;;  %v2243_v17 = vadd.f32 %v2211_v40, %v2179_v2 }
  0xa2   :  { %v1616_v4 = vmul.f32 %v6068_v7, %v6300_v45  ;;  %v1620_v50 = vmul.f32 %v6078_v12, %v6300_v45  ;;  %v1680_v28 = vmul.f32 %v6071_v8, %v6356_v0  ;;  %v1684_v25 = vmul.f32 %v6088_v19, %v6356_v0 }
  0xa3   :  { %v2152_v60 = vmul.f32 %v6082_v15, %v6300_v45  ;;  %v2156_v58 = vmul.f32 %v6091_v20, %v6300_v45  ;;  %v2216_v48 = vmul.f32 %v6109_v33, %v6356_v0  ;;  %v2220_v24 = vmul.f32 %v6128_v46, %v6356_v0 }
  0xa4   :  { %v1648_v18 = vadd.f32 %v1616_v4, %v1584_v27  ;;  %v1652_v13 = vadd.f32 %v1620_v50, %v1588_v26  ;;  %v1608_v38 = vmul.f32 %v6112_v35, %v6300_v45  ;;  %v1612_v2 = vmul.f32 %v6125_v43, %v6300_v45  ;;  %v6380_v29 = vpop.permute.xlu1 %165  ;;  %v6382_v31 = vpop.permute.xlu0 %660 }
  0xa5   :  { %8669 = vst [vmem:[#allocation64_spill] sm:$0xff] %v6380_v29  ;;  %8670 = vst [vmem:[#allocation65_spill] sm:$0xff] %v6382_v31  ;;  %v2184_v10 = vadd.f32 %v2152_v60, %v2120_v32  ;;  %v2188_v1 = vadd.f32 %v2156_v58, %v2124_v63  ;;  %v1672_v53 = vmul.f32 %v6131_v47, %v6356_v0 }
  0xa6   :  { %v1676_v40 = vmul.f32 %v6138_v54, %v6356_v0  ;;  %v1835_v50 = vmul.f32 %v6082_v15, %v6382_v31  ;;  %v1839_v4 = vmul.f32 %v6091_v20, %v6382_v31  ;;  %v2371_v26 = vmul.f32 %v6120_v41, %v6382_v31 }
  0xa7   :  { %v2375_v27 = vmul.f32 %v6135_v52, %v6382_v31  ;;  %v1827_v63 = vmul.f32 %v6141_v57, %v6382_v31  ;;  %v1831_v32 = vmul.f32 %v6150_v62, %v6382_v31  ;;  %v2363_v60 = vmul.f32 %v6166_v16, %v6382_v31 }
  0xa8   :  { %v2367_v58 = vmul.f32 %v6173_v23, %v6382_v31  ;;  %v1867_v37 = vadd.f32 %v1835_v50, %v1711_v5  ;;  %v1871_v29 = vadd.f32 %v1839_v4, %v1715_v56  ;;  %v2403_v54 = vadd.f32 %v2371_v26, %v2247_v21  ;;  %v6404_v43 = vpop.permute.xlu1 %489  ;;  %v6406_v35 = vpop.permute.xlu0 %314 }
  0xa9   :  { %v2407_v47 = vadd.f32 %v2375_v27, %v2251_v14  ;;  %8671 = vst [vmem:[#allocation66_spill] sm:$0xff] %v6404_v43  ;;  %8672 = vst [vmem:[#allocation67_spill] sm:$0xff] %v6406_v35  ;;  %v1859_v19 = vadd.f32 %v1827_v63, %v1703_v39  ;;  %v1863_v8 = vadd.f32 %v1831_v32, %v1707_v42 }
  0xaa   :  { %v2395_v12 = vadd.f32 %v2363_v60, %v2239_v44  ;;  %v2399_v7 = vadd.f32 %v2367_v58, %v2243_v17  ;;  %v1712_v34 = vadd.f32 %v1680_v28, %v1648_v18  ;;  %v1716_v52 = vadd.f32 %v1684_v25, %v1652_v13  ;;  %v8678_v60 = vld [vmem:[#allocation17_spill] sm:$0xff] }
  0xab   :  { %v2248_v41 = vadd.f32 %v2216_v48, %v2184_v10  ;;  %v2252_v20 = vadd.f32 %v2220_v24, %v2188_v1  ;;  %v1640_v16 = vadd.f32 %v1608_v38, %v6306_v36  ;;  %v1644_v31 = vadd.f32 %v1612_v2, %v6310_v9  ;;  %v8675_v38 = vld [vmem:[#allocation27_spill] sm:$0xff] }
  0xac   :  { %v2144_v5 = vmul.f32 %v6141_v57, %v6300_v45  ;;  %v2148_v56 = vmul.f32 %v6150_v62, %v6300_v45  ;;  %v2208_v21 = vmul.f32 %v6155_v51, %v6356_v0  ;;  %v2212_v14 = vmul.f32 %v6160_v6, %v6356_v0  ;;  %v6426_v9 = vpop.permute.xlu1 %841  ;;  %v6428_v42 = vpop.permute.xlu0 %665 }
  0xad   :  { %v6420_v39 = vmul.f32 %v6062_v3, %v6336_v59  ;;  %v6424_v36 = vmul.f32 %v6075_v11, %v6336_v59  ;;  %8673 = vst [vmem:[#allocation68_spill] sm:$0xff] %v6426_v9  ;;  %8674 = vst [vmem:[#allocation69_spill] sm:$0xff] %v6428_v42  ;;  %v1704_v44 = vadd.f32 %v1672_v53, %v1640_v16 }
  0xae   :  { %v1708_v17 = vadd.f32 %v1676_v40, %v1644_v31  ;;  %v2176_v28 = vadd.f32 %v2144_v5, %v6314_v55  ;;  %v2180_v25 = vadd.f32 %v2148_v56, %v6318_v30  ;;  %v1991_v48 = vmul.f32 %v6109_v33, %v6426_v9  ;;  %v8679_v5 = vld [vmem:[#allocation21_spill] sm:$0xff] }
  0xaf   :  { %v1995_v24 = vmul.f32 %v6128_v46, %v6426_v9  ;;  %v2527_v18 = vmul.f32 %v6146_v61, %v6426_v9  ;;  %v2531_v13 = vmul.f32 %v6170_v22, %v6426_v9  ;;  %v1983_v16 = vmul.f32 %v6155_v51, %v6426_v9 }
  0xb0   :  { %v1987_v55 = vmul.f32 %v6160_v6, %v6426_v9  ;;  %v2519_v30 = vmul.f32 %v6183_v49, %v6426_v9  ;;  %v2523_v2 = vmul.f32 %v8675_v38, %v6426_v9  ;;  %v2023_v31 = vadd.f32 %v1991_v48, %v1867_v37  ;;  %v6448_v40 = vpop.permute.xlu1 %670  ;;  %v6450_v50 = vpop.permute.xlu0 %494 }
  0xb1   :  { %v2027_v10 = vadd.f32 %v1995_v24, %v1871_v29  ;;  %v2559_v1 = vadd.f32 %v2527_v18, %v2403_v54  ;;  %v2563_v53 = vadd.f32 %v2531_v13, %v2407_v47  ;;  %8676 = vst [vmem:[#allocation27_spill] sm:$0xff] %v6448_v40  ;;  %8677 = vst [vmem:[#allocation70_spill] sm:$0xff] %v6450_v50  ;;  %v8680_v54 = vld [vmem:[#allocation24_spill] sm:$0xff] }
  0xb2   :  { %v2015_v4 = vadd.f32 %v1983_v16, %v1859_v19  ;;  %v2019_v26 = vadd.f32 %v1987_v55, %v1863_v8  ;;  %v2551_v27 = vadd.f32 %v2519_v30, %v2395_v12  ;;  %v2555_v63 = vadd.f32 %v2523_v2, %v2399_v7  ;;  %v8683_v30 = vld [vmem:[#allocation26_spill] sm:$0xff] }
  0xb3   :  { %v1836_v32 = vmul.f32 %v6082_v15, %v6428_v42  ;;  %v1840_v58 = vmul.f32 %v8678_v60, %v6428_v42  ;;  %v2372_v37 = vmul.f32 %v8679_v5, %v6428_v42  ;;  %v2376_v47 = vmul.f32 %v8680_v54, %v6428_v42 }
  0xb4   :  { %v1828_v29 = vmul.f32 %v6141_v57, %v6428_v42  ;;  %v1832_v8 = vmul.f32 %v6150_v62, %v6428_v42  ;;  %v2240_v12 = vadd.f32 %v2208_v21, %v2176_v28  ;;  %v2244_v7 = vadd.f32 %v2212_v14, %v2180_v25  ;;  %v6464_v18 = vpop.permute.xlu1 %675  ;;  %v6466_v13 = vpop.permute.xlu0 %846 }
  0xb5   :  { %v1868_v19 = vadd.f32 %v1836_v32, %v1712_v34  ;;  %v1872_v56 = vadd.f32 %v1840_v58, %v1716_v52  ;;  %v2404_v48 = vadd.f32 %v2372_v37, %v2248_v41  ;;  %v2408_v24 = vadd.f32 %v2376_v47, %v2252_v20  ;;  %8681 = vst [vmem:[#allocation17_spill] sm:$0xff] %v6464_v18 }
  0xb6   :  { %8682 = vst [vmem:[#allocation21_spill] sm:$0xff] %v6466_v13  ;;  %v1860_v16 = vadd.f32 %v1828_v29, %v1704_v44  ;;  %v1864_v55 = vadd.f32 %v1832_v8, %v1708_v17  ;;  %v2364_v2 = vmul.f32 %v8683_v30, %v6428_v42  ;;  %v2368_v0 = vmul.f32 %v6173_v23, %v6428_v42 }
  0xb7   :  { %v1992_v21 = vmul.f32 %v6109_v33, %v6466_v13  ;;  %v1996_v52 = vmul.f32 %v6128_v46, %v6466_v13  ;;  %v2528_v20 = vmul.f32 %v6146_v61, %v6466_v13  ;;  %v2532_v41 = vmul.f32 %v6170_v22, %v6466_v13 }
  0xb8   :  { %v1984_v34 = vmul.f32 %v6155_v51, %v6466_v13  ;;  %v1988_v14 = vmul.f32 %v6160_v6, %v6466_v13  ;;  %v2396_v44 = vadd.f32 %v2364_v2, %v2240_v12  ;;  %v2400_v17 = vadd.f32 %v2368_v0, %v2244_v7  ;;  %v6484_v37 = vpop.permute.xlu1 %925 }
  0xb9   :  { %v2024_v28 = vadd.f32 %v1992_v21, %v1868_v19  ;;  %v2028_v25 = vadd.f32 %v1996_v52, %v1872_v56  ;;  %v2560_v32 = vadd.f32 %v2528_v20, %v2404_v48  ;;  %v2564_v58 = vadd.f32 %v2532_v41, %v2408_v24  ;;  %8684 = vst [vmem:[#allocation24_spill] sm:$0xff] %v6484_v37  ;;  %v6498_v21 = vpop.permute.xlu0 %851 }
  0xba   :  { %v2016_v47 = vadd.f32 %v1984_v34, %v1860_v16  ;;  %v2020_v29 = vadd.f32 %v1988_v14, %v1864_v55  ;;  %v2520_v8 = vmul.f32 %v6183_v49, %v6466_v13  ;;  %v2524_v42 = vmul.f32 %v8675_v38, %v6466_v13  ;;  %8685 = vst [vmem:[#allocation26_spill] sm:$0xff] %v6498_v21 }
  0xbb   :  { %v2055_v45 = vadd.f32 %v2023_v31, %v6484_v37  ;;  %v2059_v9 = vadd.f32 %v2027_v10, %v6484_v37  ;;  %v2591_v0 = vadd.f32 %v2559_v1, %v6484_v37  ;;  %v2595_v12 = vadd.f32 %v2563_v53, %v6484_v37 }
  0xbc   :  { %v2047_v7 = vadd.f32 %v2015_v4, %v6484_v37  ;;  %v2051_v19 = vadd.f32 %v2019_v26, %v6484_v37  ;;  %v2583_v56 = vadd.f32 %v2551_v27, %v6484_v37  ;;  %v2587_v48 = vadd.f32 %v2555_v63, %v6484_v37  ;;  %v6500_v31 = vpop.permute.xlu1 %930 }
  0xbd   :  { %v2087_v24 = vmax.f32 %v2055_v45, 0.0  ;;  %v2091_v16 = vmax.f32 %v2059_v9, 0.0  ;;  %v2623_v55 = vmax.f32 %v2591_v0, 0.0  ;;  %v2627_v2 = vmax.f32 %v2595_v12, 0.0  ;;  %8686 = vst [vmem:[#allocation71_spill] sm:$0xff] %v6500_v31 }
  0xbe   :  { %v2079_v10 = vmax.f32 %v2047_v7, 0.0  ;;  %v2083_v1 = vmax.f32 %v2051_v19, 0.0  ;;  %v2615_v52 = vmax.f32 %v2583_v56, 0.0  ;;  %v2619_v53 = vmax.f32 %v2587_v48, 0.0 }
  0xbf   :  { %v2655_v20 = vmax.f32 %v2087_v24, %v2623_v55  ;;  %v2659_v4 = vmax.f32 %v2091_v16, %v2627_v2  ;;  %v2056_v26 = vadd.f32 %v2024_v28, %v6500_v31  ;;  %v2060_v27 = vadd.f32 %v2028_v25, %v6500_v31  ;;  %v8687_v16 = vld [vmem:[#allocation63_spill] sm:$0xff]  ;;  %v8688_v55 = vld [vmem:[#allocation12_spill] sm:$0xff] }
  0xc0   :  { %v2647_v41 = vmax.f32 %v2079_v10, %v2615_v52  ;;  %v2651_v63 = vmax.f32 %v2083_v1, %v2619_v53  ;;  %v2592_v45 = vadd.f32 %v2560_v32, %v6500_v31  ;;  %v2596_v9 = vadd.f32 %v2564_v58, %v6500_v31  ;;  %v6510_v32 = vpop.permute.xlu0 %856 }
  0xc1   :  { %v5652_v34 = vpack.i.bf16 %v2659_v4, %v2655_v20  ;;  %v2088_v14 = vmax.f32 %v2056_v26, 0.0  ;;  %v2092_v0 = vmax.f32 %v2060_v27, 0.0  ;;  %v2048_v12 = vadd.f32 %v2016_v47, %v6500_v31  ;;  %8689 = vst [vmem:[#allocation72_spill] sm:$0xff] %v6510_v32  ;;  %v8690_v47 = vld [vmem:[#allocation15_spill] sm:$0xff]  ;;  %v8692_v4 = vld [vmem:[#allocation16_spill] sm:$0xff] }
  0xc2   :  { %v5639_v7 = vpack.i.bf16 %v2651_v63, %v2647_v41  ;;  %v2624_v19 = vmax.f32 %v2592_v45, 0.0  ;;  %v2628_v56 = vmax.f32 %v2596_v9, 0.0  ;;  %v2052_v48 = vadd.f32 %v2020_v29, %v6500_v31 }
  0xc3   :  { %5653 = vxpose.xlu1.b32.start [1/4] (short) (narrow) %v5652_v34, 8  ;;  %v2080_v28 = vmax.f32 %v2048_v12, 0.0  ;;  %v2552_v24 = vadd.f32 %v2520_v8, %v2396_v44  ;;  %v2556_v25 = vadd.f32 %v2524_v42, %v2400_v17  ;;  %v1617_v2 = vmul.f32 %v8688_v55, %v8687_v16  ;;  %v8691_v42 = vld [vmem:[#allocation13_spill] sm:$0xff] }
  0xc4   :  { %5640 = vxpose.xlu0.b32.start [1/4] (short) (narrow) %v5639_v7, 8  ;;  %v2656_v58 = vmax.f32 %v2088_v14, %v2624_v19  ;;  %v2660_v10 = vmax.f32 %v2092_v0, %v2628_v56  ;;  %v2084_v1 = vmax.f32 %v2052_v48, 0.0  ;;  %v1621_v52 = vmul.f32 %v8690_v47, %v8687_v16  ;;  %v6534_v56 = vpop.permute.xlu0 %935 }
  0xc5   :  { %v2584_v53 = vadd.f32 %v2552_v24, %v6500_v31  ;;  %v2588_v29 = vadd.f32 %v2556_v25, %v6500_v31  ;;  %v1649_v20 = vadd.f32 %v1617_v2, %v6420_v39  ;;  %v1681_v44 = vmul.f32 %v8691_v42, %v6404_v43  ;;  %8693 = vst [vmem:[#allocation73_spill] sm:$0xff] %v6534_v56 }
  0xc6   :  { %v5654_v17 = vpack.i.bf16 %v2660_v10, %v2656_v58  ;;  %v1653_v8 = vadd.f32 %v1621_v52, %v6424_v36  ;;  %v1685_v26 = vmul.f32 %v8692_v4, %v6404_v43  ;;  %v1837_v27 = vmul.f32 %v6082_v15, %v6448_v40 }
  0xc7   :  { %v2616_v41 = vmax.f32 %v2584_v53, 0.0  ;;  %v2620_v63 = vmax.f32 %v2588_v29, 0.0  ;;  %v1713_v45 = vadd.f32 %v1681_v44, %v1649_v20  ;;  %v1841_v9 = vmul.f32 %v8678_v60, %v6448_v40 }
  0xc8   :  { %5655 = vxpose.xlu1.b32.cont [2/4] (short) (narrow) %v5654_v17, 8  ;;  %v1717_v39 = vadd.f32 %v1685_v26, %v1653_v8  ;;  %v1993_v34 = vmul.f32 %v6109_v33, %v6498_v21  ;;  %v1997_v36 = vmul.f32 %v6128_v46, %v6498_v21  ;;  %v2121_v14 = vmul.f32 %v8691_v42, %v6336_v59  ;;  %v8694_v26 = vld [vmem:[#allocation18_spill] sm:$0xff] }
  0xc9   :  { %v2648_v0 = vmax.f32 %v2080_v28, %v2616_v41  ;;  %v2652_v12 = vmax.f32 %v2084_v1, %v2620_v63  ;;  %v1869_v7 = vadd.f32 %v1837_v27, %v1713_v45  ;;  %v2125_v19 = vmul.f32 %v8692_v4, %v6336_v59 }
  0xca   :  { %v1873_v48 = vadd.f32 %v1841_v9, %v1717_v39  ;;  %v2153_v24 = vmul.f32 %v6082_v15, %v8687_v16  ;;  %v2157_v25 = vmul.f32 %v8678_v60, %v8687_v16  ;;  %v2217_v2 = vmul.f32 %v6109_v33, %v6404_v43  ;;  %v8695_v9 = vld [vmem:[#allocation19_spill] sm:$0xff] }
  0xcb   :  { %v5641_v58 = vpack.i.bf16 %v2652_v12, %v2648_v0  ;;  %v2025_v10 = vadd.f32 %v1993_v34, %v1869_v7  ;;  %v2221_v28 = vmul.f32 %v6128_v46, %v6404_v43  ;;  %v2373_v1 = vmul.f32 %v8679_v5, %v6448_v40  ;;  %v8697_v0 = vld [vmem:[#allocation22_spill] sm:$0xff]  ;;  %v8698_v7 = vld [vmem:[#allocation23_spill] sm:$0xff] }
  0xcc   :  { %v2029_v52 = vadd.f32 %v1997_v36, %v1873_v48  ;;  %v2185_v53 = vadd.f32 %v2153_v24, %v2121_v14  ;;  %v2189_v29 = vadd.f32 %v2157_v25, %v2125_v19  ;;  %v2377_v20 = vmul.f32 %v8680_v54, %v6448_v40  ;;  %v8696_v36 = vld [vmem:[#allocation20_spill] sm:$0xff] }
  0xcd   :  { %5642 = vxpose.xlu0.b32.cont [2/4] (short) (narrow) %v5641_v58, 8  ;;  %v2057_v44 = vadd.f32 %v2025_v10, %v6534_v56  ;;  %v2529_v17 = vmul.f32 %v6146_v61, %v6498_v21  ;;  %v2533_v8 = vmul.f32 %v6170_v22, %v6498_v21  ;;  %v1577_v27 = vmul.f32 %v8694_v26, %v6336_v59  ;;  %v8699_v58 = vld [vmem:[#allocation25_spill] sm:$0xff] }
  0xce   :  { %v2061_v41 = vadd.f32 %v2029_v52, %v6534_v56  ;;  %v2249_v63 = vadd.f32 %v2217_v2, %v2185_v53  ;;  %v2253_v45 = vadd.f32 %v2221_v28, %v2189_v29  ;;  %v1581_v39 = vmul.f32 %v8695_v9, %v6336_v59 }
  0xcf   :  { %v2089_v34 = vmax.f32 %v2057_v44, 0.0  ;;  %v1609_v14 = vmul.f32 %v8696_v36, %v8687_v16  ;;  %v1613_v12 = vmul.f32 %v8697_v0, %v8687_v16  ;;  %v1673_v19 = vmul.f32 %v8698_v7, %v6404_v43 }
  0xd0   :  { %v2093_v48 = vmax.f32 %v2061_v41, 0.0  ;;  %v2405_v24 = vadd.f32 %v2373_v1, %v2249_v63  ;;  %v2409_v25 = vadd.f32 %v2377_v20, %v2253_v45  ;;  %v1677_v2 = vmul.f32 %v8699_v58, %v6404_v43 }
  0xd1   :  { %v1641_v10 = vadd.f32 %v1609_v14, %v1577_v27  ;;  %v1645_v28 = vadd.f32 %v1613_v12, %v1581_v39  ;;  %v1829_v52 = vmul.f32 %v6141_v57, %v6448_v40  ;;  %v1833_v53 = vmul.f32 %v6150_v62, %v6448_v40 }
  0xd2   :  { %v2561_v29 = vadd.f32 %v2529_v17, %v2405_v24  ;;  %v2565_v44 = vadd.f32 %v2533_v8, %v2409_v25  ;;  %v1985_v31 = vmul.f32 %v6155_v51, %v6498_v21  ;;  %v1989_v1 = vmul.f32 %v6160_v6, %v6498_v21 }
  0xd3   :  { %v1705_v20 = vadd.f32 %v1673_v19, %v1641_v10  ;;  %v1709_v41 = vadd.f32 %v1677_v2, %v1645_v28  ;;  %v2113_v27 = vmul.f32 %v8698_v7, %v6336_v59  ;;  %v2117_v63 = vmul.f32 %v8699_v58, %v6336_v59 }
  0xd4   :  { %v2593_v45 = vadd.f32 %v2561_v29, %v6534_v56  ;;  %v2597_v39 = vadd.f32 %v2565_v44, %v6534_v56  ;;  %v2145_v17 = vmul.f32 %v6141_v57, %v8687_v16  ;;  %v2149_v8 = vmul.f32 %v6150_v62, %v8687_v16 }
  0xd5   :  { %v1861_v14 = vadd.f32 %v1829_v52, %v1705_v20  ;;  %v1865_v12 = vadd.f32 %v1833_v53, %v1709_v41  ;;  %v2209_v19 = vmul.f32 %v6155_v51, %v6404_v43  ;;  %v2213_v24 = vmul.f32 %v6160_v6, %v6404_v43 }
  0xd6   :  { %v2625_v25 = vmax.f32 %v2593_v45, 0.0  ;;  %v2629_v2 = vmax.f32 %v2597_v39, 0.0  ;;  %v2177_v10 = vadd.f32 %v2145_v17, %v2113_v27  ;;  %v2181_v28 = vadd.f32 %v2149_v8, %v2117_v63  ;;  %v8700_v39 = vld [vmem:[#allocation64_spill] sm:$0xff] }
  0xd7   :  { %v2017_v29 = vadd.f32 %v1985_v31, %v1861_v14  ;;  %v2021_v44 = vadd.f32 %v1989_v1, %v1865_v12  ;;  %v2365_v59 = vmul.f32 %v8683_v30, %v6448_v40  ;;  %v2369_v16 = vmul.f32 %v6173_v23, %v6448_v40 }
  0xd8   :  { %v2657_v52 = vmax.f32 %v2089_v34, %v2625_v25  ;;  %v2661_v53 = vmax.f32 %v2093_v48, %v2629_v2  ;;  %v2241_v20 = vadd.f32 %v2209_v19, %v2177_v10  ;;  %v2245_v41 = vadd.f32 %v2213_v24, %v2181_v28 }
  0xd9   :  { %v2049_v13 = vadd.f32 %v2017_v29, %v6534_v56  ;;  %v2053_v43 = vadd.f32 %v2021_v44, %v6534_v56  ;;  %v2521_v27 = vmul.f32 %v6183_v49, %v6498_v21  ;;  %v2525_v31 = vmul.f32 %v8675_v38, %v6498_v21 }
  0xda   :  { %v5656_v1 = vpack.i.bf16 %v2661_v53, %v2657_v52  ;;  %v2397_v63 = vadd.f32 %v2365_v59, %v2241_v20  ;;  %v2401_v45 = vadd.f32 %v2369_v16, %v2245_v41  ;;  %v1586_v17 = vmul.f32 %v6062_v3, %v8700_v39 }
  0xdb   :  { %v2081_v34 = vmax.f32 %v2049_v13, 0.0  ;;  %v2085_v48 = vmax.f32 %v2053_v43, 0.0  ;;  %v1590_v8 = vmul.f32 %v6075_v11, %v8700_v39  ;;  %v1618_v14 = vmul.f32 %v8688_v55, %v6406_v35 }
  0xdc   :  { %5657 = vxpose.xlu1.b32.cont [3/4] (short) (narrow) %v5656_v1, 8  ;;  %v2553_v12 = vadd.f32 %v2521_v27, %v2397_v63  ;;  %v2557_v19 = vadd.f32 %v2525_v31, %v2401_v45  ;;  %v1622_v24 = vmul.f32 %v8690_v47, %v6406_v35  ;;  %v1682_v59 = vmul.f32 %v8691_v42, %v6450_v50 }
  0xdd   :  { %v1650_v16 = vadd.f32 %v1618_v14, %v1586_v17  ;;  %v1686_v13 = vmul.f32 %v8692_v4, %v6450_v50  ;;  %v1838_v43 = vmul.f32 %v6082_v15, %v6464_v18  ;;  %v1842_v25 = vmul.f32 %v8678_v60, %v6464_v18  ;;  %v6632_v14 = vpop.permute.xlu1 %940 }
  0xde   :  { %v2585_v2 = vadd.f32 %v2553_v12, %v6534_v56  ;;  %v2589_v10 = vadd.f32 %v2557_v19, %v6534_v56  ;;  %v1654_v28 = vadd.f32 %v1622_v24, %v1590_v8  ;;  %v1994_v29 = vmul.f32 %v6109_v33, %v6510_v32  ;;  %8701 = vst [vmem:[#allocation74_spill] sm:$0xff] %v6632_v14  ;;  %v8740_v56 = vld [vmem:[#allocation71_spill] sm:$0xff] }
  0xdf   :  { %v1714_v44 = vadd.f32 %v1682_v59, %v1650_v16  ;;  %v1998_v52 = vmul.f32 %v6128_v46, %v6510_v32  ;;  %v2122_v53 = vmul.f32 %v8691_v42, %v8700_v39  ;;  %v2126_v20 = vmul.f32 %v8692_v4, %v8700_v39 }
  0xe0   :  { %v2617_v41 = vmax.f32 %v2585_v2, 0.0  ;;  %v2621_v27 = vmax.f32 %v2589_v10, 0.0  ;;  %v1718_v31 = vadd.f32 %v1686_v13, %v1654_v28  ;;  %v2154_v1 = vmul.f32 %v6082_v15, %v6406_v35 }
  0xe1   :  { %v1870_v63 = vadd.f32 %v1838_v43, %v1714_v44  ;;  %v2158_v45 = vmul.f32 %v8678_v60, %v6406_v35  ;;  %v2218_v17 = vmul.f32 %v6109_v33, %v6450_v50  ;;  %v2222_v8 = vmul.f32 %v6128_v46, %v6450_v50 }
  0xe2   :  { %v2649_v12 = vmax.f32 %v2081_v34, %v2617_v41  ;;  %v2653_v19 = vmax.f32 %v2085_v48, %v2621_v27  ;;  %v1874_v24 = vadd.f32 %v1842_v25, %v1718_v31  ;;  %v2186_v59 = vadd.f32 %v2154_v1, %v2122_v53 }
  0xe3   :  { %v2026_v16 = vadd.f32 %v1994_v29, %v1870_v63  ;;  %v2190_v13 = vadd.f32 %v2158_v45, %v2126_v20  ;;  %v2374_v15 = vmul.f32 %v8679_v5, %v6464_v18  ;;  %v2378_v60 = vmul.f32 %v8680_v54, %v6464_v18 }
  0xe4   :  { %v5643_v43 = vpack.i.bf16 %v2653_v19, %v2649_v12  ;;  %v2030_v2 = vadd.f32 %v1998_v52, %v1874_v24  ;;  %v2250_v33 = vadd.f32 %v2218_v17, %v2186_v59  ;;  %v2530_v46 = vmul.f32 %v6146_v61, %v6510_v32 }
  0xe5   :  { %v2058_v10 = vadd.f32 %v2026_v16, %v6632_v14  ;;  %v2254_v34 = vadd.f32 %v2222_v8, %v2190_v13  ;;  %v2534_v48 = vmul.f32 %v6170_v22, %v6510_v32  ;;  %v1578_v25 = vmul.f32 %v8694_v26, %v8700_v39 }
  0xe6   :  { %5644 = vxpose.xlu0.b32.cont [3/4] (short) (narrow) %v5643_v43, 8  ;;  %v2062_v5 = vadd.f32 %v2030_v2, %v6632_v14  ;;  %v2406_v28 = vadd.f32 %v2374_v15, %v2250_v33  ;;  %v1582_v54 = vmul.f32 %v8695_v9, %v8700_v39  ;;  %v1610_v29 = vmul.f32 %v8696_v36, %v6406_v35  ;;  %v8728_v9 = vld [vmem:[#allocation46_spill] sm:$0xff] }
  0xe7   :  { %v2090_v61 = vmax.f32 %v2058_v10, 0.0  ;;  %v2410_v44 = vadd.f32 %v2378_v60, %v2254_v34  ;;  %v1614_v52 = vmul.f32 %v8697_v0, %v6406_v35  ;;  %v1674_v22 = vmul.f32 %v8698_v7, %v6450_v50 }
  0xe8   :  { %v2094_v53 = vmax.f32 %v2062_v5, 0.0  ;;  %v2562_v20 = vadd.f32 %v2530_v46, %v2406_v28  ;;  %v1642_v41 = vadd.f32 %v1610_v29, %v1578_v25  ;;  %v1678_v27 = vmul.f32 %v8699_v58, %v6450_v50 }
  0xe9   :  { %v2566_v31 = vadd.f32 %v2534_v48, %v2410_v44  ;;  %v1646_v1 = vadd.f32 %v1614_v52, %v1582_v54  ;;  %v1830_v63 = vmul.f32 %v6141_v57, %v6464_v18  ;;  %v1834_v45 = vmul.f32 %v6150_v62, %v6464_v18 }
  0xea   :  { %v2594_v17 = vadd.f32 %v2562_v20, %v6632_v14  ;;  %v1706_v8 = vadd.f32 %v1674_v22, %v1642_v41  ;;  %v1986_v12 = vmul.f32 %v6155_v51, %v6510_v32  ;;  %v1990_v19 = vmul.f32 %v6160_v6, %v6510_v32  ;;  %v8702_v20 = vld [vmem:[#allocation53_spill] sm:$0xff]  ;;  %v8703_v41 = vld [vmem:[#allocation28_spill] sm:$0xff] }
  0xeb   :  { %v2598_v24 = vadd.f32 %v2566_v31, %v6632_v14  ;;  %v1710_v59 = vadd.f32 %v1678_v27, %v1646_v1  ;;  %v2114_v16 = vmul.f32 %v8698_v7, %v8700_v39  ;;  %v2118_v13 = vmul.f32 %v8699_v58, %v8700_v39  ;;  %v8718_v58 = vld [vmem:[#allocation48_spill] sm:$0xff] }
  0xec   :  { %v2626_v15 = vmax.f32 %v2594_v17, 0.0  ;;  %v1862_v60 = vadd.f32 %v1830_v63, %v1706_v8  ;;  %v2146_v43 = vmul.f32 %v6141_v57, %v6406_v35  ;;  %v2150_v2 = vmul.f32 %v6150_v62, %v6406_v35  ;;  %v8705_v17 = vld [vmem:[#allocation59_spill] sm:$0xff]  ;;  %v8706_v8 = vld [vmem:[#allocation32_spill] sm:$0xff] }
  0xed   :  { %v2630_v33 = vmax.f32 %v2598_v24, 0.0  ;;  %v1866_v46 = vadd.f32 %v1834_v45, %v1710_v59  ;;  %v2210_v10 = vmul.f32 %v6155_v51, %v6450_v50  ;;  %v2214_v34 = vmul.f32 %v6160_v6, %v6450_v50  ;;  %v8708_v24 = vld [vmem:[#allocation61_spill] sm:$0xff]  ;;  %v8709_v59 = vld [vmem:[#allocation30_spill] sm:$0xff] }
  0xee   :  { %v2658_v48 = vmax.f32 %v2090_v61, %v2626_v15  ;;  %v2018_v25 = vadd.f32 %v1986_v12, %v1862_v60  ;;  %v2178_v5 = vadd.f32 %v2146_v43, %v2114_v16  ;;  %v2182_v28 = vadd.f32 %v2150_v2, %v2118_v13  ;;  %v8707_v12 = vld [vmem:[#allocation33_spill] sm:$0xff]  ;;  %v8710_v15 = vld [vmem:[#allocation31_spill] sm:$0xff]  ;;  %v8712_v2 = vld [vmem:[#allocation34_spill] sm:$0xff] }
  0xef   :  { %v2662_v54 = vmax.f32 %v2094_v53, %v2630_v33  ;;  %v2022_v29 = vadd.f32 %v1990_v19, %v1866_v46  ;;  %v2366_v57 = vmul.f32 %v8683_v30, %v6464_v18  ;;  %v2370_v62 = vmul.f32 %v6173_v23, %v6464_v18  ;;  %v8704_v23 = vld [vmem:[#allocation29_spill] sm:$0xff] }
  0xf0   :  { %v2050_v44 = vadd.f32 %v2018_v25, %v6632_v14  ;;  %v2242_v52 = vadd.f32 %v2210_v10, %v2178_v5  ;;  %v2246_v22 = vadd.f32 %v2214_v34, %v2182_v28  ;;  %v2522_v51 = vmul.f32 %v6183_v49, %v6510_v32  ;;  %v8711_v43 = vld [vmem:[#allocation65_spill] sm:$0xff]  ;;  %v8713_v34 = vld [vmem:[#allocation35_spill] sm:$0xff]  ;;  %v8714_v25 = vld [vmem:[#allocation68_spill] sm:$0xff] }
  0xf1   :  { %v5658_v6 = vpack.i.bf16 %v2662_v54, %v2658_v48  ;;  %v2054_v61 = vadd.f32 %v2022_v29, %v6632_v14  ;;  %v2526_v53 = vmul.f32 %v8675_v38, %v6510_v32  ;;  %v1599_v27 = vmul.f32 %v8703_v41, %v8702_v20  ;;  %v8715_v5 = vld [vmem:[#allocation40_spill] sm:$0xff] }
  0xf2   :  { %v2082_v30 = vmax.f32 %v2050_v44, 0.0  ;;  %v2398_v31 = vadd.f32 %v2366_v57, %v2242_v52  ;;  %v2402_v1 = vadd.f32 %v2370_v62, %v2246_v22  ;;  %v1603_v63 = vmul.f32 %v8704_v23, %v8702_v20  ;;  %v8716_v57 = vld [vmem:[#allocation41_spill] sm:$0xff] }
  0xf3   :  { %5659 = vxpose.xlu1.b32.end [4/4] (short) (narrow) %v5658_v6, 8  ;;  %v2086_v45 = vmax.f32 %v2054_v61, 0.0  ;;  %v1631_v49 = vmul.f32 %v8706_v8, %v8705_v17  ;;  %v1635_v19 = vmul.f32 %v8707_v12, %v8705_v17  ;;  %v1695_v38 = vmul.f32 %v8709_v59, %v8708_v24 }
  0xf4   :  { %v2554_v16 = vadd.f32 %v2522_v51, %v2398_v31  ;;  %v2558_v13 = vadd.f32 %v2526_v53, %v2402_v1  ;;  %v1699_v60 = vmul.f32 %v8710_v15, %v8708_v24  ;;  %v1851_v33 = vmul.f32 %v8712_v2, %v8711_v43 }
  0xf5   :  { %v1663_v46 = vadd.f32 %v1631_v49, %v1599_v27  ;;  %v1667_v10 = vadd.f32 %v1635_v19, %v1603_v63  ;;  %v1855_v48 = vmul.f32 %v8713_v34, %v8711_v43  ;;  %v2007_v28 = vmul.f32 %v8715_v5, %v8714_v25 }
  0xf6   :  { %v2586_v54 = vadd.f32 %v2554_v16, %v6632_v14  ;;  %v2590_v29 = vadd.f32 %v2558_v13, %v6632_v14  ;;  %v2011_v62 = vmul.f32 %v8716_v57, %v8714_v25  ;;  %v2135_v44 = vmul.f32 %v8709_v59, %v8702_v20 }
  0xf7   :  { %v1727_v52 = vadd.f32 %v1695_v38, %v1663_v46  ;;  %v1731_v22 = vadd.f32 %v1699_v60, %v1667_v10  ;;  %v2139_v51 = vmul.f32 %v8710_v15, %v8702_v20  ;;  %v2167_v6 = vmul.f32 %v8712_v2, %v8705_v17  ;;  %v8717_v60 = vld [vmem:[#allocation44_spill] sm:$0xff] }
  0xf8   :  { %v2618_v61 = vmax.f32 %v2586_v54, 0.0  ;;  %v2622_v53 = vmax.f32 %v2590_v29, 0.0  ;;  %v2171_v27 = vmul.f32 %v8713_v34, %v8705_v17  ;;  %v2231_v31 = vmul.f32 %v8715_v5, %v8708_v24 }
  0xf9   :  { %v1883_v1 = vadd.f32 %v1851_v33, %v1727_v52  ;;  %v1887_v63 = vadd.f32 %v1855_v48, %v1731_v22  ;;  %v2199_v49 = vadd.f32 %v2167_v6, %v2135_v44  ;;  %v2235_v19 = vmul.f32 %v8716_v57, %v8708_v24  ;;  %v8719_v33 = vld [vmem:[#allocation49_spill] sm:$0xff]  ;;  %v8720_v44 = vld [vmem:[#allocation50_spill] sm:$0xff] }
  0xfa   :  { %v2650_v38 = vmax.f32 %v2082_v30, %v2618_v61  ;;  %v2654_v16 = vmax.f32 %v2086_v45, %v2622_v53  ;;  %v2203_v13 = vadd.f32 %v2171_v27, %v2139_v51  ;;  %v2387_v46 = vmul.f32 %v8717_v60, %v8711_v43  ;;  %v8722_v6 = vld [vmem:[#allocation37_spill] sm:$0xff]  ;;  %v8723_v53 = vld [vmem:[#allocation42_spill] sm:$0xff] }
  0xfb   :  { %v2039_v10 = vadd.f32 %v2007_v28, %v1883_v1  ;;  %v2043_v54 = vadd.f32 %v2011_v62, %v1887_v63  ;;  %v2263_v29 = vadd.f32 %v2231_v31, %v2199_v49  ;;  %v2391_v7 = vmul.f32 %v8718_v58, %v8711_v43  ;;  %v8721_v28 = vld [vmem:[#allocation36_spill] sm:$0xff]  ;;  %v8724_v31 = vld [vmem:[#allocation43_spill] sm:$0xff] }
  0xfc   :  { %v5645_v0 = vpack.i.bf16 %v2654_v16, %v2650_v38  ;;  %v2267_v36 = vadd.f32 %v2235_v19, %v2203_v13  ;;  %v2543_v48 = vmul.f32 %v8719_v33, %v8714_v25  ;;  %v2547_v52 = vmul.f32 %v8720_v44, %v8714_v25  ;;  %v8725_v38 = vld [vmem:[#allocation38_spill] sm:$0xff] }
  0xfd   :  { %v2071_v30 = vadd.f32 %v2039_v10, %v6484_v37  ;;  %v2075_v45 = vadd.f32 %v2043_v54, %v6484_v37  ;;  %v2419_v22 = vadd.f32 %v2387_v46, %v2263_v29  ;;  %v1591_v62 = vmul.f32 %v8721_v28, %v8702_v20  ;;  %v8727_v54 = vld [vmem:[#allocation45_spill] sm:$0xff] }
  0xfe   :  { %5646 = vxpose.xlu0.b32.end [4/4] (short) (narrow) %v5645_v0, 8  ;;  %v2423_v51 = vadd.f32 %v2391_v7, %v2267_v36  ;;  %v1595_v61 = vmul.f32 %v8722_v6, %v8702_v20  ;;  %v1623_v27 = vmul.f32 %v8723_v53, %v8705_v17  ;;  %v1627_v1 = vmul.f32 %v8724_v31, %v8705_v17  ;;  %v8726_v36 = vld [vmem:[#allocation39_spill] sm:$0xff] }
  0xff   :  { %v2103_v63 = vmax.f32 %v2071_v30, 0.0  ;;  %v2107_v49 = vmax.f32 %v2075_v45, 0.0  ;;  %v2575_v19 = vadd.f32 %v2543_v48, %v2419_v22  ;;  %v1687_v16 = vmul.f32 %v8725_v38, %v8708_v24  ;;  %v8729_v30 = vld [vmem:[#allocation47_spill] sm:$0xff] }
 0x100   :  { %v2579_v13 = vadd.f32 %v2547_v52, %v2423_v51  ;;  %v1655_v46 = vadd.f32 %v1623_v27, %v1591_v62  ;;  %v1659_v10 = vadd.f32 %v1627_v1, %v1595_v61  ;;  %v1691_v0 = vmul.f32 %v8726_v36, %v8708_v24  ;;  %v8730_v62 = vld [vmem:[#allocation51_spill] sm:$0xff] }
 0x101   :  { %v2607_v7 = vadd.f32 %v2575_v19, %v6484_v37  ;;  %v1843_v29 = vmul.f32 %v8727_v54, %v8711_v43  ;;  %v1847_v26 = vmul.f32 %v8728_v9, %v8711_v43  ;;  %v1999_v48 = vmul.f32 %v8729_v30, %v8714_v25 }
 0x102   :  { %v2611_v45 = vadd.f32 %v2579_v13, %v6484_v37  ;;  %v1719_v22 = vadd.f32 %v1687_v16, %v1655_v46  ;;  %v1723_v52 = vadd.f32 %v1691_v0, %v1659_v10  ;;  %v2003_v51 = vmul.f32 %v8730_v62, %v8714_v25 }
 0x103   :  { %v2639_v61 = vmax.f32 %v2607_v7, 0.0  ;;  %v2127_v27 = vmul.f32 %v8725_v38, %v8702_v20  ;;  %v2131_v1 = vmul.f32 %v8726_v36, %v8702_v20  ;;  %v2159_v19 = vmul.f32 %v8727_v54, %v8705_v17 }
 0x104   :  { %v2643_v4 = vmax.f32 %v2611_v45, 0.0  ;;  %v1875_v42 = vadd.f32 %v1843_v29, %v1719_v22  ;;  %v1879_v47 = vadd.f32 %v1847_v26, %v1723_v52  ;;  %v2163_v16 = vmul.f32 %v8728_v9, %v8705_v17  ;;  %v8731_v45 = vld [vmem:[#allocation54_spill] sm:$0xff]  ;;  %v8732_v26 = vld [vmem:[#allocation55_spill] sm:$0xff] }
 0x105   :  { %v2671_v13 = vmax.f32 %v2103_v63, %v2639_v61  ;;  %v2191_v46 = vadd.f32 %v2159_v19, %v2127_v27  ;;  %v2223_v10 = vmul.f32 %v8729_v30, %v8708_v24  ;;  %v2227_v0 = vmul.f32 %v8730_v62, %v8708_v24  ;;  %v8733_v63 = vld [vmem:[#allocation56_spill] sm:$0xff] }
 0x106   :  { %v2675_v7 = vmax.f32 %v2107_v49, %v2643_v4  ;;  %v2031_v55 = vadd.f32 %v1999_v48, %v1875_v42  ;;  %v2035_v11 = vadd.f32 %v2003_v51, %v1879_v47  ;;  %v2195_v3 = vadd.f32 %v2163_v16, %v2131_v1  ;;  %v8734_v47 = vld [vmem:[#allocation57_spill] sm:$0xff]  ;;  %v8735_v49 = vld [vmem:[#allocation52_spill] sm:$0xff] }
 0x107   :  { %v2255_v20 = vadd.f32 %v2223_v10, %v2191_v46  ;;  %v2379_v29 = vmul.f32 %v8731_v45, %v8711_v43  ;;  %v2383_v22 = vmul.f32 %v8732_v26, %v8711_v43  ;;  %v2535_v52 = vmul.f32 %v8733_v63, %v8714_v25  ;;  %v8738_v43 = vld [vmem:[#allocation69_spill] sm:$0xff] }
 0x108   :  { %v5678_v61 = vpack.i.bf16 %v2675_v7, %v2671_v13  ;;  %v2063_v27 = vadd.f32 %v2031_v55, %v6484_v37  ;;  %v2067_v19 = vadd.f32 %v2035_v11, %v6484_v37  ;;  %v2259_v24 = vadd.f32 %v2227_v0, %v2195_v3  ;;  %v8736_v13 = vld [vmem:[#allocation58_spill] sm:$0xff] }
 0x109   :  { %v2411_v4 = vadd.f32 %v2379_v29, %v2255_v20  ;;  %v2539_v42 = vmul.f32 %v8734_v47, %v8714_v25  ;;  %v1600_v48 = vmul.f32 %v8703_v41, %v8735_v49  ;;  %v1604_v51 = vmul.f32 %v8704_v23, %v8735_v49  ;;  %v8737_v11 = vld [vmem:[#allocation62_spill] sm:$0xff] }
 0x10a   :  { %5679 = vxpose.xlu1.b32.start [1/4] (short) (narrow) %v5678_v61, 8  ;;  %v2095_v1 = vmax.f32 %v2063_v27, 0.0  ;;  %v2099_v16 = vmax.f32 %v2067_v19, 0.0  ;;  %v2415_v46 = vadd.f32 %v2383_v22, %v2259_v24  ;;  %v1632_v55 = vmul.f32 %v8706_v8, %v8736_v13  ;;  %v8739_v27 = vld [vmem:[#allocation21_spill] sm:$0xff] }
 0x10b   :  { %v2567_v10 = vadd.f32 %v2535_v52, %v2411_v4  ;;  %v1636_v3 = vmul.f32 %v8707_v12, %v8736_v13  ;;  %v1696_v20 = vmul.f32 %v8709_v59, %v8737_v11  ;;  %v1700_v0 = vmul.f32 %v8710_v15, %v8737_v11 }
 0x10c   :  { %v2571_v7 = vadd.f32 %v2539_v42, %v2415_v46  ;;  %v1664_v29 = vadd.f32 %v1632_v55, %v1600_v48  ;;  %v1852_v61 = vmul.f32 %v8712_v2, %v8738_v43  ;;  %v1856_v24 = vmul.f32 %v8713_v34, %v8738_v43 }
 0x10d   :  { %v2599_v22 = vadd.f32 %v2567_v10, %v6484_v37  ;;  %v1668_v52 = vadd.f32 %v1636_v3, %v1604_v51  ;;  %v2008_v19 = vmul.f32 %v8715_v5, %v8739_v27  ;;  %v2012_v4 = vmul.f32 %v8716_v57, %v8739_v27 }
 0x10e   :  { %v2603_v25 = vadd.f32 %v2571_v7, %v6484_v37  ;;  %v1728_v17 = vadd.f32 %v1696_v20, %v1664_v29  ;;  %v2136_v42 = vmul.f32 %v8709_v59, %v8735_v49  ;;  %v2140_v48 = vmul.f32 %v8710_v15, %v8735_v49 }
 0x10f   :  { %v2631_v46 = vmax.f32 %v2599_v22, 0.0  ;;  %v1732_v55 = vadd.f32 %v1700_v0, %v1668_v52  ;;  %v2168_v51 = vmul.f32 %v8712_v2, %v8736_v13  ;;  %v2172_v10 = vmul.f32 %v8713_v34, %v8736_v13 }
 0x110   :  { %v2635_v3 = vmax.f32 %v2603_v25, 0.0  ;;  %v1884_v14 = vadd.f32 %v1852_v61, %v1728_v17  ;;  %v2232_v7 = vmul.f32 %v8715_v5, %v8737_v11  ;;  %v2236_v20 = vmul.f32 %v8716_v57, %v8737_v11 }
 0x111   :  { %v2663_v29 = vmax.f32 %v2095_v1, %v2631_v46  ;;  %v1888_v37 = vadd.f32 %v1856_v24, %v1732_v55  ;;  %v2200_v32 = vadd.f32 %v2168_v51, %v2136_v42  ;;  %v2204_v18 = vadd.f32 %v2172_v10, %v2140_v48 }
 0x112   :  { %v2667_v22 = vmax.f32 %v2099_v16, %v2635_v3  ;;  %v2040_v0 = vadd.f32 %v2008_v19, %v1884_v14  ;;  %v2388_v52 = vmul.f32 %v8717_v60, %v8738_v43  ;;  %v2392_v50 = vmul.f32 %v8718_v58, %v8738_v43 }
 0x113   :  { %v2044_v25 = vadd.f32 %v2012_v4, %v1888_v37  ;;  %v2264_v17 = vadd.f32 %v2232_v7, %v2200_v32  ;;  %v2268_v61 = vadd.f32 %v2236_v20, %v2204_v18  ;;  %v2544_v35 = vmul.f32 %v8719_v33, %v8739_v27 }
 0x114   :  { %v5665_v39 = vpack.i.bf16 %v2667_v22, %v2663_v29  ;;  %v2072_v1 = vadd.f32 %v2040_v0, %v8740_v56  ;;  %v2548_v24 = vmul.f32 %v8720_v44, %v8739_v27  ;;  %v1592_v14 = vmul.f32 %v8721_v28, %v8735_v49 }
 0x115   :  { %v2076_v16 = vadd.f32 %v2044_v25, %v8740_v56  ;;  %v2420_v19 = vadd.f32 %v2388_v52, %v2264_v17  ;;  %v2424_v42 = vadd.f32 %v2392_v50, %v2268_v61  ;;  %v1596_v37 = vmul.f32 %v8722_v6, %v8735_v49 }
 0x116   :  { %5666 = vxpose.xlu0.b32.start [1/4] (short) (narrow) %v5665_v39, 8  ;;  %v2104_v18 = vmax.f32 %v2072_v1, 0.0  ;;  %v1624_v32 = vmul.f32 %v8723_v53, %v8736_v13  ;;  %v1628_v4 = vmul.f32 %v8724_v31, %v8736_v13  ;;  %v1688_v48 = vmul.f32 %v8725_v38, %v8737_v11 }
 0x117   :  { %v2108_v46 = vmax.f32 %v2076_v16, 0.0  ;;  %v2576_v55 = vadd.f32 %v2544_v35, %v2420_v19  ;;  %v2580_v51 = vadd.f32 %v2548_v24, %v2424_v42  ;;  %v1692_v50 = vmul.f32 %v8726_v36, %v8737_v11 }
 0x118   :  { %v1656_v10 = vadd.f32 %v1624_v32, %v1592_v14  ;;  %v1660_v3 = vadd.f32 %v1628_v4, %v1596_v37  ;;  %v1844_v39 = vmul.f32 %v8727_v54, %v8738_v43  ;;  %v1848_v7 = vmul.f32 %v8728_v9, %v8738_v43 }
 0x119   :  { %v2608_v20 = vadd.f32 %v2576_v55, %v8740_v56  ;;  %v2612_v29 = vadd.f32 %v2580_v51, %v8740_v56  ;;  %v2000_v22 = vmul.f32 %v8729_v30, %v8739_v27  ;;  %v2004_v35 = vmul.f32 %v8730_v62, %v8739_v27 }
 0x11a   :  { %v1720_v0 = vadd.f32 %v1688_v48, %v1656_v10  ;;  %v1724_v52 = vadd.f32 %v1692_v50, %v1660_v3  ;;  %v2128_v25 = vmul.f32 %v8725_v38, %v8735_v49  ;;  %v2132_v17 = vmul.f32 %v8726_v36, %v8735_v49 }
 0x11b   :  { %v2640_v61 = vmax.f32 %v2608_v20, 0.0  ;;  %v2644_v1 = vmax.f32 %v2612_v29, 0.0  ;;  %v2160_v24 = vmul.f32 %v8727_v54, %v8736_v13  ;;  %v2164_v14 = vmul.f32 %v8728_v9, %v8736_v13 }
 0x11c   :  { %v1876_v16 = vadd.f32 %v1844_v39, %v1720_v0  ;;  %v1880_v19 = vadd.f32 %v1848_v7, %v1724_v52  ;;  %v2224_v42 = vmul.f32 %v8729_v30, %v8737_v11  ;;  %v2228_v37 = vmul.f32 %v8730_v62, %v8737_v11 }
 0x11d   :  { %v2672_v32 = vmax.f32 %v2104_v18, %v2640_v61  ;;  %v2676_v4 = vmax.f32 %v2108_v46, %v2644_v1  ;;  %v2192_v48 = vadd.f32 %v2160_v24, %v2128_v25  ;;  %v2196_v55 = vadd.f32 %v2164_v14, %v2132_v17  ;;  %v8742_v61 = vld [vmem:[#allocation63_spill] sm:$0xff] }
 0x11e   :  { %v2032_v51 = vadd.f32 %v2000_v22, %v1876_v16  ;;  %v2036_v50 = vadd.f32 %v2004_v35, %v1880_v19  ;;  %v2380_v10 = vmul.f32 %v8731_v45, %v8738_v43  ;;  %v2384_v3 = vmul.f32 %v8732_v26, %v8738_v43  ;;  %v8741_v22 = vld [vmem:[#allocation60_spill] sm:$0xff]  ;;  %v8743_v19 = vld [vmem:[#allocation66_spill] sm:$0xff] }
 0x11f   :  { %v5680_v39 = vpack.i.bf16 %v2676_v4, %v2672_v32  ;;  %v2256_v7 = vadd.f32 %v2224_v42, %v2192_v48  ;;  %v2260_v20 = vadd.f32 %v2228_v37, %v2196_v55  ;;  %v2536_v29 = vmul.f32 %v8733_v63, %v8739_v27 }
 0x120   :  { %v2064_v0 = vadd.f32 %v2032_v51, %v8740_v56  ;;  %v2068_v18 = vadd.f32 %v2036_v50, %v8740_v56  ;;  %v2540_v46 = vmul.f32 %v8734_v47, %v8739_v27  ;;  %v1601_v35 = vmul.f32 %v8703_v41, %v8741_v22 }
 0x121   :  { %5681 = vxpose.xlu1.b32.cont [2/4] (short) (narrow) %v5680_v39, 8  ;;  %v2412_v52 = vadd.f32 %v2380_v10, %v2256_v7  ;;  %v2416_v25 = vadd.f32 %v2384_v3, %v2260_v20  ;;  %v1605_v17 = vmul.f32 %v8704_v23, %v8741_v22  ;;  %v1633_v1 = vmul.f32 %v8706_v8, %v8742_v61 }
 0x122   :  { %v2096_v24 = vmax.f32 %v2064_v0, 0.0  ;;  %v2100_v14 = vmax.f32 %v2068_v18, 0.0  ;;  %v1637_v16 = vmul.f32 %v8707_v12, %v8742_v61  ;;  %v1697_v42 = vmul.f32 %v8709_v59, %v8743_v19 }
 0x123   :  { %v2568_v37 = vadd.f32 %v2536_v29, %v2412_v52  ;;  %v2572_v32 = vadd.f32 %v2540_v46, %v2416_v25  ;;  %v1665_v4 = vadd.f32 %v1633_v1, %v1601_v35  ;;  %v1701_v48 = vmul.f32 %v8710_v15, %v8743_v19 }
 0x124   :  { %v1669_v55 = vadd.f32 %v1637_v16, %v1605_v17  ;;  %v1853_v51 = vmul.f32 %v8712_v2, %v6448_v40  ;;  %v1857_v50 = vmul.f32 %v8713_v34, %v6448_v40  ;;  %v2009_v10 = vmul.f32 %v8715_v5, %v6498_v21 }
 0x125   :  { %v2600_v3 = vadd.f32 %v2568_v37, %v8740_v56  ;;  %v2604_v39 = vadd.f32 %v2572_v32, %v8740_v56  ;;  %v1729_v7 = vadd.f32 %v1697_v42, %v1665_v4  ;;  %v2013_v20 = vmul.f32 %v8716_v57, %v6498_v21 }
 0x126   :  { %v1733_v29 = vadd.f32 %v1701_v48, %v1669_v55  ;;  %v2137_v0 = vmul.f32 %v8709_v59, %v8741_v22  ;;  %v2141_v18 = vmul.f32 %v8710_v15, %v8741_v22  ;;  %v2169_v46 = vmul.f32 %v8712_v2, %v8742_v61 }
 0x127   :  { %v2632_v35 = vmax.f32 %v2600_v3, 0.0  ;;  %v2636_v52 = vmax.f32 %v2604_v39, 0.0  ;;  %v1885_v25 = vadd.f32 %v1853_v51, %v1729_v7  ;;  %v2173_v17 = vmul.f32 %v8713_v34, %v8742_v61  ;;  %v8744_v39 = vld [vmem:[#allocation73_spill] sm:$0xff] }
 0x128   :  { %v1889_v1 = vadd.f32 %v1857_v50, %v1733_v29  ;;  %v2201_v16 = vadd.f32 %v2169_v46, %v2137_v0  ;;  %v2233_v42 = vmul.f32 %v8715_v5, %v8743_v19  ;;  %v2237_v37 = vmul.f32 %v8716_v57, %v8743_v19 }
 0x129   :  { %v2664_v32 = vmax.f32 %v2096_v24, %v2632_v35  ;;  %v2668_v4 = vmax.f32 %v2100_v14, %v2636_v52  ;;  %v2041_v48 = vadd.f32 %v2009_v10, %v1885_v25  ;;  %v2205_v55 = vadd.f32 %v2173_v17, %v2141_v18 }
 0x12a   :  { %v2045_v56 = vadd.f32 %v2013_v20, %v1889_v1  ;;  %v2265_v27 = vadd.f32 %v2233_v42, %v2201_v16  ;;  %v2389_v51 = vmul.f32 %v8717_v60, %v6448_v40  ;;  %v2393_v3 = vmul.f32 %v8718_v58, %v6448_v40 }
 0x12b   :  { %v5667_v50 = vpack.i.bf16 %v2668_v4, %v2664_v32  ;;  %v2073_v7 = vadd.f32 %v2041_v48, %v8744_v39  ;;  %v2269_v29 = vadd.f32 %v2237_v37, %v2205_v55  ;;  %v2545_v0 = vmul.f32 %v8719_v33, %v6498_v21 }
 0x12c   :  { %v2077_v24 = vadd.f32 %v2045_v56, %v8744_v39  ;;  %v2421_v14 = vadd.f32 %v2389_v51, %v2265_v27  ;;  %v2549_v10 = vmul.f32 %v8720_v44, %v6498_v21  ;;  %v1593_v20 = vmul.f32 %v8721_v28, %v8741_v22 }
 0x12d   :  { %5668 = vxpose.xlu0.b32.cont [2/4] (short) (narrow) %v5667_v50, 8  ;;  %v2105_v18 = vmax.f32 %v2073_v7, 0.0  ;;  %v2425_v46 = vadd.f32 %v2393_v3, %v2269_v29  ;;  %v1597_v35 = vmul.f32 %v8722_v6, %v8741_v22  ;;  %v1625_v52 = vmul.f32 %v8723_v53, %v8742_v61 }
 0x12e   :  { %v2109_v25 = vmax.f32 %v2077_v24, 0.0  ;;  %v2577_v17 = vadd.f32 %v2545_v0, %v2421_v14  ;;  %v1629_v56 = vmul.f32 %v8724_v31, %v8742_v61  ;;  %v1689_v27 = vmul.f32 %v8725_v38, %v8743_v19 }
 0x12f   :  { %v2581_v1 = vadd.f32 %v2549_v10, %v2425_v46  ;;  %v1657_v16 = vadd.f32 %v1625_v52, %v1593_v20  ;;  %v1693_v42 = vmul.f32 %v8726_v36, %v8743_v19  ;;  %v1845_v37 = vmul.f32 %v8727_v54, %v6448_v40 }
 0x130   :  { %v2609_v32 = vadd.f32 %v2577_v17, %v8744_v39  ;;  %v1661_v4 = vadd.f32 %v1629_v56, %v1597_v35  ;;  %v1849_v48 = vmul.f32 %v8728_v9, %v6448_v40  ;;  %v2001_v55 = vmul.f32 %v8729_v30, %v6498_v21 }
 0x131   :  { %v2613_v51 = vadd.f32 %v2581_v1, %v8744_v39  ;;  %v1721_v3 = vadd.f32 %v1689_v27, %v1657_v16  ;;  %v2005_v50 = vmul.f32 %v8730_v62, %v6498_v21  ;;  %v2129_v7 = vmul.f32 %v8725_v38, %v8741_v22 }
 0x132   :  { %v2641_v29 = vmax.f32 %v2609_v32, 0.0  ;;  %v1725_v0 = vadd.f32 %v1693_v42, %v1661_v4  ;;  %v2133_v24 = vmul.f32 %v8726_v36, %v8741_v22  ;;  %v2161_v14 = vmul.f32 %v8727_v54, %v8742_v61 }
 0x133   :  { %v2645_v10 = vmax.f32 %v2613_v51, 0.0  ;;  %v1877_v20 = vadd.f32 %v1845_v37, %v1721_v3  ;;  %v2165_v46 = vmul.f32 %v8728_v9, %v8742_v61  ;;  %v2225_v35 = vmul.f32 %v8729_v30, %v8743_v19 }
 0x134   :  { %v2673_v52 = vmax.f32 %v2105_v18, %v2641_v29  ;;  %v1881_v17 = vadd.f32 %v1849_v48, %v1725_v0  ;;  %v2193_v56 = vadd.f32 %v2161_v14, %v2129_v7  ;;  %v2229_v27 = vmul.f32 %v8730_v62, %v8743_v19  ;;  %v8745_v0 = vld [vmem:[#allocation64_spill] sm:$0xff] }
 0x135   :  { %v2677_v1 = vmax.f32 %v2109_v25, %v2645_v10  ;;  %v2033_v16 = vadd.f32 %v2001_v55, %v1877_v20  ;;  %v2197_v42 = vadd.f32 %v2165_v46, %v2133_v24  ;;  %v2381_v32 = vmul.f32 %v8731_v45, %v6448_v40  ;;  %v8746_v20 = vld [vmem:[#allocation67_spill] sm:$0xff] }
 0x136   :  { %v2037_v4 = vadd.f32 %v2005_v50, %v1881_v17  ;;  %v2257_v37 = vadd.f32 %v2225_v35, %v2193_v56  ;;  %v2385_v51 = vmul.f32 %v8732_v26, %v6448_v40  ;;  %v2537_v3 = vmul.f32 %v8733_v63, %v6498_v21  ;;  %v8747_v56 = vld [vmem:[#allocation70_spill] sm:$0xff] }
 0x137   :  { %v5682_v18 = vpack.i.bf16 %v2677_v1, %v2673_v52  ;;  %v2065_v48 = vadd.f32 %v2033_v16, %v8744_v39  ;;  %v2261_v7 = vadd.f32 %v2229_v27, %v2197_v42  ;;  %v2541_v25 = vmul.f32 %v8734_v47, %v6498_v21 }
 0x138   :  { %v2069_v55 = vadd.f32 %v2037_v4, %v8744_v39  ;;  %v2413_v29 = vadd.f32 %v2381_v32, %v2257_v37  ;;  %v1602_v50 = vmul.f32 %v8703_v41, %v8745_v0  ;;  %v1606_v24 = vmul.f32 %v8704_v23, %v8745_v0  ;;  %v8748_v4 = vld [vmem:[#allocation17_spill] sm:$0xff] }
 0x139   :  { %5683 = vxpose.xlu1.b32.cont [3/4] (short) (narrow) %v5682_v18, 8  ;;  %v2097_v14 = vmax.f32 %v2065_v48, 0.0  ;;  %v2417_v10 = vadd.f32 %v2385_v51, %v2261_v7  ;;  %v1634_v46 = vmul.f32 %v8706_v8, %v8746_v20  ;;  %v1638_v35 = vmul.f32 %v8707_v12, %v8746_v20  ;;  %v8749_v48 = vld [vmem:[#allocation72_spill] sm:$0xff] }
 0x13a   :  { %v2101_v52 = vmax.f32 %v2069_v55, 0.0  ;;  %v2569_v17 = vadd.f32 %v2537_v3, %v2413_v29  ;;  %v1698_v27 = vmul.f32 %v8709_v59, %v8747_v56  ;;  %v1702_v1 = vmul.f32 %v8710_v15, %v8747_v56 }
 0x13b   :  { %v2573_v16 = vadd.f32 %v2541_v25, %v2417_v10  ;;  %v1666_v42 = vadd.f32 %v1634_v46, %v1602_v50  ;;  %v1670_v32 = vadd.f32 %v1638_v35, %v1606_v24  ;;  %v1854_v37 = vmul.f32 %v8712_v2, %v8748_v4 }
 0x13c   :  { %v2601_v51 = vadd.f32 %v2569_v17, %v8744_v39  ;;  %v1858_v18 = vmul.f32 %v8713_v34, %v8748_v4  ;;  %v2010_v3 = vmul.f32 %v8715_v5, %v8749_v48  ;;  %v2014_v7 = vmul.f32 %v8716_v57, %v8749_v48 }
 0x13d   :  { %v2605_v55 = vadd.f32 %v2573_v16, %v8744_v39  ;;  %v1730_v29 = vadd.f32 %v1698_v27, %v1666_v42  ;;  %v1734_v25 = vadd.f32 %v1702_v1, %v1670_v32  ;;  %v2138_v50 = vmul.f32 %v8709_v59, %v8745_v0 }
 0x13e   :  { %v2633_v24 = vmax.f32 %v2601_v51, 0.0  ;;  %v2142_v10 = vmul.f32 %v8710_v15, %v8745_v0  ;;  %v2170_v46 = vmul.f32 %v8712_v2, %v8746_v20  ;;  %v2174_v35 = vmul.f32 %v8713_v34, %v8746_v20 }
 0x13f   :  { %v2637_v17 = vmax.f32 %v2605_v55, 0.0  ;;  %v1886_v12 = vadd.f32 %v1854_v37, %v1730_v29  ;;  %v1890_v8 = vadd.f32 %v1858_v18, %v1734_v25  ;;  %v2234_v27 = vmul.f32 %v8715_v5, %v8747_v56  ;;  %v8750_v18 = vld [vmem:[#allocation74_spill] sm:$0xff] }
 0x140   :  { %v2665_v1 = vmax.f32 %v2097_v14, %v2633_v24  ;;  %v2202_v16 = vadd.f32 %v2170_v46, %v2138_v50  ;;  %v2206_v42 = vadd.f32 %v2174_v35, %v2142_v10  ;;  %v2238_v32 = vmul.f32 %v8716_v57, %v8747_v56 }
 0x141   :  { %v2669_v51 = vmax.f32 %v2101_v52, %v2637_v17  ;;  %v2042_v15 = vadd.f32 %v2010_v3, %v1886_v12  ;;  %v2046_v59 = vadd.f32 %v2014_v7, %v1890_v8  ;;  %v2390_v2 = vmul.f32 %v8717_v60, %v8748_v4 }
 0x142   :  { %v2266_v23 = vadd.f32 %v2234_v27, %v2202_v16  ;;  %v2270_v34 = vadd.f32 %v2238_v32, %v2206_v42  ;;  %v2394_v37 = vmul.f32 %v8718_v58, %v8748_v4  ;;  %v2546_v5 = vmul.f32 %v8719_v33, %v8749_v48 }
 0x143   :  { %v5669_v14 = vpack.i.bf16 %v2669_v51, %v2665_v1  ;;  %v2074_v55 = vadd.f32 %v2042_v15, %v8750_v18  ;;  %v2078_v29 = vadd.f32 %v2046_v59, %v8750_v18  ;;  %v2550_v12 = vmul.f32 %v8720_v44, %v8749_v48 }
 0x144   :  { %v2422_v8 = vadd.f32 %v2390_v2, %v2266_v23  ;;  %v2426_v57 = vadd.f32 %v2394_v37, %v2270_v34  ;;  %v1594_v60 = vmul.f32 %v8721_v28, %v8745_v0  ;;  %v1598_v52 = vmul.f32 %v8722_v6, %v8745_v0  ;;  %v8767_v28 = vld [vmem:[#allocation16_spill] sm:$0xff] }
 0x145   :  { %5670 = vxpose.xlu0.b32.cont [3/4] (short) (narrow) %v5669_v14, 8  ;;  %v2106_v58 = vmax.f32 %v2074_v55, 0.0  ;;  %v2110_v3 = vmax.f32 %v2078_v29, 0.0  ;;  %v1626_v33 = vmul.f32 %v8723_v53, %v8746_v20  ;;  %v1630_v59 = vmul.f32 %v8724_v31, %v8746_v20  ;;  %v8763_v31 = vld [vmem:[#allocation65_spill] sm:$0xff] }
 0x146   :  { %v2578_v15 = vadd.f32 %v2546_v5, %v2422_v8  ;;  %v2582_v7 = vadd.f32 %v2550_v12, %v2426_v57  ;;  %v1690_v23 = vmul.f32 %v8725_v38, %v8747_v56  ;;  %v1694_v44 = vmul.f32 %v8726_v36, %v8747_v56 }
 0x147   :  { %v1658_v25 = vadd.f32 %v1626_v33, %v1594_v60  ;;  %v1662_v50 = vadd.f32 %v1630_v59, %v1598_v52  ;;  %v1846_v24 = vmul.f32 %v8727_v54, %v8748_v4  ;;  %v1850_v10 = vmul.f32 %v8728_v9, %v8748_v4 }
 0x148   :  { %v2610_v46 = vadd.f32 %v2578_v15, %v8750_v18  ;;  %v2614_v35 = vadd.f32 %v2582_v7, %v8750_v18  ;;  %v2002_v17 = vmul.f32 %v8729_v30, %v8749_v48  ;;  %v2006_v27 = vmul.f32 %v8730_v62, %v8749_v48 }
 0x149   :  { %v1722_v1 = vadd.f32 %v1690_v23, %v1658_v25  ;;  %v1726_v16 = vadd.f32 %v1694_v44, %v1662_v50  ;;  %v2130_v42 = vmul.f32 %v8725_v38, %v8745_v0  ;;  %v2134_v32 = vmul.f32 %v8726_v36, %v8745_v0  ;;  %v8752_v23 = vld [vmem:[#allocation9_spill] sm:$0xff]  ;;  %v7050_v44 = vld [vmem:[%s8421_s0 + $0x48] sm:$0xff] }
 0x14a   :  { %v2642_v51 = vmax.f32 %v2610_v46, 0.0  ;;  %v2646_v2 = vmax.f32 %v2614_v35, 0.0  ;;  %v2162_v34 = vmul.f32 %v8727_v54, %v8746_v20  ;;  %v2166_v37 = vmul.f32 %v8728_v9, %v8746_v20  ;;  %8753 = vst [vmem:[#allocation35_spill] sm:$0xff] %v7050_v44 }
 0x14b   :  { %v1878_v5 = vadd.f32 %v1846_v24, %v1722_v1  ;;  %v1882_v14 = vadd.f32 %v1850_v10, %v1726_v16  ;;  %v2226_v55 = vmul.f32 %v8729_v30, %v8747_v56  ;;  %v2230_v29 = vmul.f32 %v8730_v62, %v8747_v56  ;;  %v7039_v62 = vld [vmem:[%s8421_s0 + $0x40] sm:$0xff] }
 0x14c   :  { %v2674_v12 = vmax.f32 %v2106_v58, %v2642_v51  ;;  %v2678_v8 = vmax.f32 %v2110_v3, %v2646_v2  ;;  %v2194_v57 = vadd.f32 %v2162_v34, %v2130_v42  ;;  %v2198_v60 = vadd.f32 %v2166_v37, %v2134_v32  ;;  %8751 = vst [vmem:[#allocation34_spill] sm:$0xff] %v7039_v62 }
 0x14d   :  { %v2034_v52 = vadd.f32 %v2002_v17, %v1878_v5  ;;  %v2038_v33 = vadd.f32 %v2006_v27, %v1882_v14  ;;  %v2382_v54 = vmul.f32 %v8731_v45, %v8748_v4  ;;  %v2386_v9 = vmul.f32 %v8732_v26, %v8748_v4 }
 0x14e   :  { %v5684_v59 = vpack.i.bf16 %v2678_v8, %v2674_v12  ;;  %v2258_v15 = vadd.f32 %v2226_v55, %v2194_v57  ;;  %v2262_v7 = vadd.f32 %v2230_v29, %v2198_v60  ;;  %v2538_v30 = vmul.f32 %v8733_v63, %v8749_v48  ;;  %v7055_v63 = vld [vmem:[%s8421_s0] sm:$0xff]  ;;  %v8755_v12 = vld [vmem:[#allocation10_spill] sm:$0xff] }
 0x14f   :  { %v2066_v58 = vadd.f32 %v2034_v52, %v8750_v18  ;;  %v2070_v3 = vadd.f32 %v2038_v33, %v8750_v18  ;;  %v2542_v45 = vmul.f32 %v8734_v47, %v8749_v48  ;;  %v62_v26 = vrot.slane %v7039_v62, %v8752_v23  ;;  %8754 = vst [vmem:[#allocation40_spill] sm:$0xff] %v7055_v63 }
 0x150   :  { %5685 = vxpose.xlu1.b32.end [4/4] (short) (narrow) %v5684_v59, 8  ;;  %v2414_v25 = vadd.f32 %v2382_v54, %v2258_v15  ;;  %v2418_v50 = vadd.f32 %v2386_v9, %v2262_v7  ;;  %v210_v24 = vrot.slane %v7050_v44, %v8752_v23  ;;  %v390_v47 = vrot.slane %v7055_v63, %v8752_v23  ;;  %v8756_v15 = vld [vmem:[#allocation53_spill] sm:$0xff] }
 0x151   :  { %v2098_v10 = vmax.f32 %v2066_v58, 0.0  ;;  %v2102_v46 = vmax.f32 %v2070_v3, 0.0  ;;  %v70_v35 = vcombine.high %v62_v26, %v62_v26  ;;  %v78_v17 = vrot.slane %v62_v26, %v8752_v23 }
 0x152   :  { %v2570_v27 = vadd.f32 %v2538_v30, %v2414_v25  ;;  %v2574_v1 = vadd.f32 %v2542_v45, %v2418_v50  ;;  %v218_v16 = vcombine.high %v210_v24, %v210_v24  ;;  %v226_v42 = vrot.slane %v210_v24, %v8752_v23  ;;  %v8757_v25 = vld [vmem:[#allocation59_spill] sm:$0xff]  ;;  %v7091_v24 = vld [vmem:[%s8421_s0 + $0x8] sm:$0xff] }
 0x153   :  { %v92_v32 = vrot.slane %v70_v35, %v8752_v23  ;;  %v100_v51 = vcombine.high %v78_v17, %v78_v17  ;;  %v398_v2 = vcombine.high %v390_v47, %v390_v47  ;;  %v406_v34 = vrot.slane %v390_v47, %v8752_v23  ;;  %8758 = vst [vmem:[#allocation41_spill] sm:$0xff] %v7091_v24 }
 0x154   :  { %v2602_v37 = vadd.f32 %v2570_v27, %v8750_v18  ;;  %v2606_v5 = vadd.f32 %v2574_v1, %v8750_v18  ;;  %v240_v14 = vrot.slane %v218_v16, %v8752_v23  ;;  %v248_v55 = vcombine.high %v226_v42, %v226_v42 }
 0x155   :  { %v102_v29 = vcombine.high %v92_v32, %v92_v32  ;;  %v7069_v8 = vrot.slane %v100_v51, %v8755_v12  ;;  %v420_v57 = vrot.slane %v398_v2, %v8752_v23  ;;  %v428_v60 = vcombine.high %v406_v34, %v406_v34  ;;  %v8760_v2 = vld [vmem:[#allocation11_spill] sm:$0xff] }
 0x156   :  { %v2634_v52 = vmax.f32 %v2602_v37, 0.0  ;;  %v2638_v33 = vmax.f32 %v2606_v5, 0.0  ;;  %v250_v54 = vcombine.high %v240_v14, %v240_v14  ;;  %v7073_v9 = vrot.slane %v248_v55, %v8755_v12  ;;  %v8761_v37 = vld [vmem:[#allocation68_spill] sm:$0xff] }
 0x157   :  { %v7076_v59 = vrot.slane %v102_v29, %v8755_v12  ;;  %v176_v7 = vmul.f32 %v8756_v15, %v7069_v8  ;;  %v430_v30 = vcombine.high %v420_v57, %v420_v57  ;;  %v7081_v58 = vrot.slane %v428_v60, %v8755_v12 }
 0x158   :  { %v2666_v3 = vmax.f32 %v2098_v10, %v2634_v52  ;;  %v2670_v45 = vmax.f32 %v2102_v46, %v2638_v33  ;;  %v7084_v26 = vrot.slane %v250_v54, %v8755_v12  ;;  %v325_v50 = vmul.f32 %v8757_v25, %v7073_v9  ;;  %v8759_v10 = vld [vmem:[#allocation61_spill] sm:$0xff]  ;;  %v8762_v52 = vld [vmem:[#allocation14_spill] sm:$0xff] }
 0x159   :  { %v180_v47 = vmul.f32 %v8756_v15, %v7076_v59  ;;  %v7096_v35 = vrot.slane %v430_v30, %v8755_v12  ;;  %v505_v46 = vmul.f32 %v8759_v10, %v7081_v58  ;;  %v571_v27 = vrot.slane %v7091_v24, %v8752_v23 }
 0x15a   :  { %v5671_v1 = vpack.i.bf16 %v2670_v45, %v2666_v3  ;;  %v329_v16 = vmul.f32 %v8757_v25, %v7084_v26  ;;  %v357_v51 = vadd.f32 %v325_v50, %v176_v7  ;;  %v867_v5 = vmul.f32 %v8761_v37, %v8760_v2 }
 0x15b   :  { %v509_v55 = vmul.f32 %v8759_v10, %v7096_v35  ;;  %v579_v29 = vcombine.high %v571_v27, %v571_v27  ;;  %v587_v60 = vrot.slane %v571_v27, %v8752_v23  ;;  %v871_v33 = vmul.f32 %v8761_v37, %v8762_v52 }
 0x15c   :  { %5672 = vxpose.xlu0.b32.end [4/4] (short) (narrow) %v5671_v1, 8  ;;  %v361_v54 = vadd.f32 %v329_v16, %v180_v47  ;;  %v537_v30 = vadd.f32 %v505_v46, %v357_v51  ;;  %v1015_v3 = vmul.f32 %v7081_v58, %v8756_v15  ;;  %v1019_v7 = vmul.f32 %v7096_v35, %v8756_v15  ;;  %v8764_v1 = vld [vmem:[#allocation12_spill] sm:$0xff]  ;;  %v8765_v46 = vld [vmem:[#allocation15_spill] sm:$0xff]  ;;  %v8766_v51 = vld [vmem:[#allocation13_spill] sm:$0xff] }
 0x15d   :  { %v601_v45 = vrot.slane %v579_v29, %v8752_v23  ;;  %v609_v50 = vcombine.high %v587_v60, %v587_v60  ;;  %v1111_v36 = vmul.f32 %v8760_v2, %v8759_v10  ;;  %v1115_v27 = vmul.f32 %v8762_v52, %v8759_v10 }
 0x15e   :  { %v541_v38 = vadd.f32 %v509_v55, %v361_v54  ;;  %v1267_v47 = vmul.f32 %v8764_v1, %v8763_v31  ;;  %v1271_v16 = vmul.f32 %v8765_v46, %v8763_v31  ;;  %v1423_v53 = vmul.f32 %v8766_v51, %v8761_v37 }
 0x15f   :  { %v611_v6 = vcombine.high %v601_v45, %v601_v45  ;;  %v7127_v29 = vrot.slane %v609_v50, %v8755_v12  ;;  %v1427_v41 = vmul.f32 %v8767_v28, %v8761_v37  ;;  %v7132_v24 = vrot.slane %v78_v17, %v8755_v12 }
 0x160   :  { %v7135_v55 = vrot.slane %v92_v32, %v8755_v12  ;;  %v7138_v54 = vrot.slane %v226_v42, %v8755_v12  ;;  %v7141_v23 = vrot.slane %v240_v14, %v8755_v12  ;;  %v7144_v63 = vrot.slane %v406_v34, %v8755_v12 }
 0x161   :  { %v7147_v50 = vrot.slane %v611_v6, %v8755_v12  ;;  %v686_v44 = vmul.f32 %v8763_v31, %v7127_v29  ;;  %v1047_v17 = vmul.f32 %v7127_v29, %v8757_v25  ;;  %v168_v32 = vmul.f32 %v8756_v15, %v7132_v24 }
 0x162   :  { %v172_v42 = vmul.f32 %v8756_v15, %v7135_v55  ;;  %v317_v14 = vmul.f32 %v8757_v25, %v7138_v54  ;;  %v321_v34 = vmul.f32 %v8757_v25, %v7141_v23  ;;  %v7162_v6 = vrot.slane %v420_v57, %v8755_v12 }
 0x163   :  { %v690_v62 = vmul.f32 %v8763_v31, %v7147_v50  ;;  %v718_v18 = vadd.f32 %v686_v44, %v537_v30  ;;  %v1051_v48 = vmul.f32 %v7147_v50, %v8757_v25  ;;  %v1079_v4 = vadd.f32 %v1047_v17, %v1015_v3  ;;  %v8768_v17 = vld [vmem:[#allocation24_spill] sm:$0xff] }
 0x164   :  { %v349_v56 = vadd.f32 %v317_v14, %v168_v32  ;;  %v353_v20 = vadd.f32 %v321_v34, %v172_v42  ;;  %v497_v0 = vmul.f32 %v8759_v10, %v7144_v63  ;;  %v501_v39 = vmul.f32 %v8759_v10, %v7162_v6 }
 0x165   :  { %v722_v21 = vadd.f32 %v690_v62, %v541_v38  ;;  %v899_v40 = vadd.f32 %v867_v5, %v718_v18  ;;  %v1083_v57 = vadd.f32 %v1051_v48, %v1019_v7  ;;  %v1143_v19 = vadd.f32 %v1111_v36, %v1079_v4  ;;  %v8769_v36 = vld [vmem:[#allocation18_spill] sm:$0xff] }
 0x166   :  { %v529_v61 = vadd.f32 %v497_v0, %v349_v56  ;;  %v533_v22 = vadd.f32 %v501_v39, %v353_v20  ;;  %v7173_v44 = vrot.slane %v587_v60, %v8755_v12  ;;  %v7176_v30 = vrot.slane %v601_v45, %v8755_v12  ;;  %v8770_v0 = vld [vmem:[#allocation19_spill] sm:$0xff] }
 0x167   :  { %v903_v3 = vadd.f32 %v871_v33, %v722_v21  ;;  %v951_v32 = vadd.f32 %v8768_v17, %v899_v40  ;;  %v1147_v42 = vadd.f32 %v1115_v27, %v1083_v57  ;;  %v1299_v14 = vadd.f32 %v1267_v47, %v1143_v19 }
 0x168   :  { %v678_v34 = vmul.f32 %v8763_v31, %v7173_v44  ;;  %v682_v38 = vmul.f32 %v8763_v31, %v7176_v30  ;;  %v859_v39 = vmul.f32 %v8761_v37, %v8769_v36  ;;  %v863_v20 = vmul.f32 %v8761_v37, %v8770_v0 }
 0x169   :  { %v955_v56 = vadd.f32 %v8768_v17, %v903_v3  ;;  %v983_v4 = vmax.f32 %v951_v32, 0.0  ;;  %v1303_v21 = vadd.f32 %v1271_v16, %v1147_v42  ;;  %v1455_v48 = vadd.f32 %v1423_v53, %v1299_v14  ;;  %v8771_v42 = vld [vmem:[#allocation20_spill] sm:$0xff] }
 0x16a   :  { %v710_v40 = vadd.f32 %v678_v34, %v529_v61  ;;  %v714_v18 = vadd.f32 %v682_v38, %v533_v22  ;;  %v1007_v19 = vmul.f32 %v7144_v63, %v8756_v15  ;;  %v1011_v62 = vmul.f32 %v7162_v6, %v8756_v15 }
 0x16b   :  { %v987_v5 = vmax.f32 %v955_v56, 0.0  ;;  %v1459_v60 = vadd.f32 %v1427_v41, %v1303_v21  ;;  %v1487_v33 = vadd.f32 %v1455_v48, %v8768_v17  ;;  %v1039_v7 = vmul.f32 %v7173_v44, %v8757_v25 }
 0x16c   :  { %v891_v45 = vadd.f32 %v859_v39, %v710_v40  ;;  %v895_v27 = vadd.f32 %v863_v20, %v714_v18  ;;  %v1043_v53 = vmul.f32 %v7176_v30, %v8757_v25  ;;  %v1103_v22 = vmul.f32 %v8769_v36, %v8759_v10  ;;  %v8772_v20 = vld [vmem:[#allocation22_spill] sm:$0xff]  ;;  %v8773_v18 = vld [vmem:[#allocation23_spill] sm:$0xff] }
 0x16d   :  { %v1491_v61 = vadd.f32 %v1459_v60, %v8768_v17  ;;  %v1519_v47 = vmax.f32 %v1487_v33, 0.0  ;;  %v1071_v16 = vadd.f32 %v1039_v7, %v1007_v19  ;;  %v1107_v41 = vmul.f32 %v8770_v0, %v8759_v10  ;;  %v8774_v7 = vld [vmem:[#allocation25_spill] sm:$0xff] }
 0x16e   :  { %v943_v57 = vadd.f32 %v8768_v17, %v891_v45  ;;  %v947_v3 = vadd.f32 %v8768_v17, %v895_v27  ;;  %v1075_v32 = vadd.f32 %v1043_v53, %v1011_v62  ;;  %v1259_v14 = vmul.f32 %v8771_v42, %v8763_v31 }
 0x16f   :  { %v1523_v34 = vmax.f32 %v1491_v61, 0.0  ;;  %v1551_v38 = vmax.f32 %v983_v4, %v1519_v47  ;;  %v1135_v39 = vadd.f32 %v1103_v22, %v1071_v16  ;;  %v1263_v56 = vmul.f32 %v8772_v20, %v8763_v31 }
 0x170   :  { %v975_v21 = vmax.f32 %v943_v57, 0.0  ;;  %v979_v48 = vmax.f32 %v947_v3, 0.0  ;;  %v1139_v40 = vadd.f32 %v1107_v41, %v1075_v32  ;;  %v1415_v19 = vmul.f32 %v8773_v18, %v8761_v37 }
 0x171   :  { %v1555_v60 = vmax.f32 %v987_v5, %v1523_v34  ;;  %v1291_v33 = vadd.f32 %v1259_v14, %v1135_v39  ;;  %v1419_v62 = vmul.f32 %v8774_v7, %v8761_v37  ;;  %v177_v45 = vmul.f32 %v8735_v49, %v7069_v8 }
 0x172   :  { %v1295_v27 = vadd.f32 %v1263_v56, %v1139_v40  ;;  %v181_v4 = vmul.f32 %v8735_v49, %v7076_v59  ;;  %v326_v53 = vmul.f32 %v8736_v13, %v7073_v9  ;;  %v330_v22 = vmul.f32 %v8736_v13, %v7084_v26 }
 0x173   :  { %v5704_v61 = vpack.i.bf16 %v1555_v60, %v1551_v38  ;;  %v1447_v47 = vadd.f32 %v1415_v19, %v1291_v33  ;;  %v506_v5 = vmul.f32 %v8737_v11, %v7081_v58  ;;  %v510_v16 = vmul.f32 %v8737_v11, %v7096_v35  ;;  %v8775_v38 = vld [vmem:[#allocation21_spill] sm:$0xff] }
 0x174   :  { %v1451_v41 = vadd.f32 %v1419_v62, %v1295_v27  ;;  %v358_v57 = vadd.f32 %v326_v53, %v177_v45  ;;  %v362_v3 = vadd.f32 %v330_v22, %v181_v4  ;;  %v687_v32 = vmul.f32 %v8738_v43, %v7127_v29 }
 0x175   :  { %5705 = vxpose.xlu1.b32.start [1/4] (short) (narrow) %v5704_v61, 8  ;;  %v1479_v14 = vadd.f32 %v1447_v47, %v8768_v17  ;;  %v691_v34 = vmul.f32 %v8738_v43, %v7147_v50  ;;  %v868_v39 = vmul.f32 %v8775_v38, %v8760_v2  ;;  %v872_v56 = vmul.f32 %v8775_v38, %v8762_v52 }
 0x176   :  { %v1483_v40 = vadd.f32 %v1451_v41, %v8768_v17  ;;  %v538_v19 = vadd.f32 %v506_v5, %v358_v57  ;;  %v542_v60 = vadd.f32 %v510_v16, %v362_v3  ;;  %v1016_v33 = vmul.f32 %v7081_v58, %v8735_v49 }
 0x177   :  { %v1511_v62 = vmax.f32 %v1479_v14, 0.0  ;;  %v1020_v45 = vmul.f32 %v7096_v35, %v8735_v49  ;;  %v1048_v27 = vmul.f32 %v7127_v29, %v8736_v13  ;;  %v1052_v4 = vmul.f32 %v7147_v50, %v8736_v13 }
 0x178   :  { %v1515_v53 = vmax.f32 %v1483_v40, 0.0  ;;  %v719_v22 = vadd.f32 %v687_v32, %v538_v19  ;;  %v723_v61 = vadd.f32 %v691_v34, %v542_v60  ;;  %v1112_v47 = vmul.f32 %v8760_v2, %v8737_v11  ;;  %v8776_v40 = vld [vmem:[#allocation71_spill] sm:$0xff] }
 0x179   :  { %v1543_v5 = vmax.f32 %v975_v21, %v1511_v62  ;;  %v1080_v16 = vadd.f32 %v1048_v27, %v1016_v33  ;;  %v1084_v41 = vadd.f32 %v1052_v4, %v1020_v45  ;;  %v1116_v57 = vmul.f32 %v8762_v52, %v8737_v11 }
 0x17a   :  { %v1547_v3 = vmax.f32 %v979_v48, %v1515_v53  ;;  %v900_v14 = vadd.f32 %v868_v39, %v719_v22  ;;  %v904_v17 = vadd.f32 %v872_v56, %v723_v61  ;;  %v1268_v31 = vmul.f32 %v8764_v1, %v8738_v43 }
 0x17b   :  { %v1144_v10 = vadd.f32 %v1112_v47, %v1080_v16  ;;  %v1148_v25 = vadd.f32 %v1116_v57, %v1084_v41  ;;  %v1272_v32 = vmul.f32 %v8765_v46, %v8738_v43  ;;  %v1424_v34 = vmul.f32 %v8766_v51, %v8775_v38 }
 0x17c   :  { %v5691_v21 = vpack.i.bf16 %v1547_v3, %v1543_v5  ;;  %v952_v19 = vadd.f32 %v8776_v40, %v900_v14  ;;  %v956_v60 = vadd.f32 %v8776_v40, %v904_v17  ;;  %v1428_v48 = vmul.f32 %v8767_v28, %v8775_v38 }
 0x17d   :  { %v1300_v39 = vadd.f32 %v1268_v31, %v1144_v10  ;;  %v1304_v56 = vadd.f32 %v1272_v32, %v1148_v25  ;;  %v169_v33 = vmul.f32 %v8735_v49, %v7132_v24  ;;  %v173_v62 = vmul.f32 %v8735_v49, %v7135_v55 }
 0x17e   :  { %5692 = vxpose.xlu0.b32.start [1/4] (short) (narrow) %v5691_v21, 8  ;;  %v984_v45 = vmax.f32 %v952_v19, 0.0  ;;  %v988_v27 = vmax.f32 %v956_v60, 0.0  ;;  %v318_v4 = vmul.f32 %v8736_v13, %v7138_v54  ;;  %v322_v17 = vmul.f32 %v8736_v13, %v7141_v23 }
 0x17f   :  { %v1456_v53 = vadd.f32 %v1424_v34, %v1300_v39  ;;  %v1460_v22 = vadd.f32 %v1428_v48, %v1304_v56  ;;  %v498_v31 = vmul.f32 %v8737_v11, %v7144_v63  ;;  %v502_v25 = vmul.f32 %v8737_v11, %v7162_v6 }
 0x180   :  { %v350_v10 = vadd.f32 %v318_v4, %v169_v33  ;;  %v354_v61 = vadd.f32 %v322_v17, %v173_v62  ;;  %v679_v47 = vmul.f32 %v8738_v43, %v7173_v44  ;;  %v683_v5 = vmul.f32 %v8738_v43, %v7176_v30 }
 0x181   :  { %v1488_v16 = vadd.f32 %v1456_v53, %v8776_v40  ;;  %v1492_v41 = vadd.f32 %v1460_v22, %v8776_v40  ;;  %v860_v57 = vmul.f32 %v8775_v38, %v8769_v36  ;;  %v864_v3 = vmul.f32 %v8775_v38, %v8770_v0 }
 0x182   :  { %v530_v14 = vadd.f32 %v498_v31, %v350_v10  ;;  %v534_v32 = vadd.f32 %v502_v25, %v354_v61  ;;  %v1008_v34 = vmul.f32 %v7144_v63, %v8735_v49  ;;  %v1012_v21 = vmul.f32 %v7162_v6, %v8735_v49 }
 0x183   :  { %v1520_v19 = vmax.f32 %v1488_v16, 0.0  ;;  %v1524_v60 = vmax.f32 %v1492_v41, 0.0  ;;  %v1040_v48 = vmul.f32 %v7173_v44, %v8736_v13  ;;  %v1044_v39 = vmul.f32 %v7176_v30, %v8736_v13 }
 0x184   :  { %v711_v56 = vadd.f32 %v679_v47, %v530_v14  ;;  %v715_v33 = vadd.f32 %v683_v5, %v534_v32  ;;  %v1104_v62 = vmul.f32 %v8769_v36, %v8737_v11  ;;  %v1108_v4 = vmul.f32 %v8770_v0, %v8737_v11 }
 0x185   :  { %v1552_v17 = vmax.f32 %v984_v45, %v1520_v19  ;;  %v1556_v53 = vmax.f32 %v988_v27, %v1524_v60  ;;  %v1072_v22 = vadd.f32 %v1040_v48, %v1008_v34  ;;  %v1076_v31 = vadd.f32 %v1044_v39, %v1012_v21  ;;  %v8778_v60 = vld [vmem:[#allocation63_spill] sm:$0xff] }
 0x186   :  { %v892_v25 = vadd.f32 %v860_v57, %v711_v56  ;;  %v896_v10 = vadd.f32 %v864_v3, %v715_v33  ;;  %v1260_v61 = vmul.f32 %v8771_v42, %v8738_v43  ;;  %v1264_v16 = vmul.f32 %v8772_v20, %v8738_v43  ;;  %v8777_v57 = vld [vmem:[#allocation60_spill] sm:$0xff] }
 0x187   :  { %v5706_v47 = vpack.i.bf16 %v1556_v53, %v1552_v17  ;;  %v1136_v5 = vadd.f32 %v1104_v62, %v1072_v22  ;;  %v1140_v41 = vadd.f32 %v1108_v4, %v1076_v31  ;;  %v1416_v14 = vmul.f32 %v8773_v18, %v8775_v38  ;;  %v8779_v62 = vld [vmem:[#allocation66_spill] sm:$0xff] }
 0x188   :  { %v944_v32 = vadd.f32 %v8776_v40, %v892_v25  ;;  %v948_v45 = vadd.f32 %v8776_v40, %v896_v10  ;;  %v1420_v27 = vmul.f32 %v8774_v7, %v8775_v38  ;;  %v178_v3 = vmul.f32 %v8777_v57, %v7069_v8  ;;  %v8780_v10 = vld [vmem:[#allocation27_spill] sm:$0xff] }
 0x189   :  { %5707 = vxpose.xlu1.b32.cont [2/4] (short) (narrow) %v5706_v47, 8  ;;  %v1292_v34 = vadd.f32 %v1260_v61, %v1136_v5  ;;  %v1296_v21 = vadd.f32 %v1264_v16, %v1140_v41  ;;  %v182_v19 = vmul.f32 %v8777_v57, %v7076_v59  ;;  %v327_v48 = vmul.f32 %v8778_v60, %v7073_v9  ;;  %v8781_v47 = vld [vmem:[#allocation26_spill] sm:$0xff] }
 0x18a   :  { %v976_v39 = vmax.f32 %v944_v32, 0.0  ;;  %v980_v56 = vmax.f32 %v948_v45, 0.0  ;;  %v331_v33 = vmul.f32 %v8778_v60, %v7084_v26  ;;  %v507_v4 = vmul.f32 %v8779_v62, %v7081_v58 }
 0x18b   :  { %v1448_v17 = vadd.f32 %v1416_v14, %v1292_v34  ;;  %v1452_v53 = vadd.f32 %v1420_v27, %v1296_v21  ;;  %v359_v22 = vadd.f32 %v327_v48, %v178_v3  ;;  %v511_v31 = vmul.f32 %v8779_v62, %v7096_v35 }
 0x18c   :  { %v363_v25 = vadd.f32 %v331_v33, %v182_v19  ;;  %v688_v61 = vmul.f32 %v8780_v10, %v7127_v29  ;;  %v692_v16 = vmul.f32 %v8780_v10, %v7147_v50  ;;  %v869_v5 = vmul.f32 %v8781_v47, %v8760_v2 }
 0x18d   :  { %v1480_v41 = vadd.f32 %v1448_v17, %v8776_v40  ;;  %v1484_v32 = vadd.f32 %v1452_v53, %v8776_v40  ;;  %v539_v14 = vadd.f32 %v507_v4, %v359_v22  ;;  %v873_v45 = vmul.f32 %v8781_v47, %v8762_v52 }
 0x18e   :  { %v543_v27 = vadd.f32 %v511_v31, %v363_v25  ;;  %v1017_v3 = vmul.f32 %v7081_v58, %v8777_v57  ;;  %v1021_v34 = vmul.f32 %v7096_v35, %v8777_v57  ;;  %v1049_v21 = vmul.f32 %v7127_v29, %v8778_v60 }
 0x18f   :  { %v1512_v19 = vmax.f32 %v1480_v41, 0.0  ;;  %v1516_v48 = vmax.f32 %v1484_v32, 0.0  ;;  %v720_v33 = vadd.f32 %v688_v61, %v539_v14  ;;  %v1053_v17 = vmul.f32 %v7147_v50, %v8778_v60  ;;  %v8782_v32 = vld [vmem:[#allocation73_spill] sm:$0xff] }
 0x190   :  { %v724_v4 = vadd.f32 %v692_v16, %v543_v27  ;;  %v1081_v53 = vadd.f32 %v1049_v21, %v1017_v3  ;;  %v1113_v22 = vmul.f32 %v8760_v2, %v8779_v62  ;;  %v1117_v31 = vmul.f32 %v8762_v52, %v8779_v62 }
 0x191   :  { %v1544_v25 = vmax.f32 %v976_v39, %v1512_v19  ;;  %v1548_v40 = vmax.f32 %v980_v56, %v1516_v48  ;;  %v901_v38 = vadd.f32 %v869_v5, %v720_v33  ;;  %v1085_v43 = vadd.f32 %v1053_v17, %v1021_v34 }
 0x192   :  { %v905_v11 = vadd.f32 %v873_v45, %v724_v4  ;;  %v1145_v13 = vadd.f32 %v1113_v22, %v1081_v53  ;;  %v1269_v61 = vmul.f32 %v8764_v1, %v8780_v10  ;;  %v1273_v41 = vmul.f32 %v8765_v46, %v8780_v10 }
 0x193   :  { %v5693_v16 = vpack.i.bf16 %v1548_v40, %v1544_v25  ;;  %v953_v14 = vadd.f32 %v8782_v32, %v901_v38  ;;  %v1149_v27 = vadd.f32 %v1117_v31, %v1085_v43  ;;  %v1425_v3 = vmul.f32 %v8766_v51, %v8781_v47 }
 0x194   :  { %v957_v39 = vadd.f32 %v8782_v32, %v905_v11  ;;  %v1301_v56 = vadd.f32 %v1269_v61, %v1145_v13  ;;  %v1429_v5 = vmul.f32 %v8767_v28, %v8781_v47  ;;  %v170_v45 = vmul.f32 %v8777_v57, %v7132_v24 }
 0x195   :  { %5694 = vxpose.xlu0.b32.cont [2/4] (short) (narrow) %v5693_v16, 8  ;;  %v985_v34 = vmax.f32 %v953_v14, 0.0  ;;  %v1305_v21 = vadd.f32 %v1273_v41, %v1149_v27  ;;  %v174_v40 = vmul.f32 %v8777_v57, %v7135_v55  ;;  %v319_v43 = vmul.f32 %v8778_v60, %v7138_v54 }
 0x196   :  { %v989_v38 = vmax.f32 %v957_v39, 0.0  ;;  %v1457_v19 = vadd.f32 %v1425_v3, %v1301_v56  ;;  %v323_v13 = vmul.f32 %v8778_v60, %v7141_v23  ;;  %v499_v11 = vmul.f32 %v8779_v62, %v7144_v63 }
 0x197   :  { %v1461_v48 = vadd.f32 %v1429_v5, %v1305_v21  ;;  %v351_v33 = vadd.f32 %v319_v43, %v170_v45  ;;  %v503_v17 = vmul.f32 %v8779_v62, %v7162_v6  ;;  %v680_v4 = vmul.f32 %v8780_v10, %v7173_v44 }
 0x198   :  { %v1489_v53 = vadd.f32 %v1457_v19, %v8782_v32  ;;  %v355_v22 = vadd.f32 %v323_v13, %v174_v40  ;;  %v684_v31 = vmul.f32 %v8780_v10, %v7176_v30  ;;  %v861_v25 = vmul.f32 %v8781_v47, %v8769_v36 }
 0x199   :  { %v1493_v61 = vadd.f32 %v1461_v48, %v8782_v32  ;;  %v531_v41 = vadd.f32 %v499_v11, %v351_v33  ;;  %v865_v16 = vmul.f32 %v8781_v47, %v8770_v0  ;;  %v1009_v14 = vmul.f32 %v7144_v63, %v8777_v57 }
 0x19a   :  { %v1521_v27 = vmax.f32 %v1489_v53, 0.0  ;;  %v535_v3 = vadd.f32 %v503_v17, %v355_v22  ;;  %v1013_v39 = vmul.f32 %v7162_v6, %v8777_v57  ;;  %v1041_v56 = vmul.f32 %v7173_v44, %v8778_v60 }
 0x19b   :  { %v1525_v5 = vmax.f32 %v1493_v61, 0.0  ;;  %v712_v45 = vadd.f32 %v680_v4, %v531_v41  ;;  %v1045_v21 = vmul.f32 %v7176_v30, %v8778_v60  ;;  %v1105_v40 = vmul.f32 %v8769_v36, %v8779_v62 }
 0x19c   :  { %v1553_v43 = vmax.f32 %v985_v34, %v1521_v27  ;;  %v716_v19 = vadd.f32 %v684_v31, %v535_v3  ;;  %v1073_v13 = vadd.f32 %v1041_v56, %v1009_v14  ;;  %v1109_v11 = vmul.f32 %v8770_v0, %v8779_v62  ;;  %v8783_v3 = vld [vmem:[#allocation64_spill] sm:$0xff] }
 0x19d   :  { %v1557_v48 = vmax.f32 %v989_v38, %v1525_v5  ;;  %v893_v33 = vadd.f32 %v861_v25, %v712_v45  ;;  %v1077_v17 = vadd.f32 %v1045_v21, %v1013_v39  ;;  %v1261_v53 = vmul.f32 %v8771_v42, %v8780_v10  ;;  %v8784_v45 = vld [vmem:[#allocation67_spill] sm:$0xff] }
 0x19e   :  { %v897_v22 = vadd.f32 %v865_v16, %v716_v19  ;;  %v1137_v4 = vadd.f32 %v1105_v40, %v1073_v13  ;;  %v1265_v61 = vmul.f32 %v8772_v20, %v8780_v10  ;;  %v1417_v41 = vmul.f32 %v8773_v18, %v8781_v47  ;;  %v8785_v13 = vld [vmem:[#allocation70_spill] sm:$0xff] }
 0x19f   :  { %v5708_v34 = vpack.i.bf16 %v1557_v48, %v1553_v43  ;;  %v945_v31 = vadd.f32 %v8782_v32, %v893_v33  ;;  %v1141_v14 = vadd.f32 %v1109_v11, %v1077_v17  ;;  %v1421_v38 = vmul.f32 %v8774_v7, %v8781_v47  ;;  %v8786_v17 = vld [vmem:[#allocation17_spill] sm:$0xff] }
 0x1a0   :  { %v949_v25 = vadd.f32 %v8782_v32, %v897_v22  ;;  %v1293_v27 = vadd.f32 %v1261_v53, %v1137_v4  ;;  %v179_v16 = vmul.f32 %v8783_v3, %v7069_v8  ;;  %v183_v39 = vmul.f32 %v8783_v3, %v7076_v59 }
 0x1a1   :  { %5709 = vxpose.xlu1.b32.cont [3/4] (short) (narrow) %v5708_v34, 8  ;;  %v977_v56 = vmax.f32 %v945_v31, 0.0  ;;  %v1297_v5 = vadd.f32 %v1265_v61, %v1141_v14  ;;  %v328_v21 = vmul.f32 %v8784_v45, %v7073_v9  ;;  %v332_v40 = vmul.f32 %v8784_v45, %v7084_v26  ;;  %v8787_v26 = vld [vmem:[#allocation72_spill] sm:$0xff] }
 0x1a2   :  { %v981_v43 = vmax.f32 %v949_v25, 0.0  ;;  %v1449_v19 = vadd.f32 %v1417_v41, %v1293_v27  ;;  %v508_v11 = vmul.f32 %v8785_v13, %v7081_v58  ;;  %v512_v8 = vmul.f32 %v8785_v13, %v7096_v35 }
 0x1a3   :  { %v1453_v48 = vadd.f32 %v1421_v38, %v1297_v5  ;;  %v360_v33 = vadd.f32 %v328_v21, %v179_v16  ;;  %v364_v59 = vadd.f32 %v332_v40, %v183_v39  ;;  %v689_v53 = vmul.f32 %v8786_v17, %v7127_v29 }
 0x1a4   :  { %v1481_v22 = vadd.f32 %v1449_v19, %v8782_v32  ;;  %v693_v9 = vmul.f32 %v8786_v17, %v7147_v50  ;;  %v870_v4 = vmul.f32 %v8787_v26, %v8760_v2  ;;  %v874_v61 = vmul.f32 %v8787_v26, %v8762_v52 }
 0x1a5   :  { %v1485_v41 = vadd.f32 %v1453_v48, %v8782_v32  ;;  %v540_v34 = vadd.f32 %v508_v11, %v360_v33  ;;  %v544_v31 = vadd.f32 %v512_v8, %v364_v59  ;;  %v1018_v14 = vmul.f32 %v7081_v58, %v8783_v3 }
 0x1a6   :  { %v1513_v38 = vmax.f32 %v1481_v22, 0.0  ;;  %v1022_v25 = vmul.f32 %v7096_v35, %v8783_v3  ;;  %v1050_v27 = vmul.f32 %v7127_v29, %v8784_v45  ;;  %v1054_v16 = vmul.f32 %v7147_v50, %v8784_v45  ;;  %v8788_v22 = vld [vmem:[#allocation74_spill] sm:$0xff] }
 0x1a7   :  { %v1517_v39 = vmax.f32 %v1485_v41, 0.0  ;;  %v721_v5 = vadd.f32 %v689_v53, %v540_v34  ;;  %v725_v21 = vadd.f32 %v693_v9, %v544_v31  ;;  %v1114_v40 = vmul.f32 %v8760_v2, %v8785_v13 }
 0x1a8   :  { %v1545_v19 = vmax.f32 %v977_v56, %v1513_v38  ;;  %v1082_v11 = vadd.f32 %v1050_v27, %v1018_v14  ;;  %v1086_v8 = vadd.f32 %v1054_v16, %v1022_v25  ;;  %v1118_v58 = vmul.f32 %v8762_v52, %v8785_v13 }
 0x1a9   :  { %v1549_v48 = vmax.f32 %v981_v43, %v1517_v39  ;;  %v902_v35 = vadd.f32 %v870_v4, %v721_v5  ;;  %v906_v33 = vadd.f32 %v874_v61, %v725_v21  ;;  %v1270_v29 = vmul.f32 %v8764_v1, %v8786_v17 }
 0x1aa   :  { %v1146_v59 = vadd.f32 %v1114_v40, %v1082_v11  ;;  %v1150_v50 = vadd.f32 %v1118_v58, %v1086_v8  ;;  %v1274_v53 = vmul.f32 %v8765_v46, %v8786_v17  ;;  %v1426_v2 = vmul.f32 %v8766_v51, %v8787_v26 }
 0x1ab   :  { %v5695_v56 = vpack.i.bf16 %v1549_v48, %v1545_v19  ;;  %v954_v9 = vadd.f32 %v8788_v22, %v902_v35  ;;  %v958_v41 = vadd.f32 %v8788_v22, %v906_v33  ;;  %v1430_v52 = vmul.f32 %v8767_v28, %v8787_v26  ;;  %v5754_v28 = vld [vmem:[%s8424_s3 + $0x10] sm:$0xff]  }
 0x1ac   :  { %v1302_v43 = vadd.f32 %v1270_v29, %v1146_v59  ;;  %v1306_v4 = vadd.f32 %v1274_v53, %v1150_v50  ;;  %v171_v1 = vmul.f32 %v8783_v3, %v7132_v24  ;;  %v175_v61 = vmul.f32 %v8783_v3, %v7135_v55  ;;  %5423 = vmatprep.subr.bf16.mxu1 %v5754_v28 }
 0x1ad   :  { %5696 = vxpose.xlu0.b32.cont [3/4] (short) (narrow) %v5695_v56, 8  ;;  %v986_v46 = vmax.f32 %v954_v9, 0.0  ;;  %v990_v34 = vmax.f32 %v958_v41, 0.0  ;;  %v320_v51 = vmul.f32 %v8784_v45, %v7138_v54  ;;  %v324_v31 = vmul.f32 %v8784_v45, %v7141_v23  ;;  %5424 = vmatpush3.bf16.msra.mxu1 %v5754_v28  ;;  %v5755_v9 = vld [vmem:[%s8424_s3 + $0x18] sm:$0xff]  }
 0x1ae   :  { %v1458_v14 = vadd.f32 %v1426_v2, %v1302_v43  ;;  %v1462_v38 = vadd.f32 %v1430_v52, %v1306_v4  ;;  %v500_v24 = vmul.f32 %v8785_v13, %v7144_v63  ;;  %v504_v55 = vmul.f32 %v8785_v13, %v7162_v6  ;;  %5425 = vmatprep.subr.bf16.mxu1 %v5755_v9 }
 0x1af   :  { %v352_v25 = vadd.f32 %v320_v51, %v171_v1  ;;  %v356_v27 = vadd.f32 %v324_v31, %v175_v61  ;;  %v681_v54 = vmul.f32 %v8786_v17, %v7173_v44  ;;  %v685_v23 = vmul.f32 %v8786_v17, %v7176_v30  ;;  %v8790_v31 = vld [vmem:[#allocation35_spill] sm:$0xff] }
 0x1b0   :  { %v1490_v16 = vadd.f32 %v1458_v14, %v8788_v22  ;;  %v1494_v39 = vadd.f32 %v1462_v38, %v8788_v22  ;;  %v862_v5 = vmul.f32 %v8787_v26, %v8769_v36  ;;  %v866_v21 = vmul.f32 %v8787_v26, %v8770_v0  ;;  %v8791_v38 = vld [vmem:[#allocation40_spill] sm:$0xff] }
 0x1b1   :  { %v532_v40 = vadd.f32 %v500_v24, %v352_v25  ;;  %v536_v19 = vadd.f32 %v504_v55, %v356_v27  ;;  %v1010_v11 = vmul.f32 %v7144_v63, %v8783_v3  ;;  %v1014_v8 = vmul.f32 %v7162_v6, %v8783_v3  ;;  %5426 = vmatpush3.bf16.msra.mxu1 %v5755_v9  ;;  %v8792_v25 = vld [vmem:[#allocation9_spill] sm:$0xff] }
 0x1b2   :  { %v1522_v58 = vmax.f32 %v1490_v16, 0.0  ;;  %v1526_v48 = vmax.f32 %v1494_v39, 0.0  ;;  %v1042_v35 = vmul.f32 %v7173_v44, %v8784_v45  ;;  %v1046_v33 = vmul.f32 %v7176_v30, %v8784_v45  ;;  %5483 = vmatprep.subr.bf16.mxu1 %v5754_v28 }
 0x1b3   :  { %v713_v29 = vadd.f32 %v681_v54, %v532_v40  ;;  %v717_v59 = vadd.f32 %v685_v23, %v536_v19  ;;  %v1106_v50 = vmul.f32 %v8769_v36, %v8785_v13  ;;  %v1110_v53 = vmul.f32 %v8770_v0, %v8785_v13  ;;  %v8793_v54 = vld [vmem:[#allocation41_spill] sm:$0xff] }
 0x1b4   :  { %v1554_v63 = vmax.f32 %v986_v46, %v1522_v58  ;;  %v1558_v2 = vmax.f32 %v990_v34, %v1526_v48  ;;  %v1074_v56 = vadd.f32 %v1042_v35, %v1010_v11  ;;  %v1078_v6 = vadd.f32 %v1046_v33, %v1014_v8  ;;  %v8789_v34 = vld [vmem:[#allocation34_spill] sm:$0xff]  ;;  %v8794_v11 = vld [vmem:[#allocation28_spill] sm:$0xff] }
 0x1b5   :  { %v894_v44 = vadd.f32 %v862_v5, %v713_v29  ;;  %v898_v41 = vadd.f32 %v866_v21, %v717_v59  ;;  %v1262_v30 = vmul.f32 %v8771_v42, %v8786_v17  ;;  %v1266_v52 = vmul.f32 %v8772_v20, %v8786_v17  ;;  %v8805_v17 = vld [vmem:[#allocation24_spill] sm:$0xff] }
 0x1b6   :  { %v5710_v36 = vpack.i.bf16 %v1558_v2, %v1554_v63  ;;  %v1138_v43 = vadd.f32 %v1106_v50, %v1074_v56  ;;  %v1142_v4 = vadd.f32 %v1110_v53, %v1078_v6  ;;  %v1418_v0 = vmul.f32 %v8773_v18, %v8787_v26 }
 0x1b7   :  { %v946_v1 = vadd.f32 %v8788_v22, %v894_v44  ;;  %v950_v61 = vadd.f32 %v8788_v22, %v898_v41  ;;  %v1422_v46 = vmul.f32 %v8774_v7, %v8787_v26  ;;  %v55_v42 = vcombine.high %v8789_v34, %v8789_v34 }
 0x1b8   :  { %5711 = vxpose.xlu1.b32.end [4/4] (short) (narrow) %v5710_v36, 8  ;;  %v1294_v20 = vadd.f32 %v1262_v30, %v1138_v43  ;;  %v1298_v51 = vadd.f32 %v1266_v52, %v1142_v4  ;;  %v203_v14 = vcombine.high %v8790_v31, %v8790_v31  ;;  %v383_v18 = vcombine.high %v8791_v38, %v8791_v38  ;;  %v8796_v38 = vld [vmem:[#allocation61_spill] sm:$0xff] }
 0x1b9   :  { %v978_v24 = vmax.f32 %v946_v1, 0.0  ;;  %v982_v55 = vmax.f32 %v950_v61, 0.0  ;;  %v69_v27 = vrot.slane %v55_v42, %v8792_v25  ;;  %v564_v7 = vcombine.high %v8793_v54, %v8793_v54  ;;  %v8795_v42 = vld [vmem:[#allocation59_spill] sm:$0xff] }
 0x1ba   :  { %v1450_v23 = vadd.f32 %v1418_v0, %v1294_v20  ;;  %v1454_v16 = vadd.f32 %v1422_v46, %v1298_v51  ;;  %v217_v39 = vrot.slane %v203_v14, %v8792_v25  ;;  %v397_v5 = vrot.slane %v383_v18, %v8792_v25 }
 0x1bb   :  { %v71_v21 = vcombine.high %v69_v27, %v69_v27  ;;  %v85_v40 = vrot.slane %v69_v27, %v8792_v25  ;;  %v578_v19 = vrot.slane %v564_v7, %v8792_v25  ;;  %v7497_v8 = vmul.f32 %v8761_v37, %v8794_v11  ;;  %v8797_v7 = vld [vmem:[#allocation29_spill] sm:$0xff] }
 0x1bc   :  { %v1482_v58 = vadd.f32 %v1450_v23, %v8788_v22  ;;  %v1486_v48 = vadd.f32 %v1454_v16, %v8788_v22  ;;  %v219_v28 = vcombine.high %v217_v39, %v217_v39  ;;  %v233_v35 = vrot.slane %v217_v39, %v8792_v25 }
 0x1bd   :  { %v99_v33 = vrot.slane %v71_v21, %v8792_v25  ;;  %v101_v29 = vcombine.high %v85_v40, %v85_v40  ;;  %v399_v59 = vcombine.high %v397_v5, %v397_v5  ;;  %v7504_v50 = vrot.slane %v397_v5, %v8792_v25 }
 0x1be   :  { %v1514_v53 = vmax.f32 %v1482_v58, 0.0  ;;  %v1518_v63 = vmax.f32 %v1486_v48, 0.0  ;;  %v247_v2 = vrot.slane %v219_v28, %v8792_v25  ;;  %v249_v56 = vcombine.high %v233_v35, %v233_v35 }
 0x1bf   :  { %v103_v6 = vcombine.high %v99_v33, %v99_v33  ;;  %v7508_v9 = vrot.slane %v101_v29, %v8755_v12  ;;  %v427_v44 = vrot.slane %v399_v59, %v8792_v25  ;;  %v429_v41 = vcombine.high %v7504_v50, %v7504_v50  ;;  %v8798_v59 = vld [vmem:[#allocation65_spill] sm:$0xff] }
 0x1c0   :  { %v1546_v30 = vmax.f32 %v978_v24, %v1514_v53  ;;  %v1550_v52 = vmax.f32 %v982_v55, %v1518_v63  ;;  %v251_v36 = vcombine.high %v247_v2, %v247_v2  ;;  %v7514_v43 = vrot.slane %v249_v56, %v8755_v12  ;;  %v8799_v53 = vld [vmem:[#allocation32_spill] sm:$0xff]  ;;  %v8800_v56 = vld [vmem:[#allocation33_spill] sm:$0xff] }
 0x1c1   :  { %v7517_v4 = vrot.slane %v103_v6, %v8755_v12  ;;  %v192_v0 = vmul.f32 %v8756_v15, %v7508_v9  ;;  %v431_v1 = vcombine.high %v427_v44, %v427_v44  ;;  %v7522_v61 = vrot.slane %v429_v41, %v8755_v12 }
 0x1c2   :  { %v5697_v46 = vpack.i.bf16 %v1550_v52, %v1546_v30  ;;  %v7525_v34 = vrot.slane %v251_v36, %v8755_v12  ;;  %v341_v20 = vmul.f32 %v8795_v42, %v7514_v43  ;;  %v580_v51 = vcombine.high %v578_v19, %v578_v19  ;;  %v8802_v52 = vld [vmem:[#allocation30_spill] sm:$0xff] }
 0x1c3   :  { %v196_v31 = vmul.f32 %v8756_v15, %v7517_v4  ;;  %v7532_v14 = vrot.slane %v431_v1, %v8755_v12  ;;  %v521_v18 = vmul.f32 %v8796_v38, %v7522_v61  ;;  %v594_v24 = vrot.slane %v578_v19, %v8792_v25 }
 0x1c4   :  { %5698 = vxpose.xlu0.b32.end [4/4] (short) (narrow) %v5697_v46, 8  ;;  %v345_v55 = vmul.f32 %v8795_v42, %v7525_v34  ;;  %v373_v27 = vadd.f32 %v341_v20, %v192_v0  ;;  %v608_v54 = vrot.slane %v580_v51, %v8792_v25  ;;  %v887_v23 = vmul.f32 %v8761_v37, %v8797_v7  ;;  %v8803_v0 = vld [vmem:[#allocation31_spill] sm:$0xff] }
 0x1c5   :  { %v525_v16 = vmul.f32 %v8796_v38, %v7532_v14  ;;  %v610_v39 = vcombine.high %v594_v24, %v594_v24  ;;  %v1031_v5 = vmul.f32 %v7522_v61, %v8756_v15  ;;  %v1035_v21 = vmul.f32 %v7532_v14, %v8756_v15 }
 0x1c6   :  { %v377_v19 = vadd.f32 %v345_v55, %v196_v31  ;;  %v553_v58 = vadd.f32 %v521_v18, %v373_v27  ;;  %v612_v48 = vcombine.high %v608_v54, %v608_v54  ;;  %v1127_v28 = vmul.f32 %v8794_v11, %v8796_v38 }
 0x1c7   :  { %v7551_v25 = vrot.slane %v610_v39, %v8755_v12  ;;  %v1131_v29 = vmul.f32 %v8797_v7, %v8796_v38  ;;  %v1283_v63 = vmul.f32 %v8799_v53, %v8798_v59  ;;  %v1287_v6 = vmul.f32 %v8800_v56, %v8798_v59 }
 0x1c8   :  { %v557_v41 = vadd.f32 %v525_v16, %v377_v19  ;;  %v7560_v30 = vrot.slane %v612_v48, %v8755_v12  ;;  %v1439_v36 = vmul.f32 %v8802_v52, %v8761_v37  ;;  %v1443_v1 = vmul.f32 %v8803_v0, %v8761_v37  ;;  %v7593_v48 = vld [vmem:[%s8424_s3] sm:$0xff]  }
 0x1c9   :  { %v702_v46 = vmul.f32 %v8798_v59, %v7551_v25  ;;  %v1063_v20 = vmul.f32 %v7551_v25, %v8795_v42  ;;  %v7571_v51 = vrot.slane %v85_v40, %v8755_v12  ;;  %v7574_v31 = vrot.slane %v99_v33, %v8755_v12  ;;  %8804 = vst [vmem:[#allocation48_spill] sm:$0xff] %v7593_v48 }
 0x1ca   :  { %8801 = vst [vmem:[#allocation44_spill] sm:$0xff] %v7560_v30  ;;  %v706_v18 = vmul.f32 %v8798_v59, %v7560_v30  ;;  %v1067_v55 = vmul.f32 %v7560_v30, %v8795_v42  ;;  %v7581_v27 = vrot.slane %v233_v35, %v8755_v12  ;;  %v7584_v16 = vrot.slane %v247_v2, %v8755_v12 }
 0x1cb   :  { %v734_v39 = vadd.f32 %v702_v46, %v553_v58  ;;  %v1095_v19 = vadd.f32 %v1063_v20, %v1031_v5  ;;  %v184_v40 = vmul.f32 %v8756_v15, %v7571_v51  ;;  %v188_v33 = vmul.f32 %v8756_v15, %v7574_v31  ;;  %5435 = vmatprep.subr.bf16.mxu0 %v7593_v48 }
 0x1cc   :  { %v738_v22 = vadd.f32 %v706_v18, %v557_v41  ;;  %v1099_v26 = vadd.f32 %v1067_v55, %v1035_v21  ;;  %v333_v35 = vmul.f32 %v8795_v42, %v7581_v27  ;;  %v337_v2 = vmul.f32 %v8795_v42, %v7584_v16  ;;  %5436 = vmatpush3.bf16.msra.mxu0 %v7593_v48 }
 0x1cd   :  { %v915_v5 = vadd.f32 %v7497_v8, %v734_v39  ;;  %v1159_v58 = vadd.f32 %v1127_v28, %v1095_v19  ;;  %v7602_v46 = vrot.slane %v7504_v50, %v8755_v12  ;;  %v7605_v20 = vrot.slane %v427_v44, %v8755_v12 }
 0x1ce   :  { %v919_v41 = vadd.f32 %v887_v23, %v738_v22  ;;  %v1163_v21 = vadd.f32 %v1131_v29, %v1099_v26  ;;  %v365_v18 = vadd.f32 %v333_v35, %v184_v40  ;;  %v369_v55 = vadd.f32 %v337_v2, %v188_v33  ;;  %v8806_v2 = vld [vmem:[#allocation36_spill] sm:$0xff] }
 0x1cf   :  { %v967_v13 = vadd.f32 %v8805_v17, %v915_v5  ;;  %v1315_v45 = vadd.f32 %v1283_v63, %v1159_v58  ;;  %v513_v8 = vmul.f32 %v8796_v38, %v7602_v46  ;;  %v517_v50 = vmul.f32 %v8796_v38, %v7605_v20  ;;  %v8807_v5 = vld [vmem:[#allocation37_spill] sm:$0xff] }
 0x1d0   :  { %v971_v44 = vadd.f32 %v8805_v17, %v919_v41  ;;  %v1319_v28 = vadd.f32 %v1287_v6, %v1163_v21  ;;  %v7616_v39 = vrot.slane %v594_v24, %v8755_v12  ;;  %v7619_v26 = vrot.slane %v608_v54, %v8755_v12 }
 0x1d1   :  { %v999_v22 = vmax.f32 %v967_v13, 0.0  ;;  %v1471_v23 = vadd.f32 %v1439_v36, %v1315_v45  ;;  %v545_v29 = vadd.f32 %v513_v8, %v365_v18  ;;  %v549_v19 = vadd.f32 %v517_v50, %v369_v55 }
 0x1d2   :  { %v1003_v63 = vmax.f32 %v971_v44, 0.0  ;;  %v1475_v40 = vadd.f32 %v1443_v1, %v1319_v28  ;;  %v694_v33 = vmul.f32 %v8798_v59, %v7616_v39  ;;  %v698_v35 = vmul.f32 %v8798_v59, %v7619_v26 }
 0x1d3   :  { %v1503_v6 = vadd.f32 %v1471_v23, %v8805_v17  ;;  %v875_v24 = vmul.f32 %v8761_v37, %v8806_v2  ;;  %v879_v12 = vmul.f32 %v8761_v37, %v8807_v5  ;;  %v1023_v45 = vmul.f32 %v7602_v46, %v8756_v15 }
 0x1d4   :  { %v1507_v13 = vadd.f32 %v1475_v40, %v8805_v17  ;;  %v726_v54 = vadd.f32 %v694_v33, %v545_v29  ;;  %v730_v36 = vadd.f32 %v698_v35, %v549_v19  ;;  %v1027_v1 = vmul.f32 %v7605_v20, %v8756_v15  ;;  %v8808_v15 = vld [vmem:[#allocation42_spill] sm:$0xff]  ;;  %v8809_v35 = vld [vmem:[#allocation43_spill] sm:$0xff] }
 0x1d5   :  { %v1535_v58 = vmax.f32 %v1503_v6, 0.0  ;;  %v1055_v41 = vmul.f32 %v7616_v39, %v8795_v42  ;;  %v1059_v21 = vmul.f32 %v7619_v26, %v8795_v42  ;;  %v1119_v18 = vmul.f32 %v8806_v2, %v8796_v38 }
 0x1d6   :  { %v1539_v55 = vmax.f32 %v1507_v13, 0.0  ;;  %v907_v8 = vadd.f32 %v875_v24, %v726_v54  ;;  %v911_v50 = vadd.f32 %v879_v12, %v730_v36  ;;  %v1123_v44 = vmul.f32 %v8807_v5, %v8796_v38  ;;  %v8810_v12 = vld [vmem:[#allocation38_spill] sm:$0xff]  ;;  %v8811_v38 = vld [vmem:[#allocation39_spill] sm:$0xff] }
 0x1d7   :  { %v1567_v28 = vmax.f32 %v999_v22, %v1535_v58  ;;  %v1087_v23 = vadd.f32 %v1055_v41, %v1023_v45  ;;  %v1091_v29 = vadd.f32 %v1059_v21, %v1027_v1  ;;  %v1275_v19 = vmul.f32 %v8808_v15, %v8798_v59 }
 0x1d8   :  { %v1571_v40 = vmax.f32 %v1003_v63, %v1539_v55  ;;  %v959_v33 = vadd.f32 %v8805_v17, %v907_v8  ;;  %v963_v42 = vadd.f32 %v8805_v17, %v911_v50  ;;  %v1279_v6 = vmul.f32 %v8809_v35, %v8798_v59  ;;  %v8812_v59 = vld [vmem:[#allocation58_spill] sm:$0xff] }
 0x1d9   :  { %v1151_v13 = vadd.f32 %v1119_v18, %v1087_v23  ;;  %v1155_v24 = vadd.f32 %v1123_v44, %v1091_v29  ;;  %v1431_v54 = vmul.f32 %v8810_v12, %v8761_v37  ;;  %v1435_v22 = vmul.f32 %v8811_v38, %v8761_v37  ;;  %v8813_v37 = vld [vmem:[#allocation62_spill] sm:$0xff]  ;;  %v8814_v44 = vld [vmem:[#allocation69_spill] sm:$0xff] }
 0x1da   :  { %v5730_v45 = vpack.i.bf16 %v1571_v40, %v1567_v28  ;;  %v991_v36 = vmax.f32 %v959_v33, 0.0  ;;  %v995_v1 = vmax.f32 %v963_v42, 0.0  ;;  %v193_v63 = vmul.f32 %v8735_v49, %v7508_v9  ;;  %v8815_v42 = vld [vmem:[#allocation21_spill] sm:$0xff] }
 0x1db   :  { %v1307_v58 = vadd.f32 %v1275_v19, %v1151_v13  ;;  %v1311_v41 = vadd.f32 %v1279_v6, %v1155_v24  ;;  %v197_v21 = vmul.f32 %v8735_v49, %v7517_v4  ;;  %v342_v18 = vmul.f32 %v8812_v59, %v7514_v43 }
 0x1dc   :  { %5731 = vxpose.xlu1.b32.start [1/4] (short) (narrow) %v5730_v45, 8  ;;  %v346_v55 = vmul.f32 %v8812_v59, %v7525_v34  ;;  %v522_v8 = vmul.f32 %v8813_v37, %v7522_v61  ;;  %v526_v50 = vmul.f32 %v8813_v37, %v7532_v14  ;;  %v703_v28 = vmul.f32 %v8814_v44, %v7551_v25 }
 0x1dd   :  { %v1463_v23 = vadd.f32 %v1431_v54, %v1307_v58  ;;  %v1467_v29 = vadd.f32 %v1435_v22, %v1311_v41  ;;  %v374_v19 = vadd.f32 %v342_v18, %v193_v63  ;;  %v707_v40 = vmul.f32 %v8814_v44, %v7560_v30 }
 0x1de   :  { %v378_v33 = vadd.f32 %v346_v55, %v197_v21  ;;  %v884_v6 = vmul.f32 %v8815_v42, %v8794_v11  ;;  %v888_v13 = vmul.f32 %v8815_v42, %v8797_v7  ;;  %v1032_v24 = vmul.f32 %v7522_v61, %v8735_v49 }
 0x1df   :  { %v1495_v45 = vadd.f32 %v1463_v23, %v8805_v17  ;;  %v1499_v48 = vadd.f32 %v1467_v29, %v8805_v17  ;;  %v554_v54 = vadd.f32 %v522_v8, %v374_v19  ;;  %v1036_v22 = vmul.f32 %v7532_v14, %v8735_v49 }
 0x1e0   :  { %v558_v63 = vadd.f32 %v526_v50, %v378_v33  ;;  %v1064_v58 = vmul.f32 %v7551_v25, %v8812_v59  ;;  %v1068_v41 = vmul.f32 %v7560_v30, %v8812_v59  ;;  %v1128_v21 = vmul.f32 %v8794_v11, %v8813_v37 }
 0x1e1   :  { %v1527_v18 = vmax.f32 %v1495_v45, 0.0  ;;  %v1531_v55 = vmax.f32 %v1499_v48, 0.0  ;;  %v735_v3 = vadd.f32 %v703_v28, %v554_v54  ;;  %v1132_v17 = vmul.f32 %v8797_v7, %v8813_v37  ;;  %v8816_v54 = vld [vmem:[#allocation71_spill] sm:$0xff] }
 0x1e2   :  { %v739_v8 = vadd.f32 %v707_v40, %v558_v63  ;;  %v1096_v23 = vadd.f32 %v1064_v58, %v1032_v24  ;;  %v1100_v29 = vadd.f32 %v1068_v41, %v1036_v22  ;;  %v1284_v50 = vmul.f32 %v8799_v53, %v8814_v44 }
 0x1e3   :  { %v1559_v19 = vmax.f32 %v991_v36, %v1527_v18  ;;  %v1563_v33 = vmax.f32 %v995_v1, %v1531_v55  ;;  %v916_v32 = vadd.f32 %v884_v6, %v735_v3  ;;  %v1288_v47 = vmul.f32 %v8800_v56, %v8814_v44 }
 0x1e4   :  { %v920_v30 = vadd.f32 %v888_v13, %v739_v8  ;;  %v1160_v11 = vadd.f32 %v1128_v21, %v1096_v23  ;;  %v1164_v45 = vadd.f32 %v1132_v17, %v1100_v29  ;;  %v1440_v48 = vmul.f32 %v8802_v52, %v8815_v42 }
 0x1e5   :  { %v5717_v28 = vpack.i.bf16 %v1563_v33, %v1559_v19  ;;  %v968_v40 = vadd.f32 %v8816_v54, %v916_v32  ;;  %v1444_v24 = vmul.f32 %v8803_v0, %v8815_v42  ;;  %v185_v36 = vmul.f32 %v8735_v49, %v7571_v51 }
 0x1e6   :  { %v972_v3 = vadd.f32 %v8816_v54, %v920_v30  ;;  %v1316_v1 = vadd.f32 %v1284_v50, %v1160_v11  ;;  %v1320_v6 = vadd.f32 %v1288_v47, %v1164_v45  ;;  %v189_v13 = vmul.f32 %v8735_v49, %v7574_v31 }
 0x1e7   :  { %5718 = vxpose.xlu0.b32.start [1/4] (short) (narrow) %v5717_v28, 8  ;;  %v1000_v22 = vmax.f32 %v968_v40, 0.0  ;;  %v334_v63 = vmul.f32 %v8812_v59, %v7581_v27  ;;  %v338_v32 = vmul.f32 %v8812_v59, %v7584_v16  ;;  %v514_v58 = vmul.f32 %v8813_v37, %v7602_v46 }
 0x1e8   :  { %v1004_v41 = vmax.f32 %v972_v3, 0.0  ;;  %v1472_v21 = vadd.f32 %v1440_v48, %v1316_v1  ;;  %v1476_v18 = vadd.f32 %v1444_v24, %v1320_v6  ;;  %v518_v47 = vmul.f32 %v8813_v37, %v7605_v20 }
 0x1e9   :  { %v366_v11 = vadd.f32 %v334_v63, %v185_v36  ;;  %v370_v30 = vadd.f32 %v338_v32, %v189_v13  ;;  %v695_v55 = vmul.f32 %v8814_v44, %v7616_v39  ;;  %v699_v17 = vmul.f32 %v8814_v44, %v7619_v26 }
 0x1ea   :  { %v1504_v8 = vadd.f32 %v1472_v21, %v8816_v54  ;;  %v1508_v23 = vadd.f32 %v1476_v18, %v8816_v54  ;;  %v876_v29 = vmul.f32 %v8815_v42, %v8806_v2  ;;  %v880_v50 = vmul.f32 %v8815_v42, %v8807_v5 }
 0x1eb   :  { %v546_v19 = vadd.f32 %v514_v58, %v366_v11  ;;  %v550_v33 = vadd.f32 %v518_v47, %v370_v30  ;;  %v1024_v45 = vmul.f32 %v7602_v46, %v8735_v49  ;;  %v1028_v48 = vmul.f32 %v7605_v20, %v8735_v49 }
 0x1ec   :  { %v1536_v28 = vmax.f32 %v1504_v8, 0.0  ;;  %v1540_v40 = vmax.f32 %v1508_v23, 0.0  ;;  %v1056_v24 = vmul.f32 %v7616_v39, %v8812_v59  ;;  %v1060_v36 = vmul.f32 %v7619_v26, %v8812_v59 }
 0x1ed   :  { %v727_v3 = vadd.f32 %v695_v55, %v546_v19  ;;  %v731_v1 = vadd.f32 %v699_v17, %v550_v33  ;;  %v1120_v6 = vmul.f32 %v8806_v2, %v8813_v37  ;;  %v1124_v13 = vmul.f32 %v8807_v5, %v8813_v37 }
 0x1ee   :  { %v1568_v63 = vmax.f32 %v1000_v22, %v1536_v28  ;;  %v1572_v32 = vmax.f32 %v1004_v41, %v1540_v40  ;;  %v1088_v58 = vadd.f32 %v1056_v24, %v1024_v45  ;;  %v1092_v49 = vadd.f32 %v1060_v36, %v1028_v48 }
 0x1ef   :  { %v908_v21 = vadd.f32 %v876_v29, %v727_v3  ;;  %v912_v18 = vadd.f32 %v880_v50, %v731_v1  ;;  %v1276_v47 = vmul.f32 %v8808_v15, %v8814_v44  ;;  %v1280_v59 = vmul.f32 %v8809_v35, %v8814_v44  ;;  %v8817_v1 = vld [vmem:[#allocation44_spill] sm:$0xff] }
 0x1f0   :  { %v5732_v11 = vpack.i.bf16 %v1572_v32, %v1568_v63  ;;  %v1152_v30 = vadd.f32 %v1120_v6, %v1088_v58  ;;  %v1156_v55 = vadd.f32 %v1124_v13, %v1092_v49  ;;  %v1432_v17 = vmul.f32 %v8810_v12, %v8815_v42  ;;  %v8818_v13 = vld [vmem:[#allocation28_spill] sm:$0xff]  ;;  %v8819_v63 = vld [vmem:[#allocation26_spill] sm:$0xff] }
 0x1f1   :  { %v960_v37 = vadd.f32 %v8816_v54, %v908_v21  ;;  %v964_v22 = vadd.f32 %v8816_v54, %v912_v18  ;;  %v1436_v41 = vmul.f32 %v8811_v38, %v8815_v42  ;;  %v194_v8 = vmul.f32 %v8777_v57, %v7508_v9 }
 0x1f2   :  { %5733 = vxpose.xlu1.b32.cont [2/4] (short) (narrow) %v5732_v11, 8  ;;  %v1308_v23 = vadd.f32 %v1276_v47, %v1152_v30  ;;  %v1312_v29 = vadd.f32 %v1280_v59, %v1156_v55  ;;  %v198_v44 = vmul.f32 %v8777_v57, %v7517_v4  ;;  %v343_v50 = vmul.f32 %v8778_v60, %v7514_v43 }
 0x1f3   :  { %v992_v19 = vmax.f32 %v960_v37, 0.0  ;;  %v996_v33 = vmax.f32 %v964_v22, 0.0  ;;  %v347_v45 = vmul.f32 %v8778_v60, %v7525_v34  ;;  %v523_v42 = vmul.f32 %v8779_v62, %v7522_v61 }
 0x1f4   :  { %v1464_v48 = vadd.f32 %v1432_v17, %v1308_v23  ;;  %v1468_v28 = vadd.f32 %v1436_v41, %v1312_v29  ;;  %v375_v40 = vadd.f32 %v343_v50, %v194_v8  ;;  %v527_v24 = vmul.f32 %v8779_v62, %v7532_v14 }
 0x1f5   :  { %v379_v36 = vadd.f32 %v347_v45, %v198_v44  ;;  %v704_v3 = vmul.f32 %v8780_v10, %v7551_v25  ;;  %v708_v6 = vmul.f32 %v8780_v10, %v8817_v1  ;;  %v885_v32 = vmul.f32 %v8819_v63, %v8818_v13 }
 0x1f6   :  { %v1496_v58 = vadd.f32 %v1464_v48, %v8816_v54  ;;  %v1500_v49 = vadd.f32 %v1468_v28, %v8816_v54  ;;  %v555_v21 = vadd.f32 %v523_v42, %v375_v40  ;;  %v889_v18 = vmul.f32 %v8819_v63, %v8797_v7 }
 0x1f7   :  { %v559_v47 = vadd.f32 %v527_v24, %v379_v36  ;;  %v1033_v59 = vmul.f32 %v7522_v61, %v8777_v57  ;;  %v1037_v11 = vmul.f32 %v7532_v14, %v8777_v57  ;;  %v1065_v30 = vmul.f32 %v7551_v25, %v8778_v60  ;;  %v8820_v36 = vld [vmem:[#allocation73_spill] sm:$0xff] }
 0x1f8   :  { %v1528_v55 = vmax.f32 %v1496_v58, 0.0  ;;  %v1532_v17 = vmax.f32 %v1500_v49, 0.0  ;;  %v736_v37 = vadd.f32 %v704_v3, %v555_v21  ;;  %v1069_v54 = vmul.f32 %v8817_v1, %v8778_v60 }
 0x1f9   :  { %v740_v22 = vadd.f32 %v708_v6, %v559_v47  ;;  %v1097_v41 = vadd.f32 %v1065_v30, %v1033_v59  ;;  %v1129_v8 = vmul.f32 %v8818_v13, %v8779_v62  ;;  %v1133_v23 = vmul.f32 %v8797_v7, %v8779_v62 }
 0x1fa   :  { %v1560_v29 = vmax.f32 %v992_v19, %v1528_v55  ;;  %v1564_v44 = vmax.f32 %v996_v33, %v1532_v17  ;;  %v917_v50 = vadd.f32 %v885_v32, %v736_v37  ;;  %v1101_v45 = vadd.f32 %v1069_v54, %v1037_v11 }
 0x1fb   :  { %v921_v42 = vadd.f32 %v889_v18, %v740_v22  ;;  %v1161_v48 = vadd.f32 %v1129_v8, %v1097_v41  ;;  %v1285_v28 = vmul.f32 %v8799_v53, %v8780_v10  ;;  %v1289_v40 = vmul.f32 %v8800_v56, %v8780_v10 }
 0x1fc   :  { %v5719_v24 = vpack.i.bf16 %v1564_v44, %v1560_v29  ;;  %v969_v3 = vadd.f32 %v8820_v36, %v917_v50  ;;  %v1165_v6 = vadd.f32 %v1133_v23, %v1101_v45  ;;  %v1441_v58 = vmul.f32 %v8802_v52, %v8819_v63 }
 0x1fd   :  { %v973_v19 = vadd.f32 %v8820_v36, %v921_v42  ;;  %v1317_v33 = vadd.f32 %v1285_v28, %v1161_v48  ;;  %v1445_v32 = vmul.f32 %v8803_v0, %v8819_v63  ;;  %v186_v49 = vmul.f32 %v8777_v57, %v7571_v51 }
 0x1fe   :  { %5720 = vxpose.xlu0.b32.cont [2/4] (short) (narrow) %v5719_v24, 8  ;;  %v1001_v21 = vmax.f32 %v969_v3, 0.0  ;;  %v1321_v18 = vadd.f32 %v1289_v40, %v1165_v6  ;;  %v190_v47 = vmul.f32 %v8777_v57, %v7574_v31  ;;  %v335_v59 = vmul.f32 %v8778_v60, %v7581_v27 }
 0x1ff   :  { %v1005_v11 = vmax.f32 %v973_v19, 0.0  ;;  %v1473_v30 = vadd.f32 %v1441_v58, %v1317_v33  ;;  %v339_v55 = vmul.f32 %v8778_v60, %v7584_v16  ;;  %v515_v17 = vmul.f32 %v8779_v62, %v7602_v46 }
 0x200   :  { %v1477_v37 = vadd.f32 %v1445_v32, %v1321_v18  ;;  %v367_v54 = vadd.f32 %v335_v59, %v186_v49  ;;  %v519_v22 = vmul.f32 %v8779_v62, %v7605_v20  ;;  %v696_v41 = vmul.f32 %v8780_v10, %v7616_v39 }
 0x201   :  { %v1505_v8 = vadd.f32 %v1473_v30, %v8820_v36  ;;  %v371_v23 = vadd.f32 %v339_v55, %v190_v47  ;;  %v700_v29 = vmul.f32 %v8780_v10, %v7619_v26  ;;  %v877_v44 = vmul.f32 %v8819_v63, %v8806_v2 }
 0x202   :  { %v1509_v50 = vadd.f32 %v1477_v37, %v8820_v36  ;;  %v547_v45 = vadd.f32 %v515_v17, %v367_v54  ;;  %v881_v42 = vmul.f32 %v8819_v63, %v8807_v5  ;;  %v1025_v48 = vmul.f32 %v7602_v46, %v8777_v57 }
 0x203   :  { %v1537_v28 = vmax.f32 %v1505_v8, 0.0  ;;  %v551_v40 = vadd.f32 %v519_v22, %v371_v23  ;;  %v1029_v24 = vmul.f32 %v7605_v20, %v8777_v57  ;;  %v1057_v3 = vmul.f32 %v7616_v39, %v8778_v60  ;;  %v8821_v23 = vld [vmem:[#allocation64_spill] sm:$0xff] }
 0x204   :  { %v1541_v6 = vmax.f32 %v1509_v50, 0.0  ;;  %v728_v58 = vadd.f32 %v696_v41, %v547_v45  ;;  %v1061_v19 = vmul.f32 %v7619_v26, %v8778_v60  ;;  %v1121_v33 = vmul.f32 %v8806_v2, %v8779_v62  ;;  %v8822_v45 = vld [vmem:[#allocation67_spill] sm:$0xff] }
 0x205   :  { %v1569_v32 = vmax.f32 %v1001_v21, %v1537_v28  ;;  %v732_v49 = vadd.f32 %v700_v29, %v551_v40  ;;  %v1089_v18 = vadd.f32 %v1057_v3, %v1025_v48  ;;  %v1125_v47 = vmul.f32 %v8807_v5, %v8779_v62  ;;  %v8823_v40 = vld [vmem:[#allocation70_spill] sm:$0xff] }
 0x206   :  { %v1573_v59 = vmax.f32 %v1005_v11, %v1541_v6  ;;  %v909_v30 = vadd.f32 %v877_v44, %v728_v58  ;;  %v1093_v57 = vadd.f32 %v1061_v19, %v1029_v24  ;;  %v1277_v55 = vmul.f32 %v8808_v15, %v8780_v10  ;;  %v8824_v58 = vld [vmem:[#allocation17_spill] sm:$0xff] }
 0x207   :  { %v913_v17 = vadd.f32 %v881_v42, %v732_v49  ;;  %v1153_v37 = vadd.f32 %v1121_v33, %v1089_v18  ;;  %v1281_v60 = vmul.f32 %v8809_v35, %v8780_v10  ;;  %v1433_v54 = vmul.f32 %v8810_v12, %v8819_v63 }
 0x208   :  { %v5734_v21 = vpack.i.bf16 %v1573_v59, %v1569_v32  ;;  %v961_v22 = vadd.f32 %v8820_v36, %v909_v30  ;;  %v1157_v41 = vadd.f32 %v1125_v47, %v1093_v57  ;;  %v1437_v62 = vmul.f32 %v8811_v38, %v8819_v63 }
 0x209   :  { %v965_v11 = vadd.f32 %v8820_v36, %v913_v17  ;;  %v1309_v8 = vadd.f32 %v1277_v55, %v1153_v37  ;;  %v195_v29 = vmul.f32 %v8821_v23, %v7508_v9  ;;  %v199_v44 = vmul.f32 %v8821_v23, %v7517_v4 }
 0x20a   :  { %5735 = vxpose.xlu1.b32.cont [3/4] (short) (narrow) %v5734_v21, 8  ;;  %v993_v10 = vmax.f32 %v961_v22, 0.0  ;;  %v1313_v50 = vadd.f32 %v1281_v60, %v1157_v41  ;;  %v344_v42 = vmul.f32 %v8822_v45, %v7514_v43  ;;  %v348_v48 = vmul.f32 %v8822_v45, %v7525_v34  ;;  %v8825_v34 = vld [vmem:[#allocation72_spill] sm:$0xff] }
 0x20b   :  { %v997_v28 = vmax.f32 %v965_v11, 0.0  ;;  %v1465_v63 = vadd.f32 %v1433_v54, %v1309_v8  ;;  %v524_v24 = vmul.f32 %v8823_v40, %v7522_v61  ;;  %v528_v9 = vmul.f32 %v8823_v40, %v7532_v14 }
 0x20c   :  { %v1469_v3 = vadd.f32 %v1437_v62, %v1313_v50  ;;  %v376_v6 = vadd.f32 %v344_v42, %v195_v29  ;;  %v380_v4 = vadd.f32 %v348_v48, %v199_v44  ;;  %v705_v19 = vmul.f32 %v8824_v58, %v7551_v25  ;;  %v8826_v50 = vld [vmem:[#allocation74_spill] sm:$0xff] }
 0x20d   :  { %v1497_v33 = vadd.f32 %v1465_v63, %v8820_v36  ;;  %v709_v43 = vmul.f32 %v8824_v58, %v8817_v1  ;;  %v886_v32 = vmul.f32 %v8825_v34, %v8818_v13  ;;  %v890_v49 = vmul.f32 %v8825_v34, %v8797_v7 }
 0x20e   :  { %v1501_v18 = vadd.f32 %v1469_v3, %v8820_v36  ;;  %v556_v47 = vadd.f32 %v524_v24, %v376_v6  ;;  %v560_v59 = vadd.f32 %v528_v9, %v380_v4  ;;  %v1034_v30 = vmul.f32 %v7522_v61, %v8821_v23 }
 0x20f   :  { %v1529_v57 = vmax.f32 %v1497_v33, 0.0  ;;  %v1038_v55 = vmul.f32 %v7532_v14, %v8821_v23  ;;  %v1066_v17 = vmul.f32 %v7551_v25, %v8822_v45  ;;  %v1070_v37 = vmul.f32 %v8817_v1, %v8822_v45 }
 0x210   :  { %v1533_v60 = vmax.f32 %v1501_v18, 0.0  ;;  %v737_v54 = vadd.f32 %v705_v19, %v556_v47  ;;  %v741_v21 = vadd.f32 %v709_v43, %v560_v59  ;;  %v1130_v36 = vmul.f32 %v8818_v13, %v8823_v40 }
 0x211   :  { %v1561_v22 = vmax.f32 %v993_v10, %v1529_v57  ;;  %v1098_v41 = vadd.f32 %v1066_v17, %v1034_v30  ;;  %v1102_v62 = vadd.f32 %v1070_v37, %v1038_v55  ;;  %v1134_v61 = vmul.f32 %v8797_v7, %v8823_v40 }
 0x212   :  { %v1565_v11 = vmax.f32 %v997_v28, %v1533_v60  ;;  %v918_v14 = vadd.f32 %v886_v32, %v737_v54  ;;  %v922_v8 = vadd.f32 %v890_v49, %v741_v21  ;;  %v1286_v25 = vmul.f32 %v8799_v53, %v8824_v58 }
 0x213   :  { %v1162_v29 = vadd.f32 %v1130_v36, %v1098_v41  ;;  %v1166_v1 = vadd.f32 %v1134_v61, %v1102_v62  ;;  %v1290_v44 = vmul.f32 %v8800_v56, %v8824_v58  ;;  %v1442_v13 = vmul.f32 %v8802_v52, %v8825_v34 }
 0x214   :  { %v5721_v10 = vpack.i.bf16 %v1565_v11, %v1561_v22  ;;  %v970_v42 = vadd.f32 %v8826_v50, %v918_v14  ;;  %v974_v48 = vadd.f32 %v8826_v50, %v922_v8  ;;  %v1446_v7 = vmul.f32 %v8803_v0, %v8825_v34 }
 0x215   :  { %v1318_v28 = vadd.f32 %v1286_v25, %v1162_v29  ;;  %v1322_v63 = vadd.f32 %v1290_v44, %v1166_v1  ;;  %v187_v53 = vmul.f32 %v8821_v23, %v7571_v51  ;;  %v191_v24 = vmul.f32 %v8821_v23, %v7574_v31  ;;  %v5660_v25 = vpop.trf.xlu1 }
 0x216   :  { %5722 = vxpose.xlu0.b32.cont [3/4] (short) (narrow) %v5721_v10, 8  ;;  %v1002_v56 = vmax.f32 %v970_v42, 0.0  ;;  %v1006_v9 = vmax.f32 %v974_v48, 0.0  ;;  %v336_v52 = vmul.f32 %v8822_v45, %v7581_v27  ;;  %v340_v3 = vmul.f32 %v8822_v45, %v7584_v16 }
 0x217   :  { %v1474_v6 = vadd.f32 %v1442_v13, %v1318_v28  ;;  %v1478_v4 = vadd.f32 %v1446_v7, %v1322_v63  ;;  %v516_v0 = vmul.f32 %v8823_v40, %v7602_v46  ;;  %v520_v51 = vmul.f32 %v8823_v40, %v7605_v20 }
 0x218   :  { %v368_v19 = vadd.f32 %v336_v52, %v187_v53  ;;  %v372_v33 = vadd.f32 %v340_v3, %v191_v24  ;;  %v697_v31 = vmul.f32 %v8824_v58, %v7616_v39  ;;  %v701_v43 = vmul.f32 %v8824_v58, %v7619_v26 }
 0x219   :  { %v1506_v27 = vadd.f32 %v1474_v6, %v8826_v50  ;;  %v1510_v16 = vadd.f32 %v1478_v4, %v8826_v50  ;;  %v878_v32 = vmul.f32 %v8825_v34, %v8806_v2  ;;  %v882_v49 = vmul.f32 %v8825_v34, %v8807_v5 }
 0x21a   :  { %v548_v18 = vadd.f32 %v516_v0, %v368_v19  ;;  %v552_v47 = vadd.f32 %v520_v51, %v372_v33  ;;  %v1026_v59 = vmul.f32 %v7602_v46, %v8821_v23  ;;  %v1030_v30 = vmul.f32 %v7605_v20, %v8821_v23  ;;  %v5647_v23 = vpop.trf.xlu0 }
 0x21b   :  { %v1538_v57 = vmax.f32 %v1506_v27, 0.0  ;;  %v1542_v55 = vmax.f32 %v1510_v16, 0.0  ;;  %v1058_v17 = vmul.f32 %v7616_v39, %v8822_v45  ;;  %v1062_v37 = vmul.f32 %v7619_v26, %v8822_v45  ;;  %v7938_v27 = vld [vmem:[%s8424_s3 + $0x8] sm:$0xff]   ;;  %v7943_v16 = vld [vmem:[%s8424_s3 + $0x20] sm:$0xff]  }
 0x21c   :  { %v729_v60 = vadd.f32 %v697_v31, %v548_v18  ;;  %v733_v54 = vadd.f32 %v701_v43, %v552_v47  ;;  %v1122_v21 = vmul.f32 %v8806_v2, %v8823_v40  ;;  %v1126_v36 = vmul.f32 %v8807_v5, %v8823_v40  ;;  %5437 = vmatprep.subr.bf16.mxu0 %v7938_v27 }
 0x21d   :  { %v1570_v46 = vmax.f32 %v1002_v56, %v1538_v57  ;;  %v1574_v22 = vmax.f32 %v1006_v9, %v1542_v55  ;;  %v1090_v41 = vadd.f32 %v1058_v17, %v1026_v59  ;;  %v1094_v20 = vadd.f32 %v1062_v37, %v1030_v30  ;;  %v5686_v9 = vpop.trf.xlu1  ;;  %5438 = vmatpush3.bf16.msra.mxu0 %v7938_v27 }
 0x21e   :  { %v910_v62 = vadd.f32 %v878_v32, %v729_v60  ;;  %v914_v61 = vadd.f32 %v882_v49, %v733_v54  ;;  %v1278_v39 = vmul.f32 %v8808_v15, %v8824_v58  ;;  %v1282_v26 = vmul.f32 %v8809_v35, %v8824_v58  ;;  %v5673_v1 = vpop.trf.xlu0  ;;  %5447 = vmatprep.subr.bf16.mxu0 %v7943_v16  ;;  %v5762_v54 = vld [vmem:[%s8424_s3 + $0x40] sm:$0xff]  }
 0x21f   :  { %v5736_v45 = vpack.i.bf16 %v1574_v22, %v1570_v46  ;;  %v1154_v11 = vadd.f32 %v1122_v21, %v1090_v41  ;;  %v1158_v14 = vadd.f32 %v1126_v36, %v1094_v20  ;;  %v1434_v2 = vmul.f32 %v8810_v12, %v8825_v34 }
 0x220   :  { %v962_v5 = vadd.f32 %v8826_v50, %v910_v62  ;;  %v966_v40 = vadd.f32 %v8826_v50, %v914_v61  ;;  %v1438_v8 = vmul.f32 %v8811_v38, %v8825_v34  ;;  %v5664_v10 = vunpack.i.h.bf16 %v5660_v25 }
 0x221   :  { %5737 = vxpose.xlu1.b32.end [4/4] (short) (narrow) %v5736_v45, 8  ;;  %v1310_v29 = vadd.f32 %v1278_v39, %v1154_v11  ;;  %v1314_v15 = vadd.f32 %v1282_v26, %v1158_v14  ;;  %v7917_v42 = vunpack.i.l.bf16 %v5647_v23  ;;  %v5661_v12 = vunpack.i.l.bf16 %v5660_v25 }
 0x222   :  { %v994_v44 = vmax.f32 %v962_v5, 0.0  ;;  %v998_v35 = vmax.f32 %v966_v40, 0.0  ;;  %v7919_v48 = vunpack.i.h.bf16 %v5673_v1  ;;  %v3202_v38 = vpack.c.bf16 %v5664_v10, %v5664_v10 }
 0x223   :  { %v1466_v58 = vadd.f32 %v1434_v2, %v1310_v29  ;;  %v1470_v13 = vadd.f32 %v1438_v8, %v1314_v15  ;;  %v3201_v34 = vpack.c.bf16 %v5661_v12, %v5661_v12  ;;  %v7923_v63 = vpack.c.bf16 %v5664_v10, %v5661_v12 }
 0x224   :  { %v3315_v56 = vshrl.u32 %v3202_v38, 16  ;;  %v7925_v52 = vunpack.i.h.bf16 %v5647_v23  ;;  %v3199_v3 = vpack.c.bf16 %v7917_v42, %v7917_v42  ;;  %v3204_v4 = vpack.c.bf16 %v7919_v48, %v7919_v48 }
 0x225   :  { %v1498_v7 = vadd.f32 %v1466_v58, %v8826_v50  ;;  %v1502_v28 = vadd.f32 %v1470_v13, %v8826_v50  ;;  %v3308_v6 = vshrl.u32 %v3201_v34, 16  ;;  %v3318_v50 = vshll.u32 %v3202_v38, 16 }
 0x226   :  { %v7931_v19 = vunpack.i.l.bf16 %v5673_v1  ;;  %v3311_v31 = vshll.u32 %v3201_v34, 16  ;;  %v7933_v43 = vunpack.i.h.bf16 %v5686_v9  ;;  %v3317_v49 = vrot.slane %v3315_v56, 7 }
 0x227   :  { %v1530_v53 = vmax.f32 %v1498_v7, 0.0  ;;  %v1534_v24 = vmax.f32 %v1502_v28, 0.0  ;;  %v3310_v33 = vrot.slane %v3308_v6, 7  ;;  %v3200_v47 = vpack.c.bf16 %v7925_v52, %v7925_v52 }
 0x228   :  { %v3203_v18 = vpack.c.bf16 %v7931_v19, %v7931_v19  ;;  %v3206_v59 = vpack.c.bf16 %v7933_v43, %v7933_v43  ;;  %v7951_v30 = vunpack.i.l.bf16 %v5686_v9  ;;  %v3329_v57 = vshrl.u32 %v3204_v4, 16 }
 0x229   :  { %v1562_v0 = vmax.f32 %v994_v44, %v1530_v53  ;;  %v1566_v51 = vmax.f32 %v998_v35, %v1534_v24  ;;  %v3313_v55 = vor.u32 %v3311_v31, %v3310_v33  ;;  %v3320_v60 = vor.u32 %v3318_v50, %v3317_v49  ;;  %v5804_v50 = vld [vmem:[%s8424_s3 + $0x10] sm:$0xff]  }
 0x22a   :  { %v3322_v17 = vshrl.u32 %v3203_v18, 16  ;;  %v3205_v37 = vpack.c.bf16 %v7951_v30, %v7951_v30  ;;  %v3294_v21 = vshrl.u32 %v3199_v3, 16  ;;  %v3297_v36 = vshll.u32 %v3199_v3, 16 }
 0x22b   :  { %v5723_v32 = vpack.i.bf16 %v1566_v51, %v1562_v0  ;;  %v3332_v46 = vshll.u32 %v3204_v4, 16  ;;  %v3343_v22 = vshrl.u32 %v3206_v59, 16  ;;  %v3301_v20 = vshrl.u32 %v3200_v47, 16 }
 0x22c   :  { %v3336_v41 = vshrl.u32 %v3205_v37, 16  ;;  %v3331_v23 = vrot.slane %v3329_v57, 7  ;;  %v3325_v62 = vshll.u32 %v3203_v18, 16  ;;  %v3296_v39 = vrot.slane %v3294_v21, 7 }
 0x22d   :  { %5724 = vxpose.xlu0.b32.end [4/4] (short) (narrow) %v5723_v32, 8  ;;  %v3304_v26 = vshll.u32 %v3200_v47, 16  ;;  %v3324_v45 = vrot.slane %v3322_v17, 7  ;;  %v3346_v11 = vshll.u32 %v3206_v59, 16  ;;  %v3303_v14 = vrot.slane %v3301_v20, 7  ;;  %v5805_v47 = vld [vmem:[%s8424_s3 + $0x18] sm:$0xff]  }
 0x22e   :  { %v3359_v2 = vsel %vm7958_vm3, 0, %v3313_v55  ;;  %v3338_v5 = vrot.slane %v3336_v41, 7  ;;  %v3339_v40 = vshll.u32 %v3205_v37, 16  ;;  %v3299_v8 = vor.u32 %v3297_v36, %v3296_v39  ;;  %v5712_v36 = vpop.trf.xlu1  ;;  %v8831_v39 = vld [vmem:[#allocation48_spill] sm:$0xff] }
 0x22f   :  { %v3360_v25 = vsel %vm7958_vm3, 0, %v3320_v60  ;;  %v3345_v29 = vrot.slane %v3343_v22, 7  ;;  %v3306_v15 = vor.u32 %v3304_v26, %v3303_v14  ;;  %v3367_v1 = vsel %vm7962_vm5, %v3359_v2, 0 }
 0x230   :  { %v3368_v44 = vsel %vm7962_vm5, %v3360_v25, 0  ;;  %v3357_v35 = vsel %vm7958_vm3, 0, %v3299_v8  ;;  %v3334_v58 = vor.u32 %v3332_v46, %v3331_v23  ;;  %v3327_v13 = vor.u32 %v3325_v62, %v3324_v45 }
 0x231   :  { %v3358_v10 = vsel %vm7958_vm3, 0, %v3306_v15  ;;  %v3365_v12 = vsel %vm7962_vm5, %v3357_v35, 0  ;;  %v3341_v7 = vor.u32 %v3339_v40, %v3338_v5  ;;  %v7984_v38 = vcombine.low %v3367_v1, %v3368_v44 }
 0x232   :  { %v7982_v28 = vsel %vm7962_vm5, %v3358_v10, 0  ;;  %v3348_v34 = vor.u32 %v3346_v11, %v3345_v29  ;;  %v5227_v24 = vcombine.low %v3367_v1, %v3367_v1  ;;  %v3361_v56 = vsel %vm7958_vm3, 0, %v3327_v13 }
 0x233   :  { %v7987_v53 = vcombine.low %v3365_v12, %v7982_v28  ;;  %v5228_v9 = vcombine.high %v3367_v1, %v3367_v1  ;;  %v3362_v3 = vsel %vm7958_vm3, 0, %v3334_v58  ;;  %v7999_v6 = vsel %vm7962_vm5, %v3361_v56, 0 }
 0x234   :  { %v3363_v4 = vsel %vm7958_vm3, 0, %v3341_v7  ;;  %v5223_v0 = vcombine.low %v3365_v12, %v3365_v12  ;;  %v5224_v51 = vcombine.high %v3365_v12, %v3365_v12  ;;  %v8008_v33 = vsel %vm7962_vm5, %v3362_v3, 0 }
 0x235   :  { %5427 = vmatprep.mubr.msk.bf16.mxu1 %vm3414_vm6, %v7987_v53  ;;  %v3364_v31 = vsel %vm7958_vm3, 0, %v3348_v34  ;;  %v5229_v32 = vcombine.low %v3368_v44, %v3368_v44  ;;  %v8014_v49 = vcombine.low %v7999_v6, %v8008_v33  ;;  %v8018_v18 = vsel %vm7962_vm5, %v3363_v4, 0 }
 0x236   :  { %5428 = vmatmul.mubr.msk.bf16.vlgmr.msra.gmra.mrb[0].mxu1 %vm3414_vm6, %v7984_v38  ;;  %v5225_v57 = vcombine.low %v7982_v28, %v7982_v28  ;;  %v5230_v55 = vcombine.high %v3368_v44, %v3368_v44  ;;  %v8027_v17 = vsel %vm7962_vm5, %v3364_v31, 0  ;;  %v5226_v37 = vcombine.high %v7982_v28, %v7982_v28 }
 0x237   :  { %5484 = vmatpush3.bf16.msra.mxu1 %v5804_v50  ;;  %v8031_v60 = vrot.slane %v5227_v24, 9  ;;  %5431 = vmatprep.mubr.msk.bf16.mxu1 %vm3414_vm6, %v8014_v49  ;;  %v8037_v21 = vcombine.low %v8018_v18, %v8027_v17  ;;  %v8039_v46 = vrot.slane %v5223_v0, 9  ;;  %v8041_v22 = vrot.slane %v5224_v51, 5 }
 0x238   :  { %5485 = vmatprep.subr.bf16.mxu1 %v5805_v47  ;;  %v5699_v59 = vpop.trf.xlu0  ;;  %v8043_v41 = vrot.slane %v5228_v9, 5  ;;  %v8045_v23 = vrot.slane %v5229_v32, 9  ;;  %v8048_v26 = vrot.slane %v5225_v57, 9  ;;  %v8050_v45 = vrot.slane %v5230_v55, 5 }
 0x239   :  { %v5703_v20 = vunpack.i.h.bf16 %v5699_v59  ;;  %v5700_v62 = vunpack.i.l.bf16 %v5699_v59  ;;  %v5716_v14 = vunpack.i.h.bf16 %v5712_v36  ;;  %v5713_v5 = vunpack.i.l.bf16 %v5712_v36 }
 0x23a   :  { %v8068_v7 = vpack.c.bf16 %v7925_v52, %v7917_v42  ;;  %v8072_v56 = vpack.c.bf16 %v7919_v48, %v7931_v19  ;;  %v8074_v9 = vrot.slane %v5226_v37, 5  ;;  %v8078_v0 = vpack.c.bf16 %v7933_v43, %v7951_v30 }
 0x23b   :  { %5486 = vmatpush3.bf16.msra.mxu1 %v5805_v47  ;;  %v2936_v11 = vpack.c.bf16 %v5703_v20, %v5703_v20  ;;  %v2935_v2 = vpack.c.bf16 %v5700_v62, %v5700_v62  ;;  %v2938_v40 = vpack.c.bf16 %v5716_v14, %v5716_v14  ;;  %v8054_v8 = vpack.c.bf16 %v5703_v20, %v5700_v62 }
 0x23c   :  { %5495 = vmatprep.subr.bf16.mxu1 %v8831_v39  ;;  %v2937_v15 = vpack.c.bf16 %v5713_v5, %v5713_v5  ;;  %v8056_v1 = vpack.c.bf16 %v5716_v14, %v5713_v5  ;;  %v4329_v42 = vsel %vm8060_vm9, %v8031_v60, %v8043_v41  ;;  %v4333_v52 = vsel %vm8060_vm9, %v8045_v23, %v8050_v45 }
 0x23d   :  { %v3215_v25 = vshrl.u32 %v2936_v11, 16  ;;  %v3218_v29 = vshll.u32 %v2936_v11, 16  ;;  %v3208_v44 = vshrl.u32 %v2935_v2, 16  ;;  %v3211_v35 = vshll.u32 %v2935_v2, 16 }
 0x23e   :  { %5432 = vmatmul.mubr.msk.bf16.gmra.mrb[4].mxu1 %vm3414_vm6, %v8037_v21  ;;  %v3229_v13 = vshrl.u32 %v2938_v40, 16  ;;  %v3232_v10 = vshll.u32 %v2938_v40, 16  ;;  %v3222_v28 = vshrl.u32 %v2937_v15, 16  ;;  %v3225_v34 = vshll.u32 %v2937_v15, 16 }
 0x23f   :  { %5487 = vmatprep.mubr.msk.bf16.mxu1 %vm3414_vm6, %v8054_v8  ;;  %v3217_v12 = vrot.slane %v3215_v25, 7  ;;  %v3210_v24 = vrot.slane %v3208_v44, 7  ;;  %v5231_v51 = vcombine.low %v7999_v6, %v7999_v6  ;;  %v5232_v50 = vcombine.high %v7999_v6, %v7999_v6  ;;  %v5806_v6 = vld [vmem:[%s8424_s3] sm:$0xff]   ;;  %v8120_v25 = vld [vmem:[%s8424_s3 + $0x28] sm:$0xff]  }
 0x240   :  { %v3231_v3 = vrot.slane %v3229_v13, 7  ;;  %v3224_v48 = vrot.slane %v3222_v28, 7  ;;  %v5233_v31 = vcombine.low %v8008_v33, %v8008_v33  ;;  %v5234_v13 = vcombine.high %v8008_v33, %v8008_v33 }
 0x241   :  { %v3220_v4 = vor.u32 %v3218_v29, %v3217_v12  ;;  %v3213_v19 = vor.u32 %v3211_v35, %v3210_v24  ;;  %v5236_v33 = vcombine.high %v8018_v18, %v8018_v18 }
 0x242   :  { %v3234_v43 = vor.u32 %v3232_v10, %v3231_v3  ;;  %v3227_v32 = vor.u32 %v3225_v34, %v3224_v48  ;;  %v5235_v10 = vcombine.low %v8018_v18, %v8018_v18  ;;  %v8144_v48 = vld [vmem:[%s8424_s3 + $0x30] sm:$0xff]   ;;  %v4325_v18 = vsel %vm8060_vm9, %v8048_v26, %v8074_v9 }
 0x243   :  { %v3275_v30 = vsel %vm7958_vm3, 0, %v3220_v4  ;;  %v3274_v47 = vsel %vm7958_vm3, 0, %v3213_v19  ;;  %v5237_v4 = vcombine.low %v8027_v17, %v8027_v17  ;;  %v4321_v19 = vsel %vm8060_vm9, %v8039_v46, %v8041_v22 }
 0x244   :  { %v3286_v59 = vsel %vm7962_vm5, %v3275_v30, 0  ;;  %v3285_v57 = vsel %vm7962_vm5, %v3274_v47, 0  ;;  %v3277_v60 = vsel %vm7958_vm3, 0, %v3234_v43  ;;  %v3276_v23 = vsel %vm7958_vm3, 0, %v3227_v32 }
 0x245   :  { %v5175_v55 = vcombine.low %v3286_v59, %v3286_v59  ;;  %v5176_v37 = vcombine.high %v3286_v59, %v3286_v59  ;;  %v5131_v36 = vcombine.low %v3285_v57, %v3286_v59  ;;  %v5173_v41 = vcombine.low %v3285_v57, %v3285_v57 }
 0x246   :  { %5488 = vmatmul.mubr.msk.bf16.vlgmr.msra.gmra.mrb[8].mxu1 %vm3414_vm6, %v8056_v1  ;;  %v5174_v20 = vcombine.high %v3285_v57, %v3285_v57  ;;  %v3287_v45 = vsel %vm7962_vm5, %v3276_v23, 0  ;;  %v3288_v11 = vsel %vm7962_vm5, %v3277_v60, 0  ;;  %v5238_v43 = vcombine.high %v8027_v17, %v8027_v17 }
 0x247   :  { %5496 = vmatpush3.bf16.msra.mxu1 %v5806_v6  ;;  %v5190_v62 = vrot.slane %v5175_v55, 9  ;;  %v3883_v39 = vrot.slane %v5176_v37, 5  ;;  %5439 = vmatprep.mubr.msk.bf16.mxu0 %vm3414_vm6, %v5131_v36  ;;  %v5189_v14 = vrot.slane %v5173_v41, 9  ;;  %v5132_v5 = vcombine.low %v3287_v45, %v3288_v11 }
 0x248   :  { %5497 = vmatprep.subr.bf16.mxu1 %v7938_v27  ;;  %v3879_v2 = vrot.slane %v5174_v20, 5  ;;  %v5177_v40 = vcombine.low %v3287_v45, %v3287_v45  ;;  %v5178_v29 = vcombine.high %v3287_v45, %v3287_v45  ;;  %v5179_v15 = vcombine.low %v3288_v11, %v3288_v11 }
 0x249   :  { %v5180_v44 = vcombine.high %v3288_v11, %v3288_v11  ;;  %v3884_v35 = vsel %vm8060_vm9, %v5190_v62, %v3883_v39  ;;  %5440 = vmatmul.mubr.msk.bf16.vlgmr.msra.gmra.mrb[0].mxu0 %vm3414_vm6, %v5132_v5  ;;  %v8160_v47 = vcombine.low %v4321_v19, %v4325_v18  ;;  %v8164_v6 = vcombine.low %v4329_v42, %v4333_v52 }
 0x24a   :  { %v5191_v12 = vrot.slane %v5177_v40, 9  ;;  %v3880_v28 = vsel %vm8060_vm9, %v5189_v14, %v3879_v2  ;;  %v3887_v34 = vrot.slane %v5178_v29, 5  ;;  %v5192_v24 = vrot.slane %v5179_v15, 9  ;;  %5448 = vmatpush3.bf16.msra.mxu0 %v7943_v16 }
 0x24b   :  { %5498 = vmatpush3.bf16.msra.mxu1 %v7938_v27  ;;  %v3891_v27 = vrot.slane %v5180_v44, 5  ;;  %v8134_v3 = vcombine.low %v3880_v28, %v3884_v35  ;;  %5449 = vmatprep.subr.bf16.mxu0 %v8120_v25  ;;  %v5243_v46 = vrot.slane %v5231_v51, 9  ;;  %v4336_v22 = vrot.slane %v5232_v50, 5 }
 0x24c   :  { %5507 = vmatprep.subr.bf16.mxu1 %v7943_v16  ;;  %v3888_v30 = vsel %vm8060_vm9, %v5191_v12, %v3887_v34  ;;  %v5244_v26 = vrot.slane %v5233_v31, 9  ;;  %v4340_v9 = vrot.slane %v5234_v13, 5  ;;  %v5245_v17 = vrot.slane %v5235_v10, 9 }
 0x24d   :  { %v3892_v32 = vsel %vm8060_vm9, %v5192_v24, %v3891_v27  ;;  %v4344_v57 = vrot.slane %v5236_v33, 5  ;;  %v5246_v55 = vrot.slane %v5237_v4, 9  ;;  %v4348_v37 = vrot.slane %v5238_v43, 5 }
 0x24e   :  { %v8162_v59 = vcombine.low %v3888_v30, %v3892_v32  ;;  %5450 = vmatpush3.bf16.msra.mxu0 %v8120_v25  ;;  %v4337_v60 = vsel %vm8060_vm9, %v5243_v46, %v4336_v22  ;;  %v4341_v36 = vsel %vm8060_vm9, %v5244_v26, %v4340_v9 }
 0x24f   :  { %5459 = vmatprep.subr.bf16.mxu0 %v8144_v48  ;;  %v8172_v42 = vcombine.low %v4337_v60, %v4341_v36  ;;  %v4345_v52 = vsel %vm8060_vm9, %v5245_v17, %v4344_v57  ;;  %v4349_v51 = vsel %vm8060_vm9, %v5246_v55, %v4348_v37 }
 0x250   :  { %v8178_v50 = vcombine.low %v4345_v52, %v4349_v51 }
 0x295   :  { %v5738_v31 = vpop.trf.xlu1 }
 0x296   :  { %v5742_v41 = vunpack.i.h.bf16 %v5738_v31  ;;  %v5739_v20 = vunpack.i.l.bf16 %v5738_v31 }
 0x298   :  { %v2942_v23 = vpack.c.bf16 %v5742_v41, %v5742_v41  ;;  %v2941_v62 = vpack.c.bf16 %v5739_v20, %v5739_v20  ;;  %v5305_v13 = vpack.c.bf16 %v5742_v41, %v5739_v20 }
 0x29a   :  { %v3257_v39 = vshrl.u32 %v2942_v23, 16  ;;  %v3250_v45 = vshrl.u32 %v2941_v62, 16  ;;  %v3260_v14 = vshll.u32 %v2942_v23, 16  ;;  %v3253_v5 = vshll.u32 %v2941_v62, 16 }
 0x29c   :  { %v3259_v11 = vrot.slane %v3257_v39, 7  ;;  %v3252_v2 = vrot.slane %v3250_v45, 7 }
 0x29e   :  { %v3262_v44 = vor.u32 %v3260_v14, %v3259_v11  ;;  %v3255_v35 = vor.u32 %v3253_v5, %v3252_v2  ;;  %v5766_v2 = vld [vmem:[%s8426_s5 + $0x48] sm:$0xff]   ;;  %v5767_v5 = vld [vmem:[%s8426_s5 + $0xc0] sm:$0xff]  }
 0x2a0   :  { %v3280_v27 = vsel %vm7958_vm3, 0, %v3255_v35  ;;  %v3281_v33 = vsel %vm7958_vm3, 0, %v3262_v44  ;;  %v5770_v44 = vld [vmem:[%s8426_s5 + $0x50] sm:$0xff]   ;;  %v5773_v35 = vld [vmem:[%s8426_s5 + $0x88] sm:$0xff]  }
 0x2a1   :  { %v5725_v40 = vpop.trf.xlu0  ;;  %v3291_v46 = vsel %vm7962_vm5, %v3280_v27, 0  ;;  %v3292_v22 = vsel %vm7962_vm5, %v3281_v33, 0  ;;  %v5778_v27 = vld [vmem:[%s8426_s5 + $0x60] sm:$0xff]   ;;  %v5781_v33 = vld [vmem:[%s8426_s5 + $0x98] sm:$0xff]  }
 0x2a2   :  { %v5729_v29 = vunpack.i.h.bf16 %v5725_v40  ;;  %v5726_v15 = vunpack.i.l.bf16 %v5725_v40  ;;  %v5134_v57 = vcombine.low %v3291_v46, %v3292_v22  ;;  %v5186_v60 = vcombine.high %v3291_v46, %v3291_v46  ;;  %v5769_v40 = vld [vmem:[%s8426_s5 + $0x80] sm:$0xff]  }
 0x2a3   :  { %v5187_v36 = vcombine.low %v3292_v22, %v3292_v22  ;;  %v5188_v52 = vcombine.high %v3292_v22, %v3292_v22  ;;  %v5789_v22 = vld [vmem:[%s8426_s5 + $0xa8] sm:$0xff]  }
 0x2a4   :  { %v2940_v10 = vpack.c.bf16 %v5729_v29, %v5729_v29  ;;  %v2939_v12 = vpack.c.bf16 %v5726_v15, %v5726_v15  ;;  %v5304_v28 = vpack.c.bf16 %v5729_v29, %v5726_v15  ;;  %v3903_v20 = vrot.slane %v5186_v60, 5  ;;  %v5771_v29 = vld [vmem:[%s8426_s5 + $0xc8] sm:$0xff]  }
 0x2a5   :  { %v5196_v23 = vrot.slane %v5187_v36, 9  ;;  %v3907_v62 = vrot.slane %v5188_v52, 5  ;;  %v5768_v15 = vld [vmem:[%s8426_s5 + $0x8] sm:$0xff]   ;;  %v5860_v52 = vmov 1983009808  }
 0x2a6   :  { %v3243_v34 = vshrl.u32 %v2940_v10, 16  ;;  %v3236_v24 = vshrl.u32 %v2939_v12, 16  ;;  %5491 = vmatprep.mubr.msk.bf16.mxu1 %vm3414_vm6, %v5304_v28  ;;  %v3246_v19 = vshll.u32 %v2940_v10, 16  ;;  %v3239_v43 = vshll.u32 %v2939_v12, 16  ;;  %v5772_v10 = vld [vmem:[%s8426_s5 + $0x10] sm:$0xff]   ;;  %v5774_v12 = vld [vmem:[%s8426_s5 + $0x58] sm:$0xff]  }
 0x2a7   :  { %5492 = vmatmul.mubr.msk.bf16.gmra.mrb[12].mxu1 %vm3414_vm6, %v5305_v13 }
 0x2a8   :  { %v3245_v4 = vrot.slane %v3243_v34, 7  ;;  %v3238_v18 = vrot.slane %v3236_v24, 7  ;;  %5499 = vmatprep.mubr.msk.bf16.mxu1 %vm3414_vm6, %v7987_v53  ;;  %v5779_v34 = vld [vmem:[%s8426_s5 + $0xd8] sm:$0xff]  }
 0x2a9   :  { %v5776_v24 = vld [vmem:[%s8426_s5 + $0x18] sm:$0xff]  }
 0x2aa   :  { %v3248_v30 = vor.u32 %v3246_v19, %v3245_v4  ;;  %v3241_v32 = vor.u32 %v3239_v43, %v3238_v18  ;;  %v5783_v4 = vld [vmem:[%s8426_s5 + $0xe0] sm:$0xff]   ;;  %v5782_v18 = vld [vmem:[%s8426_s5 + $0x68] sm:$0xff]  }
 0x2ab   :  { %v5780_v19 = vld [vmem:[%s8426_s5 + $0x20] sm:$0xff]  }
 0x2ac   :  { %v3278_v26 = vsel %vm7958_vm3, 0, %v3241_v32  ;;  %v3279_v9 = vsel %vm7958_vm3, 0, %v3248_v30  ;;  %v5785_v43 = vld [vmem:[%s8426_s5 + $0xa0] sm:$0xff]   ;;  %v5787_v30 = vld [vmem:[%s8426_s5 + $0xe8] sm:$0xff]  }
 0x2ad   :  { %v3289_v17 = vsel %vm7962_vm5, %v3278_v26, 0  ;;  %v3290_v53 = vsel %vm7962_vm5, %v3279_v9, 0  ;;  %v5784_v32 = vld [vmem:[%s8426_s5 + $0x28] sm:$0xff]   ;;  %v5788_v26 = vld [vmem:[%s8426_s5 + $0x30] sm:$0xff]  }
 0x2ae   :  { %v5133_v55 = vcombine.low %v3289_v17, %v3290_v53  ;;  %v5181_v61 = vcombine.low %v3289_v17, %v3289_v17 }
 0x2af   :  { %5500 = vmatmul.mubr.msk.bf16.vlgmr.msra.gmra.mrb[8].mxu1 %vm3414_vm6, %v7984_v38  ;;  %v5182_v38 = vcombine.high %v3289_v17, %v3289_v17 }
 0x2b0   :  { %5508 = vmatpush3.bf16.msra.mxu1 %v7943_v16  ;;  %5443 = vmatprep.mubr.msk.bf16.mxu0 %vm3414_vm6, %v5133_v55  ;;  %v5761_v16 = vld [vmem:[%s8424_s3 + $0x38] sm:$0xff]  }
 0x2b1   :  { %5503 = vmatprep.mubr.msk.bf16.mxu1 %vm3414_vm6, %v8014_v49  ;;  %5444 = vmatmul.mubr.msk.bf16.gmra.mrb[4].mxu0 %vm3414_vm6, %v5134_v57  ;;  %v5183_v49 = vcombine.low %v3290_v53, %v3290_v53  ;;  %v5255_v57 = vld [vmem:[%s8425_s4] ss:$0 sm:$0xff] }
 0x2b2   :  { %5451 = vmatprep.mubr.msk.bf16.mxu0 %vm3414_vm6, %v8054_v8  ;;  %5509 = vmatprep.subr.bf16.mxu1 %v8120_v25  ;;  %v5193_v8 = vrot.slane %v5181_v61, 9 }
 0x2b4   :  { %5510 = vmatpush3.bf16.msra.mxu1 %v8120_v25  ;;  %v5194_v25 = vrot.slane %v5183_v49, 9 }
 0x2b5   :  { %5519 = vmatprep.subr.bf16.mxu1 %v8144_v48 }
 0x2b7   :  { %5504 = vmatmul.mubr.msk.bf16.gmra.mrb[12].mxu1 %vm3414_vm6, %v8037_v21  ;;  %v5184_v21 = vcombine.high %v3290_v53, %v3290_v53 }
 0x2b8   :  { %5511 = vmatprep.mubr.msk.bf16.mxu1 %vm3414_vm6, %v8068_v7 }
 0x2b9   :  { %5452 = vmatmul.mubr.msk.bf16.vlgmr.msra.gmra.mrb[0].mxu0 %vm3414_vm6, %v8056_v1  ;;  %v3895_v1 = vrot.slane %v5182_v38, 5  ;;  %v3899_v37 = vrot.slane %v5184_v21, 5 }
 0x2ba   :  { %5455 = vmatprep.mubr.msk.bf16.mxu0 %vm3414_vm6, %v5304_v28  ;;  %5460 = vmatpush3.bf16.msra.mxu0 %v8144_v48  ;;  %v5777_v28 = vld [vmem:[%s8426_s5 + $0x90] sm:$0xff]  }
 0x2bb   :  { %5461 = vmatprep.subr.bf16.mxu0 %v5761_v16  ;;  %v3896_v51 = vsel %vm8060_vm9, %v5193_v8, %v3895_v1  ;;  %v3900_v31 = vsel %vm8060_vm9, %v5194_v25, %v3899_v37 }
 0x2bc   :  { %v5199_v39 = vcombine.low %v3896_v51, %v3900_v31  ;;  %v4504_v51 = vunpack.c.l.s4 %v5860_v52  ;;  %v5793_v52 = vld [vmem:[%s8426_s5 + $0xb0] sm:$0xff]  }
 0x2be   :  { %5462 = vmatpush3.bf16.msra.mxu0 %v5761_v16 }
 0x2bf   :  { %5512 = vmatmul.mubr.msk.bf16.vlgmr.msra.gmra.mrb[8].mxu1 %vm3414_vm6, %v7923_v63  ;;  %5471 = vmatprep.subr.bf16.mxu0 %v5762_v54 }
 0x2c0   :  { %5520 = vmatpush3.bf16.msra.mxu1 %v8144_v48  ;;  %5515 = vmatprep.mubr.msk.bf16.mxu1 %vm3414_vm6, %v8072_v56  ;;  %v5763_v48 = vld [vmem:[%s8424_s3 + $0x48] sm:$0xff]  }
 0x2c1   :  { %5456 = vmatmul.mubr.msk.bf16.gmra.mrb[4].mxu0 %vm3414_vm6, %v5305_v13  ;;  %5521 = vmatprep.subr.bf16.mxu1 %v5761_v16  ;;  %v5775_v13 = vld [vmem:[%s8426_s5 + $0xd0] sm:$0xff]  }
 0x2c2   :  { %5463 = vmatprep.mubr.msk.bf16.mxu0 %vm3414_vm6, %v8068_v7  ;;  %v5185_v7 = vcombine.low %v3291_v46, %v3291_v46  ;;  %v5786_v46 = vld [vmem:[%s8426_s5 + $0x70] sm:$0xff]  }
 0x2c4   :  { %5522 = vmatpush3.bf16.msra.mxu1 %v5761_v16  ;;  %v5195_v41 = vrot.slane %v5185_v7, 9 }
 0x2c5   :  { %5531 = vmatprep.subr.bf16.mxu1 %v5762_v54 }
 0x2c7   :  { %5516 = vmatmul.mubr.msk.bf16.gmra.mrb[12].mxu1 %vm3414_vm6, %v8078_v0 }
 0x2c8   :  { %5523 = vmatprep.mubr.msk.bf16.mxu1 %vm3414_vm6, %v8134_v3 }
 0x2c9   :  { %5464 = vmatmul.mubr.msk.bf16.vlgmr.msra.gmra.mrb[0].mxu0 %vm3414_vm6, %v7923_v63  ;;  %v3904_v63 = vsel %vm8060_vm9, %v5195_v41, %v3903_v20 }
 0x2ca   :  { %5467 = vmatprep.mubr.msk.bf16.mxu0 %vm3414_vm6, %v8072_v56  ;;  %5472 = vmatpush3.bf16.msra.mxu0 %v5762_v54  ;;  %v3908_v56 = vsel %vm8060_vm9, %v5196_v23, %v3907_v62 }
 0x2cb   :  { %5473 = vmatprep.subr.bf16.mxu0 %v5763_v48  ;;  %v5200_v45 = vcombine.low %v3904_v63, %v3908_v56 }
 0x2ce   :  { %5474 = vmatpush3.bf16.msra.mxu0 %v5763_v48 }
 0x2cf   :  { %5524 = vmatmul.mubr.msk.bf16.vlgmr.msra.gmra.mrb[8].mxu1 %vm3414_vm6, %v8162_v59 }
 0x2d0   :  { %5532 = vmatpush3.bf16.msra.mxu1 %v5762_v54  ;;  %5527 = vmatprep.mubr.msk.bf16.mxu1 %vm3414_vm6, %v5199_v39 }
 0x2d1   :  { %5468 = vmatmul.mubr.msk.bf16.gmra.mrb[4].mxu0 %vm3414_vm6, %v8078_v0  ;;  %5533 = vmatprep.subr.bf16.mxu1 %v5763_v48 }
 0x2d2   :  { %5475 = vmatprep.mubr.msk.bf16.mxu0 %vm3414_vm6, %v8134_v3 }
 0x2d4   :  { %5534 = vmatpush3.bf16.msra.mxu1 %v5763_v48 }
 0x2d5   :  { %5392 = vmatprep.subr.bf16.mxu1 %v5767_v5 }
 0x2d7   :  { %5528 = vmatmul.mubr.msk.bf16.gmra.mrb[12].mxu1 %vm3414_vm6, %v5200_v45 }
 0x2d8   :  { %5535 = vmatprep.mubr.msk.bf16.mxu1 %vm3414_vm6, %v8160_v47 }
 0x2d9   :  { %5476 = vmatmul.mubr.msk.bf16.vlgmr.msra.gmra.mrb[0].mxu0 %vm3414_vm6, %v8162_v59 }
 0x2da   :  { %5479 = vmatprep.mubr.msk.bf16.mxu0 %vm3414_vm6, %v5199_v39 }
 0x2df   :  { %5536 = vmatmul.mubr.msk.bf16.vlgmr.msra.gmra.mrb[8].mxu1 %vm3414_vm6, %v8164_v6 }
 0x2e0   :  { %5539 = vmatprep.mubr.msk.bf16.mxu1 %vm3414_vm6, %v8172_v42  ;;  %v5764_v42 = vld [vmem:[%s8426_s5 + $0x40] sm:$0xff]   ;;  %5393 = vmatpush3.bf16.msra.mxu1 %v5769_v40 }
 0x2e1   :  { %5480 = vmatmul.mubr.msk.bf16.gmra.mrb[4].mxu0 %vm3414_vm6, %v5200_v45  ;;  %5370 = vmatprep.subr.bf16.mxu0 %v5764_v42 }
 0x2e2   :  { %5394 = vmatprep.subr.bf16.mxu1 %v5771_v29 }
 0x2e4   :  { %5395 = vmatpush3.bf16.msra.mxu1 %v5773_v35 }
 0x2e5   :  { %5396 = vmatprep.subr.bf16.mxu1 %v5775_v13 }
 0x2e7   :  { %5540 = vmatmul.mubr.msk.bf16.gmra.mrb[12].mxu1 %vm3414_vm6, %v8178_v50  ;;  %v5765_v50 = vld [vmem:[%s8426_s5] sm:$0xff]  }
 0x2e8   :  { %5371 = vmatpush3.bf16.msra.mxu0 %v5765_v50  ;;  %5397 = vmatpush3.bf16.msra.mxu1 %v5777_v28  ;;  %v4505_v28 = vunpack.c.0.s8 %v4504_v51 }
 0x2e9   :  { %5372 = vmatprep.subr.bf16.mxu0 %v5766_v2  ;;  %5398 = vmatprep.subr.bf16.mxu1 %v5779_v34 }
 0x2ec   :  { %5373 = vmatpush3.bf16.msra.mxu0 %v5768_v15  ;;  %5399 = vmatpush3.bf16.msra.mxu1 %v5781_v33 }
 0x2ed   :  { %5374 = vmatprep.subr.bf16.mxu0 %v5770_v44  ;;  %5400 = vmatprep.subr.bf16.mxu1 %v5783_v4  ;;  %v5861_v4 = vmov 1934713408  }
 0x2f0   :  { %5375 = vmatpush3.bf16.msra.mxu0 %v5772_v10  ;;  %5401 = vmatpush3.bf16.msra.mxu1 %v5785_v43 }
 0x2f1   :  { %5376 = vmatprep.subr.bf16.mxu0 %v5774_v12  ;;  %5402 = vmatprep.subr.bf16.mxu1 %v5787_v30 }
 0x2f4   :  { %5377 = vmatpush3.bf16.msra.mxu0 %v5776_v24  ;;  %5403 = vmatpush3.bf16.msra.mxu1 %v5789_v22 }
 0x2f5   :  { %5378 = vmatprep.subr.bf16.mxu0 %v5778_v27 }
 0x2f8   :  { %5379 = vmatpush3.bf16.msra.mxu0 %v5780_v19 }
 0x2f9   :  { %5380 = vmatprep.subr.bf16.mxu0 %v5782_v18 }
 0x2fc   :  { %5381 = vmatpush3.bf16.msra.mxu0 %v5784_v32 }
 0x2fd   :  { %5382 = vmatprep.subr.bf16.mxu0 %v5786_v46 }
 0x300   :  { %5383 = vmatpush3.bf16.msra.mxu0 %v5788_v26 }
 0x309   :  { %v5429_v58 = vpop.f32.mrb[0].mxu1 }
 0x30a   :  { %v8273_v0 = vpop.f32.mrb[1].mxu1 }
 0x30b   :  { %v8275_v3 = vpop.f32.mrb[2].mxu1 }
 0x30c   :  { %v8277_v47 = vpop.f32.mrb[3].mxu1 }
 0x311   :  { %v8279_v59 = vpop.f32.mrb[4].mxu1 }
 0x312   :  { %v8281_v11 = vpop.f32.mrb[5].mxu1 }
 0x313   :  { %v8283_v6 = vpop.f32.mrb[6].mxu1 }
 0x314   :  { %v8285_v14 = vpop.f32.mrb[7].mxu1 }
 0x3ac   :  { %v5477_v9 = vpop.f32.mrb[0].mxu0 }
 0x3ad   :  { %v5563_v17 = vadd.f32 %v5477_v9, %v5429_v58  ;;  %v3979_v53 = vpop.f32.mrb[1].mxu0  ;;  %v8834_v9 = vld [vmem:[#allocation8_spill] sm:$0xff] }
 0x3ae   :  { %v5564_v55 = vadd.f32 %v3979_v53, %v8273_v0  ;;  %v5478_v16 = vpop.f32.mrb[2].mxu0 }
 0x3af   :  { %v5565_v54 = vadd.f32 %v5478_v16, %v8275_v3  ;;  %v3982_v61 = vpop.f32.mrb[3].mxu0  ;;  %v4456_v49 = vadd.f32 %v5563_v17, %v5255_v57  ;;  %v4508_v17 = vsub.s32 %v4505_v28, %v8834_v9 }
 0x3b0   :  { %v5566_v38 = vadd.f32 %v3982_v61, %v8277_v47  ;;  %v4454_v21 = vadd.f32 %v5564_v55, %v5255_v57 }
 0x3b1   :  { %v4457_v1 = vadd.f32 %v5565_v54, %v5255_v57  ;;  %v4464_v31 = vmax.f32 %v4456_v49, 0.0 }
 0x3b2   :  { %v5537_v8 = vpop.f32.mrb[8].mxu1  ;;  %v4455_v48 = vadd.f32 %v5566_v38, %v5255_v57  ;;  %v4462_v63 = vmax.f32 %v4454_v21, 0.0 }
 0x3b3   :  { %v4472_v25 = vadd.f32 %v5537_v8, %v5255_v57  ;;  %v4408_v37 = vpop.f32.mrb[9].mxu1  ;;  %v4465_v3 = vmax.f32 %v4457_v1, 0.0 }
 0x3b4   :  { %v4470_v7 = vadd.f32 %v5255_v57, %v4408_v37  ;;  %v5481_v60 = vpop.f32.mrb[4].mxu0  ;;  %v5538_v36 = vpop.f32.mrb[10].mxu1  ;;  %v4463_v5 = vmax.f32 %v4455_v48, 0.0  ;;  %v5790_v37 = vld [vmem:[%s8426_s5 + $0x78] sm:$0xff]  }
 0x3b5   :  { %v4480_v41 = vmax.f32 %v4472_v25, 0.0  ;;  %v5567_v20 = vadd.f32 %v5481_v60, %v8279_v59  ;;  %v4473_v23 = vadd.f32 %v5538_v36, %v5255_v57  ;;  %v3995_v62 = vpop.f32.mrb[5].mxu0  ;;  %v4411_v39 = vpop.f32.mrb[11].mxu1  ;;  %v5792_v48 = vld [vmem:[%s8426_s5 + $0x38] sm:$0xff]   ;;  %5384 = vmatprep.subr.bf16.mxu0 %v5790_v37 }
 0x3b6   :  { %v4478_v56 = vmax.f32 %v4470_v7, 0.0  ;;  %v5568_v45 = vadd.f32 %v3995_v62, %v8281_v11  ;;  %v4471_v58 = vadd.f32 %v5255_v57, %v4411_v39  ;;  %v5482_v0 = vpop.f32.mrb[6].mxu0  ;;  %5385 = vmatpush3.bf16.msra.mxu0 %v5792_v48  ;;  %v5795_v62 = vld [vmem:[%s8426_s5 + $0xb8] sm:$0xff]  }
 0x3b7   :  { %v4488_v47 = vmax.f32 %v4464_v31, %v4480_v41  ;;  %v4481_v42 = vmax.f32 %v4473_v23, 0.0  ;;  %v5569_v50 = vadd.f32 %v5482_v0, %v8283_v6  ;;  %v3998_v2 = vpop.f32.mrb[7].mxu0  ;;  %v4460_v15 = vadd.f32 %v5567_v20, %v5255_v57  ;;  %v5794_v23 = vld [vmem:[%s8426_s5 + $0xf8] sm:$0xff]  }
 0x3b8   :  { %v4486_v40 = vmax.f32 %v4462_v63, %v4478_v56  ;;  %v4479_v29 = vmax.f32 %v4471_v58, 0.0  ;;  %v5570_v59 = vadd.f32 %v3998_v2, %v8285_v14  ;;  %v4458_v35 = vadd.f32 %v5568_v45, %v5255_v57 }
 0x3b9   :  { %v4489_v44 = vmax.f32 %v4465_v3, %v4481_v42  ;;  %v4461_v12 = vadd.f32 %v5569_v50, %v5255_v57  ;;  %v4521_v6 = vunpack.c.l.s4 %v5861_v4  ;;  %v4468_v19 = vmax.f32 %v4460_v15, 0.0 }
 0x3ba   :  { %v4487_v13 = vmax.f32 %v4463_v5, %v4479_v29  ;;  %v5541_v10 = vpop.f32.mrb[12].mxu1  ;;  %v4459_v24 = vadd.f32 %v5570_v59, %v5255_v57  ;;  %v4466_v32 = vmax.f32 %v4458_v35, 0.0  ;;  %v8835_v0 = vmov 0  }
 0x3bb   :  { %v4476_v11 = vadd.f32 %v5541_v10, %v5255_v57  ;;  %v4424_v34 = vpop.f32.mrb[13].mxu1  ;;  %v4469_v22 = vmax.f32 %v4461_v12, 0.0  ;;  %v4522_v61 = vunpack.c.0.s8 %v4521_v6  ;;  %v5862_v59 = vmov 0.0  }
 0x3bc   :  { %v4474_v27 = vadd.f32 %v5255_v57, %v4424_v34  ;;  %v5542_v33 = vpop.f32.mrb[14].mxu1  ;;  %v4467_v55 = vmax.f32 %v4459_v24, 0.0  ;;  %5543 = vmatprep.subr.bf16.mxu0 %v5862_v59 }
 0x3bd   :  { %v4484_v18 = vmax.f32 %v4476_v11, 0.0  ;;  %v4477_v43 = vadd.f32 %v5542_v33, %v5255_v57  ;;  %v4427_v30 = vpop.f32.mrb[15].mxu1  ;;  %v4525_v36 = vsub.s32 %v4522_v61, %v8834_v9  ;;  %v5798_v9 = vld [vmem:[#allocation2 + $0x10] sm:$0xff]  }
 0x3be   :  { %v4482_v14 = vmax.f32 %v4474_v27, 0.0  ;;  %v4475_v46 = vadd.f32 %v5255_v57, %v4427_v30  ;;  %v5791_v57 = vld [vmem:[%s8426_s5 + $0xf0] sm:$0xff]  }
 0x3bf   :  { %v4492_v26 = vmax.f32 %v4468_v19, %v4484_v18  ;;  %v4485_v53 = vmax.f32 %v4477_v43, 0.0  ;;  %5404 = vmatprep.subr.bf16.mxu1 %v5791_v57  ;;  %v5796_v18 = vld [vmem:[#allocation2] sm:$0xff]  }
 0x3c0   :  { %v4490_v16 = vmax.f32 %v4466_v32, %v4482_v14  ;;  %v4483_v54 = vmax.f32 %v4475_v46, 0.0  ;;  %5405 = vmatpush3.bf16.msra.mxu1 %v5793_v52  ;;  %v5797_v46 = vld [vmem:[#allocation2 + $0x8] sm:$0xff]  }
 0x3c1   :  { %v5257_v38 = vpack.c.bf16 %v4492_v26, %v4488_v47  ;;  %v4493_v49 = vmax.f32 %v4469_v22, %v4485_v53  ;;  %5406 = vmatprep.subr.bf16.mxu1 %v5794_v23  ;;  %v5800_v53 = vld [vmem:[#allocation2 + $0x20] sm:$0xff]  }
 0x3c2   :  { %v5256_v21 = vpack.c.bf16 %v4490_v16, %v4486_v40  ;;  %v4491_v8 = vmax.f32 %v4467_v55, %v4483_v54  ;;  %v5801_v55 = vld [vmem:[#allocation2 + $0x28] sm:$0xff]   ;;  %v5802_v16 = vld [vmem:[#allocation2 + $0x30] sm:$0xff]   ;;  %v5803_v54 = vld [vmem:[#allocation2 + $0x38] sm:$0xff]  }
 0x3c3   :  { %v4517_v1 = vrot.slane %v5257_v38, %v4508_v17  ;;  %v5259_v25 = vpack.c.bf16 %v4493_v49, %v4489_v44 }
 0x3c4   :  { %v4509_v7 = vrot.slane %v5256_v21, %v4508_v17  ;;  %v5258_v60 = vpack.c.bf16 %v4491_v8, %v4487_v13  ;;  %5407 = vmatpush3.bf16.msra.mxu1 %v5795_v62  ;;  %v5260_v8 = vld [vmem:[%s8427_s6] ss:$0 sm:$0xff]  ;;  %s5829_s6 = scalar_lea.vmem %s5083_s23, 128 }
 0x3c5   :  { %v4551_v51 = vrot.slane %v5259_v25, %v4508_v17  ;;  %p5830_p8 = scmp.ne.s32.totalorder %s5083_s23, %s5829_s6  ;;  %p5835_p10 = scmp.lt.s32.totalorder %s5829_s6, %s5829_s6 }
 0x3c6   :  { %v4518_v31 = vcombine.low %v4509_v7, %v4517_v1  ;;  %v4519_v41 = vcombine.high %v4509_v7, %v4517_v1  ;;  %v4543_v20 = vrot.slane %v5258_v60, %v4508_v17  ;;  %v5799_v17 = vld [vmem:[#allocation2 + $0x18] sm:$0xff]  }
 0x3c7   :  { %p5836_p11 = por %p5835_p10, %p5834_p9 }
 0x3c8   :  { %v4552_v39 = vcombine.low %v4543_v20, %v4551_v51  ;;  %v4553_v63 = vcombine.high %v4543_v20, %v4551_v51  ;;  %v4526_v56 = vrot.slane %v4518_v31, %v4525_v36  ;;  %v4533_v45 = vrot.slane %v4519_v41, %v4525_v36  ;;  %v5293_v31 = vld [vmem:[%s8429_s8] ss:$0 sm:$0xff] }
 0x3c9   :  { %p5837_p12 = pnand %p5836_p11, %p5830_p8 }
 0x3ca   :  { %v4560_v58 = vrot.slane %v4552_v39, %v4525_v36  ;;  %v4534_v3 = vcombine.high %v4526_v56, %v8835_v0  ;;  %v4567_v47 = vrot.slane %v4553_v63, %v4525_v36  ;;  %v4573_v42 = vshrl.u32 %v4526_v56, 16 }
 0x3cb   :  { %v4535_v50 = vcombine.high %v4533_v45, %v8835_v0  ;;  %v4585_v40 = vshrl.u32 %v4533_v45, 16 }
 0x3cc   :  { %v4574_v2 = vshrl.u32 %v4560_v58, 16  ;;  %v4568_v5 = vcombine.high %v4560_v58, %v8835_v0  ;;  %v4586_v29 = vshrl.u32 %v4567_v47, 16  ;;  %v4579_v15 = vshrl.u32 %v4534_v3, 16 }
 0x3cd   :  { %v4569_v44 = vcombine.high %v4567_v47, %v8835_v0  ;;  %v4572_v35 = vpack.i.b16 %v4560_v58, %v4526_v56  ;;  %v4584_v13 = vpack.i.b16 %v4567_v47, %v4533_v45  ;;  %v4591_v34 = vshrl.u32 %v4535_v50, 16 }
 0x3ce   :  { %v4575_v10 = vpack.i.b16 %v4574_v2, %v4573_v42  ;;  %v4580_v12 = vshrl.u32 %v4568_v5, 16  ;;  %v4587_v11 = vpack.i.b16 %v4586_v29, %v4585_v40  ;;  %v4578_v28 = vpack.i.b16 %v4568_v5, %v4534_v3 }
 0x3cf   :  { %v4592_v24 = vshrl.u32 %v4569_v44, 16  ;;  %v4590_v27 = vpack.i.b16 %v4569_v44, %v4535_v50 }
 0x3d0   :  { %4594 = vrot.lane.b32.xlu1 %v4575_v10, %s5856_s19  ;;  %v4581_v33 = vpack.i.b16 %v4580_v12, %v4579_v15 }
 0x3d1   :  { %v4593_v4 = vpack.i.b16 %v4592_v24, %v4591_v34 }
 0x3d2   :  { %4596 = vrot.lane.b32.xlu0 %v4581_v33, %s5856_s19 }
 0x3d4   :  { %4598 = vrot.lane.b32.xlu1 %v4587_v11, %s5856_s19 }
 0x3d6   :  { %4600 = vrot.lane.b32.xlu0 %v4593_v4, %s5856_s19 }
 0x442   :  { %v4595_v6 = vpop.permute.xlu1 %4594 }
 0x443   :  { %v4605_v30 = vsel %vm4602_vm10, %v4572_v35, %v4595_v6 }
 0x444   :  { %v4597_v19 = vpop.permute.xlu0 %4596 }
 0x445   :  { %v4609_v43 = vsel %vm4602_vm10, %v4578_v28, %v4597_v19 }
 0x446   :  { %4914 = vmatprep.mubr.bf16.mxu0 %v4609_v43  ;;  %v4599_v32 = vpop.permute.xlu1 %4598 }
 0x447   :  { %4915 = vmatmul.mubr.bf16.vlgmr.msra.gmra.mrb[8].mxu0 %v4605_v30  ;;  %v4613_v26 = vsel %vm4602_vm10, %v4584_v13, %v4599_v32 }
 0x448   :  { %v4601_v14 = vpop.permute.xlu0 %4600  ;;  %5544 = vmatpush3.bf16.msra.mxu0 %v5796_v18  ;;  %5559 = vmatprep.mubr.msk.bf16.mxu0 %vm5863_vm11, %v5862_v59 }
 0x449   :  { %v4617_v22 = vsel %vm4602_vm10, %v4590_v27, %v4601_v14  ;;  %5545 = vmatprep.subr.bf16.mxu0 %v5862_v59 }
 0x44a   :  { %4954 = vmatprep.mubr.bf16.mxu1 %v4617_v22 }
 0x44b   :  { %4955 = vmatmul.mubr.bf16.vlgmr.msra.gmra.mrb[16].mxu1 %v4613_v26 }
 0x44c   :  { %5546 = vmatpush3.bf16.msra.mxu0 %v5797_v46 }
 0x44d   :  { %5547 = vmatprep.subr.bf16.mxu0 %v5862_v59 }
 0x450   :  { %5548 = vmatpush3.bf16.msra.mxu0 %v5798_v9 }
 0x451   :  { %5549 = vmatprep.subr.bf16.mxu0 %v5862_v59 }
 0x454   :  { %5550 = vmatpush3.bf16.msra.mxu0 %v5799_v17 }
 0x455   :  { %5551 = vmatprep.subr.bf16.mxu0 %v5862_v59 }
 0x458   :  { %5552 = vmatpush3.bf16.msra.mxu0 %v5800_v53 }
 0x459   :  { %5553 = vmatprep.subr.bf16.mxu0 %v5862_v59 }
 0x45c   :  { %5554 = vmatpush3.bf16.msra.mxu0 %v5801_v55 }
 0x45d   :  { %5555 = vmatprep.subr.bf16.mxu0 %v5862_v59 }
 0x460   :  { %5556 = vmatpush3.bf16.msra.mxu0 %v5802_v16 }
 0x461   :  { %5557 = vmatprep.subr.bf16.mxu0 %v5862_v59 }
 0x464   :  { %5558 = vmatpush3.bf16.msra.mxu0 %v5803_v54 }
 0x51a   :  { %v5386_v61 = vpop.f32.mrb[8].mxu0 }
 0x51b   :  { %v5387_v38 = vpop.f32.mrb[9].mxu0 }
 0x51c   :  { %v5388_v49 = vadd.f32 %v5387_v38, %v5386_v61  ;;  %v5389_v21 = vpop.f32.mrb[10].mxu0 }
 0x51d   :  { %v5390_v1 = vpop.f32.mrb[11].mxu0 }
 0x51e   :  { %v5408_v25 = vpop.f32.mrb[16].mxu1  ;;  %v4917_v57 = vadd.f32 %v5388_v49, %v5260_v8 }
 0x51f   :  { %v5409_v37 = vpop.f32.mrb[17].mxu1 }
 0x520   :  { %v5410_v48 = vadd.f32 %v5409_v37, %v5408_v25  ;;  %v5411_v7 = vpop.f32.mrb[18].mxu1 }
 0x521   :  { %v5412_v60 = vpop.f32.mrb[19].mxu1 }
 0x522   :  { %v4957_v36 = vadd.f32 %v5410_v48, %v4917_v57 }
 0x524   :  { %v4962_v52 = vmax.f32 %v4957_v36, 0.0 }
 0x526   :  { %v4963_v51 = vpack.c.bf16 %v4962_v52, %v4962_v52 }
 0x528   :  { %5560 = vmatmul.mubr.bf16.vlgmr.msra.gmra.mrb[12].mxu0 %v4963_v51 }
 0x5fb   :  { %v5069_v41 = vpop.f32.mrb[12].mxu0 }
 0x5fc   :  { %v5070_v20 = vadd.f32 %v5293_v31, %v5069_v41  ;;  %v5561_v23 = vpop.f32.mrb[13].mxu0 }
 0x5fd   :  { %v5072_v62 = vpop.f32.mrb[14].mxu0 }
 0x5fe   :  { %5075 = vst [vmem:[#allocation5] sm:$0xff] %v5070_v20  ;;  %v5562_v39 = vpop.f32.mrb[15].mxu0 }
 0x5ff   :  { %5840 = shalt.err (!%p5837_p12)
}
 0x600   :  { %s5841_s8 = scalar_lea.hbm %s8430_s9, 128 }
 0x601   :  { %p5842_p13 = scmp.ne.s32.totalorder %s8430_s9, %s5841_s8  ;;  %p5845_p0 = scmp.lt.u32.totalorder %s5841_s8, %s8430_s9 }
 0x603   :  { %p5847_p1 = pnand %p5845_p0, %p5842_p13 }
 0x605   :  { %5850 = shalt.err (!%p5847_p1)
}
 0x606   :  { %5085 = dma.vmem_to_hbm [thread:$0]  %s5083_s23, 128, %s8430_s9, [#allocation4]  }
 0x607   :  { %5853 = dma.done.wait [#allocation4], 128  }
 0x608   :  { %5854 = vsyncadd [#allocation4], 4294967168 }
 0x609   :  { %5089 = vsyncpa [#allocation3], 1 }
 0x60a   :  { %5090 = vsyncpa [#allocation4], 1 }

</bundles_post_ra>
